<compile_context>
chip_gen: v6e
topology: v6e:2x2x1
jax: 0.10.0
libtpu: 0.0.40
codegen_flags: <defaults>
</compile_context>

<pallas_src>
import jax
import jax.numpy as jnp
from jax import lax
from jax.experimental import pallas as pl
from jax.experimental.pallas import tpu as pltpu


# ---------------------------------------------------------------------------
# Helpers
# ---------------------------------------------------------------------------

def _round_up(n, m):
    return ((n + m - 1) // m) * m


def _pad_axis(a, axis, new_size):
    if a.shape[axis] == new_size:
        return a
    pad = [(0, 0)] * a.ndim
    pad[axis] = (0, new_size - a.shape[axis])
    return jnp.pad(a, pad)


# ---------------------------------------------------------------------------
# Fused Pallas kernel: all LSTM layers + FC head
# ---------------------------------------------------------------------------

def fused_lstm_fc_kernel(x_ref, wih0_ref, wih_rest_ref, whh_ref, b_ref,
                         wfc_ref, bfc_ref, out_ref,
                         seq_ref, proj_ref, h_ref, c_ref):
    """One (batch-tile, time-tile) grid step of the fused model.

    x_ref:        (Tt, Bt, Ip)      time-major input tile (compute dtype)
    wih0_ref:     (Ip, 4Hp)         layer-0 input->hidden weights (transposed, compute dtype)
    wih_rest_ref: (max(L-1,1), Hp, 4Hp)  layers 1.. input->hidden weights
    whh_ref:      (L, Hp, 4Hp)      hidden->hidden weights
    b_ref:        (L, 1, 4Hp)       fused biases (f32)
    wfc_ref:      (Hp, Op)          FC weights (transposed, compute dtype)
    bfc_ref:      (1, Op)           FC bias (f32)
    out_ref:      (Bt, Op)          FC output (written only at the last time tile)
    seq_ref:      (Tt, Bt, Hp)      scratch: current layer's output sequence (compute dtype)
    proj_ref:     (Tt, Bt, 4Hp)     scratch: hoisted input projection + bias (f32)
    h_ref, c_ref: (L, Bt, Hp)       scratch: recurrent state carried across time tiles (f32)
    """
    t_idx = pl.program_id(1)
    Tt, Bt, Ip = x_ref.shape
    L = whh_ref.shape[0]
    G = whh_ref.shape[2]
    Hp = G // 4
    cd = whh_ref.dtype  # matmul compute dtype

    # Re-initialize the recurrent state at the start of each batch tile's time axis.
    @pl.when(t_idx == 0)
    def _():
        h_ref[...] = jnp.zeros_like(h_ref)
        c_ref[...] = jnp.zeros_like(c_ref)

    def run_layer(layer, wih_t, x2d, is_last_layer):
        # Hoisted input projection: one large MXU matmul over the whole time tile,
        # with the bias folded in once (not per step).
        proj = jnp.dot(x2d, wih_t, preferred_element_type=jnp.float32)
        proj_ref[...] = (proj + b_ref[layer]).reshape(Tt, Bt, G)

        whh_t = whh_ref[layer]  # (Hp, 4Hp)

        def step(t, carry):
            h, c = carry  # f32 (Bt, Hp)
            gates = proj_ref[t] + jnp.dot(
                h.astype(cd), whh_t, preferred_element_type=jnp.float32)
            # Full-tile activations (2 EUP passes), slice after.
            sig = jax.nn.sigmoid(gates)
            th = jnp.tanh(gates)
            i_g = sig[:, 0 * Hp:1 * Hp]
            f_g = sig[:, 1 * Hp:2 * Hp]
            g_g = th[:, 2 * Hp:3 * Hp]
            o_g = sig[:, 3 * Hp:4 * Hp]
            c_new = f_g * c + i_g * g_g
            h_new = o_g * jnp.tanh(c_new)
            if not is_last_layer:
                # Only the next layer needs the full sequence; the last layer skips
                # per-timestep stores entirely.
                seq_ref[t] = h_new.astype(seq_ref.dtype)
            return (h_new, c_new)

        h_fin, c_fin = lax.fori_loop(0, Tt, step, (h_ref[layer], c_ref[layer]),
                                     unroll=True)
        h_ref[layer] = h_fin
        c_ref[layer] = c_fin
        return h_fin

    # Layer 0: input is the x tile.
    x2d = x_ref[...].reshape(Tt * Bt, Ip)
    h_last = run_layer(0, wih0_ref[...], x2d, L == 1)

    # Layers 1..L-1: input is the previous layer's sequence held in VMEM scratch.
    for layer in range(1, L):
        x2d = seq_ref[...].reshape(Tt * Bt, Hp)
        h_last = run_layer(layer, wih_rest_ref[layer - 1], x2d, layer == L - 1)

    # FC head on the final layer's last hidden state, only at the last time tile.
    # Dropout(p=0.1) is identity in eval mode.
    # TODO(synk): training-mode dropout (random mask + 1/(1-p) scaling) not implemented.
    @pl.when(t_idx == pl.num_programs(1) - 1)
    def _():
        out_ref[...] = (
            jnp.dot(h_last.astype(cd), wfc_ref[...],
                    preferred_element_type=jnp.float32)
            + bfc_ref[...]
        )


# ---------------------------------------------------------------------------
# Wrapper
# ---------------------------------------------------------------------------

def lstm_model_forward(x, prep, *, t_tile=None, b_tile=None,
                       compute_dtype=jnp.bfloat16):
    """Forward pass matching LSTMModel.forward (eval mode).

    x: (B, T, input_size) float32, batch_first like PyTorch.
    prep: output of prepare_params() (pre-transposed / pre-padded weights).
    """
    input_size, hidden_size, L, output_size, Ip, Hp, Op = prep["dims"]
    B, T, _ = x.shape
    G = 4 * Hp

    sublane = 8 if compute_dtype == jnp.float32 else 16
    Bp = _round_up(B, sublane)

    if t_tile is None:
        t_tile = T
    if b_tile is None:
        b_tile = Bp
    if T % t_tile != 0:
        raise ValueError(f"t_tile={t_tile} must divide T={T}")
    if Bp % b_tile != 0:
        raise ValueError(f"b_tile={b_tile} must divide padded batch {Bp}")

    # Time-major, padded, compute-dtype input (done once outside the kernel).
    x_tm = jnp.transpose(x, (1, 0, 2))                     # (T, B, I)
    x_tm = _pad_axis(_pad_axis(x_tm, 1, Bp), 2, Ip).astype(compute_dtype)

    # Matmul operands in compute dtype; biases stay f32 (added to f32 accumulators).
    wih0 = prep["wih0"].astype(compute_dtype)
    wih_rest = prep["wih_rest"].astype(compute_dtype)
    whh = prep["whh"].astype(compute_dtype)
    wfc = prep["wfc"].astype(compute_dtype)
    b = prep["b"]
    bfc = prep["bfc"]

    grid = (Bp // b_tile, T // t_tile)

    out = pl.pallas_call(
        fused_lstm_fc_kernel,
        out_shape=jax.ShapeDtypeStruct((Bp, Op), jnp.float32),
        grid_spec=pltpu.PrefetchScalarGridSpec(
            num_scalar_prefetch=0,
            grid=grid,
            in_specs=[
                pl.BlockSpec((t_tile, b_tile, Ip), lambda bi, ti: (ti, bi, 0)),
                pl.BlockSpec((Ip, G), lambda bi, ti: (0, 0)),
                pl.BlockSpec((max(L - 1, 1), Hp, G), lambda bi, ti: (0, 0, 0)),
                pl.BlockSpec((L, Hp, G), lambda bi, ti: (0, 0, 0)),
                pl.BlockSpec((L, 1, G), lambda bi, ti: (0, 0, 0)),
                pl.BlockSpec((Hp, Op), lambda bi, ti: (0, 0)),
                pl.BlockSpec((1, Op), lambda bi, ti: (0, 0)),
            ],
            out_specs=pl.BlockSpec((b_tile, Op), lambda bi, ti: (bi, 0)),
            scratch_shapes=[
                pltpu.VMEM((t_tile, b_tile, Hp), compute_dtype),  # seq buffer
                pltpu.VMEM((t_tile, b_tile, G), jnp.float32),     # input-proj buffer
                pltpu.VMEM((L, b_tile, Hp), jnp.float32),         # h state (carried)
                pltpu.VMEM((L, b_tile, Hp), jnp.float32),         # c state (carried)
            ],
        ),
        compiler_params=pltpu.CompilerParams(
            dimension_semantics=("parallel", "arbitrary")),
    )(x_tm, wih0, wih_rest, whh, b, wfc, bfc)

    return out[:B, :output_size]


# ---------------------------------------------------------------------------
# One-time parameter preparation (transpose / pad / fuse biases)
# ---------------------------------------------------------------------------

def prepare_params(params, input_size, hidden_size, num_layers, output_size,
                   lane=128):
    Hp = _round_up(hidden_size, lane)
    Ip = _round_up(input_size, lane)
    Op = _round_up(output_size, lane)
    G = 4 * Hp

    wih0 = None
    wih_rest = []
    whh_all = []
    b_all = []
    for layer, (w_ih, w_hh, b_ih, b_hh) in enumerate(params["lstm"]):
        in_sz = w_ih.shape[1]
        in_p = Ip if layer == 0 else Hp
        # Pad each gate block separately so [i, f, g, o] slices stay aligned at Hp.
        w = w_ih.reshape(4, hidden_size, in_sz)
        w = _pad_axis(_pad_axis(w, 1, Hp), 2, in_p).reshape(G, in_p)
        w_t = jnp.transpose(w)                                   # (in_p, 4Hp)
        wh = w_hh.reshape(4, hidden_size, hidden_size)
        wh = _pad_axis(_pad_axis(wh, 1, Hp), 2, Hp).reshape(G, Hp)
        wh_t = jnp.transpose(wh)                                 # (Hp, 4Hp)
        bias = (b_ih + b_hh).reshape(4, hidden_size)
        bias = _pad_axis(bias, 1, Hp).reshape(1, G)
        if layer == 0:
            wih0 = w_t
        else:
            wih_rest.append(w_t)
        whh_all.append(wh_t)
        b_all.append(bias)

    if wih_rest:
        wih_rest = jnp.stack(wih_rest)                           # (L-1, Hp, 4Hp)
    else:
        wih_rest = jnp.zeros((1, Hp, G), jnp.float32)            # dummy, never read

    whh_all = jnp.stack(whh_all)                                 # (L, Hp, 4Hp)
    b_all = jnp.stack(b_all)                                     # (L, 1, 4Hp)

    w_fc, b_fc = params["fc"]
    wfc = _pad_axis(_pad_axis(jnp.transpose(w_fc), 0, Hp), 1, Op)  # (Hp, Op)
    bfc = _pad_axis(b_fc[None, :], 1, Op)                          # (1, Op)

    return {
        "wih0": wih0, "wih_rest": wih_rest, "whh": whh_all, "b": b_all,
        "wfc": wfc, "bfc": bfc,
        "dims": (input_size, hidden_size, num_layers, output_size, Ip, Hp, Op),
    }


# ---------------------------------------------------------------------------
# Deterministic parameter init (PyTorch-style shapes)
# ---------------------------------------------------------------------------

def init_params(key, input_size, hidden_size, num_layers, output_size):
    lstm_params = []
    bound = 1.0 / jnp.sqrt(hidden_size)
    for layer in range(num_layers):
        in_sz = input_size if layer == 0 else hidden_size
        key, k1, k2, k3, k4 = jax.random.split(key, 5)
        w_ih = jax.random.uniform(k1, (4 * hidden_size, in_sz), jnp.float32, -bound, bound)
        w_hh = jax.random.uniform(k2, (4 * hidden_size, hidden_size), jnp.float32, -bound, bound)
        b_ih = jax.random.uniform(k3, (4 * hidden_size,), jnp.float32, -bound, bound)
        b_hh = jax.random.uniform(k4, (4 * hidden_size,), jnp.float32, -bound, bound)
        lstm_params.append((w_ih, w_hh, b_ih, b_hh))
    key, k5, k6 = jax.random.split(key, 3)
    fc_bound = 1.0 / jnp.sqrt(hidden_size)
    w_fc = jax.random.uniform(k5, (output_size, hidden_size), jnp.float32, -fc_bound, fc_bound)
    b_fc = jax.random.uniform(k6, (output_size,), jnp.float32, -fc_bound, fc_bound)
    return {"lstm": lstm_params, "fc": (w_fc, b_fc)}


# ---------------------------------------------------------------------------
# Pure-JAX reference (same math, no Pallas) for correctness checks
# ---------------------------------------------------------------------------

def reference_forward(x, params):
    B = x.shape[0]
    seq = x
    for (w_ih, w_hh, b_ih, b_hh) in params["lstm"]:
        H = w_hh.shape[1]
        h = jnp.zeros((B, H), jnp.float32)
        c = jnp.zeros((B, H), jnp.float32)
        outs = []
        for t in range(seq.shape[1]):
            gates = seq[:, t, :] @ w_ih.T + h @ w_hh.T + b_ih + b_hh
            i_g = jax.nn.sigmoid(gates[:, 0:H])
            f_g = jax.nn.sigmoid(gates[:, H:2 * H])
            g_g = jnp.tanh(gates[:, 2 * H:3 * H])
            o_g = jax.nn.sigmoid(gates[:, 3 * H:4 * H])
            c = f_g * c + i_g * g_g
            h = o_g * jnp.tanh(c)
            outs.append(h)
        seq = jnp.stack(outs, axis=1)
    last = seq[:, -1, :]
    w_fc, b_fc = params["fc"]
    return last @ w_fc.T + b_fc


# ---------------------------------------------------------------------------
# Main
# ---------------------------------------------------------------------------

if __name__ == "__main__":
    B, T = 2, 8
    input_size, hidden_size, num_layers, output_size = 4, 32, 2, 1

    key = jax.random.PRNGKey(0)
    key, kx = jax.random.split(key)
    x = jax.random.normal(kx, (B, T, input_size), dtype=jnp.float32)

    params = init_params(key, input_size, hidden_size, num_layers, output_size)
    prep = prepare_params(params, input_size, hidden_size, num_layers, output_size)

    ref = reference_forward(x, params)

    # f32 matmuls: tight correctness check (t_tile=4 exercises the carried h/c state
    # across two time tiles of the grid).
    out_f32 = lstm_model_forward(x, prep, t_tile=4, compute_dtype=jnp.float32)
    out_f32 = jax.block_until_ready(out_f32)
    assert out_f32.shape == (B, output_size)
    assert jnp.allclose(out_f32, ref, atol=1e-5, rtol=1e-5), (out_f32, ref)

    # bf16 matmuls (f32 accumulation + f32 gate math): looser check.
    out_bf16 = lstm_model_forward(x, prep, t_tile=4, compute_dtype=jnp.bfloat16)
    out_bf16 = jax.block_until_ready(out_bf16)
    assert out_bf16.shape == (B, output_size)
    assert jnp.allclose(out_bf16, ref, atol=5e-2, rtol=5e-2), (out_bf16, ref)

    print("KERNEL_OK")
</pallas_src>

<mosaic_0001>
module attributes {stable_mosaic.version = 11 : i64} {
  func.func @fused_lstm_fc_kernel(%arg0: i32, %arg1: i32, %arg2: memref<4x8x128xf32, #tpu.memory_space<vmem>>, %arg3: memref<128x512xf32, #tpu.memory_space<vmem>>, %arg4: memref<1x128x512xf32, #tpu.memory_space<vmem>>, %arg5: memref<2x128x512xf32, #tpu.memory_space<vmem>>, %arg6: memref<2x1x512xf32, #tpu.memory_space<vmem>>, %arg7: memref<128x128xf32, #tpu.memory_space<vmem>>, %arg8: memref<1x128xf32, #tpu.memory_space<vmem>>, %arg9: memref<8x128xf32, #tpu.memory_space<vmem>>, %arg10: memref<4x8x128xf32, #tpu.memory_space<vmem>>, %arg11: memref<4x8x512xf32, #tpu.memory_space<vmem>>, %arg12: memref<2x8x128xf32, #tpu.memory_space<vmem>>, %arg13: memref<2x8x128xf32, #tpu.memory_space<vmem>>) attributes {dimension_semantics = [#tpu.dimension_semantics<parallel>, #tpu.dimension_semantics<arbitrary>], iteration_bounds = array<i64: 1, 2>, scalar_prefetch = 0 : i64, scratch_operands = 4 : i64, tpu.core_type = #tpu.core_type<tc>, window_params = [{transform_indices = @transform_0, window_bounds = array<i64: 4, 8, 128>}, {pipeline_mode = #tpu.pipeline_mode<synchronous>, transform_indices = @transform_1, window_bounds = array<i64: 128, 512>}, {pipeline_mode = #tpu.pipeline_mode<synchronous>, transform_indices = @transform_2, window_bounds = array<i64: 1, 128, 512>}, {pipeline_mode = #tpu.pipeline_mode<synchronous>, transform_indices = @transform_3, window_bounds = array<i64: 2, 128, 512>}, {pipeline_mode = #tpu.pipeline_mode<synchronous>, transform_indices = @transform_4, window_bounds = array<i64: 2, 1, 512>}, {pipeline_mode = #tpu.pipeline_mode<synchronous>, transform_indices = @transform_5, window_bounds = array<i64: 128, 128>}, {pipeline_mode = #tpu.pipeline_mode<synchronous>, transform_indices = @transform_6, window_bounds = array<i64: 1, 128>}, {transform_indices = @transform_7, window_bounds = array<i64: 8, 128>}]} {
    %c0_i32 = arith.constant 0 : i32
    %0 = arith.cmpi eq, %arg1, %c0_i32 : i32
    %1 = arith.extui %0 : i1 to i32
    %c0_i32_0 = arith.constant 0 : i32
    %2 = arith.cmpi ne, %1, %c0_i32_0 : i32
    scf.if %2 {
      %cst_101 = arith.constant 0.000000e+00 : f32
      %227 = vector.broadcast %cst_101 : f32 to vector<2x8x128xf32>
      %c0_102 = arith.constant 0 : index
      %c0_103 = arith.constant 0 : index
      %c0_104 = arith.constant 0 : index
      %228 = vector.load %arg12[%c0_102, %c0_103, %c0_104] : memref<2x8x128xf32, #tpu.memory_space<vmem>>, vector<2x8x128xf32>
      tpu.vector_store %arg12[%c0_102, %c0_103, %c0_104], %227 {strides = array<i32>} : memref<2x8x128xf32, #tpu.memory_space<vmem>>, vector<2x8x128xf32>,
      %cst_105 = arith.constant 0.000000e+00 : f32
      %229 = vector.broadcast %cst_105 : f32 to vector<2x8x128xf32>
      %c0_106 = arith.constant 0 : index
      %c0_107 = arith.constant 0 : index
      %c0_108 = arith.constant 0 : index
      %230 = vector.load %arg13[%c0_106, %c0_107, %c0_108] : memref<2x8x128xf32, #tpu.memory_space<vmem>>, vector<2x8x128xf32>
      tpu.vector_store %arg13[%c0_106, %c0_107, %c0_108], %229 {strides = array<i32>} : memref<2x8x128xf32, #tpu.memory_space<vmem>>, vector<2x8x128xf32>,
    } else {
    }
    %c0 = arith.constant 0 : index
    %c0_1 = arith.constant 0 : index
    %c0_2 = arith.constant 0 : index
    %3 = vector.load %arg2[%c0, %c0_1, %c0_2] : memref<4x8x128xf32, #tpu.memory_space<vmem>>, vector<4x8x128xf32>
    %4 = vector.shape_cast %3 : vector<4x8x128xf32> to vector<32x128xf32>
    %c0_3 = arith.constant 0 : index
    %c0_4 = arith.constant 0 : index
    %5 = vector.load %arg3[%c0_3, %c0_4] : memref<128x512xf32, #tpu.memory_space<vmem>>, vector<128x512xf32>
    %cst = arith.constant dense<0.000000e+00> : vector<32x512xf32>
    %6 = tpu.matmul %4, %5, %cst {dimension_numbers = #tpu.dot_dimension_numbers<[1], [0], [0], [1], [0, 0, 1, 1], [], []>} : vector<32x128xf32>, vector<128x512xf32>, vector<32x512xf32> -> vector<32x512xf32>
    %c0_5 = arith.constant 0 : index
    %c0_6 = arith.constant 0 : index
    %c0_7 = arith.constant 0 : index
    %7 = vector.load %arg6[%c0_5, %c0_6, %c0_7] : memref<2x1x512xf32, #tpu.memory_space<vmem>>, vector<1x1x512xf32>
    %8 = vector.shape_cast %7 : vector<1x1x512xf32> to vector<1x512xf32>
    %9 = vector.broadcast %8 : vector<1x512xf32> to vector<32x512xf32>
    %10 = arith.addf %6, %9 : vector<32x512xf32>
    %11 = vector.shape_cast %10 : vector<32x512xf32> to vector<4x8x512xf32>
    %c0_8 = arith.constant 0 : index
    %c0_9 = arith.constant 0 : index
    %c0_10 = arith.constant 0 : index
    %12 = vector.load %arg11[%c0_8, %c0_9, %c0_10] : memref<4x8x512xf32, #tpu.memory_space<vmem>>, vector<4x8x512xf32>
    tpu.vector_store %arg11[%c0_8, %c0_9, %c0_10], %11 {strides = array<i32>} : memref<4x8x512xf32, #tpu.memory_space<vmem>>, vector<4x8x512xf32>,
    %c0_11 = arith.constant 0 : index
    %c0_12 = arith.constant 0 : index
    %c0_13 = arith.constant 0 : index
    %13 = vector.load %arg5[%c0_11, %c0_12, %c0_13] : memref<2x128x512xf32, #tpu.memory_space<vmem>>, vector<1x128x512xf32>
    %14 = vector.shape_cast %13 : vector<1x128x512xf32> to vector<128x512xf32>
    %c0_14 = arith.constant 0 : index
    %c0_15 = arith.constant 0 : index
    %c0_16 = arith.constant 0 : index
    %15 = vector.load %arg12[%c0_14, %c0_15, %c0_16] : memref<2x8x128xf32, #tpu.memory_space<vmem>>, vector<1x8x128xf32>
    %16 = vector.shape_cast %15 : vector<1x8x128xf32> to vector<8x128xf32>
    %c0_17 = arith.constant 0 : index
    %c0_18 = arith.constant 0 : index
    %c0_19 = arith.constant 0 : index
    %17 = vector.load %arg13[%c0_17, %c0_18, %c0_19] : memref<2x8x128xf32, #tpu.memory_space<vmem>>, vector<1x8x128xf32>
    %18 = vector.shape_cast %17 : vector<1x8x128xf32> to vector<8x128xf32>
    %c0_i32_20 = arith.constant 0 : i32
    %19 = arith.index_cast %c0_i32_20 : i32 to index
    %c0_21 = arith.constant 0 : index
    %c0_22 = arith.constant 0 : index
    %20 = vector.load %arg11[%19, %c0_21, %c0_22] : memref<4x8x512xf32, #tpu.memory_space<vmem>>, vector<1x8x512xf32>
    %21 = vector.shape_cast %20 : vector<1x8x512xf32> to vector<8x512xf32>
    %cst_23 = arith.constant dense<0.000000e+00> : vector<8x512xf32>
    %22 = tpu.matmul %16, %14, %cst_23 {dimension_numbers = #tpu.dot_dimension_numbers<[1], [0], [0], [1], [0, 0, 1, 1], [], []>} : vector<8x128xf32>, vector<128x512xf32>, vector<8x512xf32> -> vector<8x512xf32>
    %23 = arith.addf %21, %22 : vector<8x512xf32>
    %24 = arith.negf %23 : vector<8x512xf32>
    %25 = math.exp %24 : vector<8x512xf32>
    %cst_24 = arith.constant 1.000000e+00 : f32
    %26 = vector.broadcast %cst_24 : f32 to vector<8x512xf32>
    %27 = arith.addf %26, %25 : vector<8x512xf32>
    %28 = arith.divf %26, %27 : vector<8x512xf32>
    %29 = math.tanh %23 : vector<8x512xf32>
    %30 = vector.extract_strided_slice %28 {offsets = [0, 0], sizes = [8, 128], strides = [1, 1]} : vector<8x512xf32> to vector<8x128xf32>
    %31 = vector.extract_strided_slice %28 {offsets = [0, 128], sizes = [8, 128], strides = [1, 1]} : vector<8x512xf32> to vector<8x128xf32>
    %32 = vector.extract_strided_slice %29 {offsets = [0, 256], sizes = [8, 128], strides = [1, 1]} : vector<8x512xf32> to vector<8x128xf32>
    %33 = vector.extract_strided_slice %28 {offsets = [0, 384], sizes = [8, 128], strides = [1, 1]} : vector<8x512xf32> to vector<8x128xf32>
    %34 = arith.mulf %31, %18 : vector<8x128xf32>
    %35 = arith.mulf %30, %32 : vector<8x128xf32>
    %36 = arith.addf %34, %35 : vector<8x128xf32>
    %37 = math.tanh %36 : vector<8x128xf32>
    %38 = arith.mulf %33, %37 : vector<8x128xf32>
    %39 = arith.index_cast %c0_i32_20 : i32 to index
    %c0_25 = arith.constant 0 : index
    %c0_26 = arith.constant 0 : index
    %40 = vector.load %arg10[%39, %c0_25, %c0_26] : memref<4x8x128xf32, #tpu.memory_space<vmem>>, vector<1x8x128xf32>
    %41 = vector.shape_cast %40 : vector<1x8x128xf32> to vector<8x128xf32>
    %42 = vector.shape_cast %38 : vector<8x128xf32> to vector<1x8x128xf32>
    tpu.vector_store %arg10[%39, %c0_25, %c0_26], %42 {strides = array<i32>} : memref<4x8x128xf32, #tpu.memory_space<vmem>>, vector<1x8x128xf32>,
    %c1_i32 = arith.constant 1 : i32
    %43 = arith.index_cast %c1_i32 : i32 to index
    %c0_27 = arith.constant 0 : index
    %c0_28 = arith.constant 0 : index
    %44 = vector.load %arg11[%43, %c0_27, %c0_28] : memref<4x8x512xf32, #tpu.memory_space<vmem>>, vector<1x8x512xf32>
    %45 = vector.shape_cast %44 : vector<1x8x512xf32> to vector<8x512xf32>
    %cst_29 = arith.constant dense<0.000000e+00> : vector<8x512xf32>
    %46 = tpu.matmul %38, %14, %cst_29 {dimension_numbers = #tpu.dot_dimension_numbers<[1], [0], [0], [1], [0, 0, 1, 1], [], []>} : vector<8x128xf32>, vector<128x512xf32>, vector<8x512xf32> -> vector<8x512xf32>
    %47 = arith.addf %45, %46 : vector<8x512xf32>
    %48 = arith.negf %47 : vector<8x512xf32>
    %49 = math.exp %48 : vector<8x512xf32>
    %cst_30 = arith.constant 1.000000e+00 : f32
    %50 = vector.broadcast %cst_30 : f32 to vector<8x512xf32>
    %51 = arith.addf %50, %49 : vector<8x512xf32>
    %52 = arith.divf %50, %51 : vector<8x512xf32>
    %53 = math.tanh %47 : vector<8x512xf32>
    %54 = vector.extract_strided_slice %52 {offsets = [0, 0], sizes = [8, 128], strides = [1, 1]} : vector<8x512xf32> to vector<8x128xf32>
    %55 = vector.extract_strided_slice %52 {offsets = [0, 128], sizes = [8, 128], strides = [1, 1]} : vector<8x512xf32> to vector<8x128xf32>
    %56 = vector.extract_strided_slice %53 {offsets = [0, 256], sizes = [8, 128], strides = [1, 1]} : vector<8x512xf32> to vector<8x128xf32>
    %57 = vector.extract_strided_slice %52 {offsets = [0, 384], sizes = [8, 128], strides = [1, 1]} : vector<8x512xf32> to vector<8x128xf32>
    %58 = arith.mulf %55, %36 : vector<8x128xf32>
    %59 = arith.mulf %54, %56 : vector<8x128xf32>
    %60 = arith.addf %58, %59 : vector<8x128xf32>
    %61 = math.tanh %60 : vector<8x128xf32>
    %62 = arith.mulf %57, %61 : vector<8x128xf32>
    %63 = arith.index_cast %c1_i32 : i32 to index
    %c0_31 = arith.constant 0 : index
    %c0_32 = arith.constant 0 : index
    %64 = vector.load %arg10[%63, %c0_31, %c0_32] : memref<4x8x128xf32, #tpu.memory_space<vmem>>, vector<1x8x128xf32>
    %65 = vector.shape_cast %64 : vector<1x8x128xf32> to vector<8x128xf32>
    %66 = vector.shape_cast %62 : vector<8x128xf32> to vector<1x8x128xf32>
    tpu.vector_store %arg10[%63, %c0_31, %c0_32], %66 {strides = array<i32>} : memref<4x8x128xf32, #tpu.memory_space<vmem>>, vector<1x8x128xf32>,
    %c2_i32 = arith.constant 2 : i32
    %67 = arith.index_cast %c2_i32 : i32 to index
    %c0_33 = arith.constant 0 : index
    %c0_34 = arith.constant 0 : index
    %68 = vector.load %arg11[%67, %c0_33, %c0_34] : memref<4x8x512xf32, #tpu.memory_space<vmem>>, vector<1x8x512xf32>
    %69 = vector.shape_cast %68 : vector<1x8x512xf32> to vector<8x512xf32>
    %cst_35 = arith.constant dense<0.000000e+00> : vector<8x512xf32>
    %70 = tpu.matmul %62, %14, %cst_35 {dimension_numbers = #tpu.dot_dimension_numbers<[1], [0], [0], [1], [0, 0, 1, 1], [], []>} : vector<8x128xf32>, vector<128x512xf32>, vector<8x512xf32> -> vector<8x512xf32>
    %71 = arith.addf %69, %70 : vector<8x512xf32>
    %72 = arith.negf %71 : vector<8x512xf32>
    %73 = math.exp %72 : vector<8x512xf32>
    %cst_36 = arith.constant 1.000000e+00 : f32
    %74 = vector.broadcast %cst_36 : f32 to vector<8x512xf32>
    %75 = arith.addf %74, %73 : vector<8x512xf32>
    %76 = arith.divf %74, %75 : vector<8x512xf32>
    %77 = math.tanh %71 : vector<8x512xf32>
    %78 = vector.extract_strided_slice %76 {offsets = [0, 0], sizes = [8, 128], strides = [1, 1]} : vector<8x512xf32> to vector<8x128xf32>
    %79 = vector.extract_strided_slice %76 {offsets = [0, 128], sizes = [8, 128], strides = [1, 1]} : vector<8x512xf32> to vector<8x128xf32>
    %80 = vector.extract_strided_slice %77 {offsets = [0, 256], sizes = [8, 128], strides = [1, 1]} : vector<8x512xf32> to vector<8x128xf32>
    %81 = vector.extract_strided_slice %76 {offsets = [0, 384], sizes = [8, 128], strides = [1, 1]} : vector<8x512xf32> to vector<8x128xf32>
    %82 = arith.mulf %79, %60 : vector<8x128xf32>
    %83 = arith.mulf %78, %80 : vector<8x128xf32>
    %84 = arith.addf %82, %83 : vector<8x128xf32>
    %85 = math.tanh %84 : vector<8x128xf32>
    %86 = arith.mulf %81, %85 : vector<8x128xf32>
    %87 = arith.index_cast %c2_i32 : i32 to index
    %c0_37 = arith.constant 0 : index
    %c0_38 = arith.constant 0 : index
    %88 = vector.load %arg10[%87, %c0_37, %c0_38] : memref<4x8x128xf32, #tpu.memory_space<vmem>>, vector<1x8x128xf32>
    %89 = vector.shape_cast %88 : vector<1x8x128xf32> to vector<8x128xf32>
    %90 = vector.shape_cast %86 : vector<8x128xf32> to vector<1x8x128xf32>
    tpu.vector_store %arg10[%87, %c0_37, %c0_38], %90 {strides = array<i32>} : memref<4x8x128xf32, #tpu.memory_space<vmem>>, vector<1x8x128xf32>,
    %c3_i32 = arith.constant 3 : i32
    %91 = arith.index_cast %c3_i32 : i32 to index
    %c0_39 = arith.constant 0 : index
    %c0_40 = arith.constant 0 : index
    %92 = vector.load %arg11[%91, %c0_39, %c0_40] : memref<4x8x512xf32, #tpu.memory_space<vmem>>, vector<1x8x512xf32>
    %93 = vector.shape_cast %92 : vector<1x8x512xf32> to vector<8x512xf32>
    %cst_41 = arith.constant dense<0.000000e+00> : vector<8x512xf32>
    %94 = tpu.matmul %86, %14, %cst_41 {dimension_numbers = #tpu.dot_dimension_numbers<[1], [0], [0], [1], [0, 0, 1, 1], [], []>} : vector<8x128xf32>, vector<128x512xf32>, vector<8x512xf32> -> vector<8x512xf32>
    %95 = arith.addf %93, %94 : vector<8x512xf32>
    %96 = arith.negf %95 : vector<8x512xf32>
    %97 = math.exp %96 : vector<8x512xf32>
    %cst_42 = arith.constant 1.000000e+00 : f32
    %98 = vector.broadcast %cst_42 : f32 to vector<8x512xf32>
    %99 = arith.addf %98, %97 : vector<8x512xf32>
    %100 = arith.divf %98, %99 : vector<8x512xf32>
    %101 = math.tanh %95 : vector<8x512xf32>
    %102 = vector.extract_strided_slice %100 {offsets = [0, 0], sizes = [8, 128], strides = [1, 1]} : vector<8x512xf32> to vector<8x128xf32>
    %103 = vector.extract_strided_slice %100 {offsets = [0, 128], sizes = [8, 128], strides = [1, 1]} : vector<8x512xf32> to vector<8x128xf32>
    %104 = vector.extract_strided_slice %101 {offsets = [0, 256], sizes = [8, 128], strides = [1, 1]} : vector<8x512xf32> to vector<8x128xf32>
    %105 = vector.extract_strided_slice %100 {offsets = [0, 384], sizes = [8, 128], strides = [1, 1]} : vector<8x512xf32> to vector<8x128xf32>
    %106 = arith.mulf %103, %84 : vector<8x128xf32>
    %107 = arith.mulf %102, %104 : vector<8x128xf32>
    %108 = arith.addf %106, %107 : vector<8x128xf32>
    %109 = math.tanh %108 : vector<8x128xf32>
    %110 = arith.mulf %105, %109 : vector<8x128xf32>
    %111 = arith.index_cast %c3_i32 : i32 to index
    %c0_43 = arith.constant 0 : index
    %c0_44 = arith.constant 0 : index
    %112 = vector.load %arg10[%111, %c0_43, %c0_44] : memref<4x8x128xf32, #tpu.memory_space<vmem>>, vector<1x8x128xf32>
    %113 = vector.shape_cast %112 : vector<1x8x128xf32> to vector<8x128xf32>
    %114 = vector.shape_cast %110 : vector<8x128xf32> to vector<1x8x128xf32>
    tpu.vector_store %arg10[%111, %c0_43, %c0_44], %114 {strides = array<i32>} : memref<4x8x128xf32, #tpu.memory_space<vmem>>, vector<1x8x128xf32>,
    %c4_i32 = arith.constant 4 : i32
    %c0_45 = arith.constant 0 : index
    %c0_46 = arith.constant 0 : index
    %c0_47 = arith.constant 0 : index
    %115 = vector.load %arg12[%c0_45, %c0_46, %c0_47] : memref<2x8x128xf32, #tpu.memory_space<vmem>>, vector<1x8x128xf32>
    %116 = vector.shape_cast %115 : vector<1x8x128xf32> to vector<8x128xf32>
    %117 = vector.shape_cast %110 : vector<8x128xf32> to vector<1x8x128xf32>
    tpu.vector_store %arg12[%c0_45, %c0_46, %c0_47], %117 {strides = array<i32>} : memref<2x8x128xf32, #tpu.memory_space<vmem>>, vector<1x8x128xf32>,
    %c0_48 = arith.constant 0 : index
    %c0_49 = arith.constant 0 : index
    %c0_50 = arith.constant 0 : index
    %118 = vector.load %arg13[%c0_48, %c0_49, %c0_50] : memref<2x8x128xf32, #tpu.memory_space<vmem>>, vector<1x8x128xf32>
    %119 = vector.shape_cast %118 : vector<1x8x128xf32> to vector<8x128xf32>
    %120 = vector.shape_cast %108 : vector<8x128xf32> to vector<1x8x128xf32>
    tpu.vector_store %arg13[%c0_48, %c0_49, %c0_50], %120 {strides = array<i32>} : memref<2x8x128xf32, #tpu.memory_space<vmem>>, vector<1x8x128xf32>,
    %c0_51 = arith.constant 0 : index
    %c0_52 = arith.constant 0 : index
    %c0_53 = arith.constant 0 : index
    %121 = vector.load %arg10[%c0_51, %c0_52, %c0_53] : memref<4x8x128xf32, #tpu.memory_space<vmem>>, vector<4x8x128xf32>
    %122 = vector.shape_cast %121 : vector<4x8x128xf32> to vector<32x128xf32>
    %c0_54 = arith.constant 0 : index
    %c0_55 = arith.constant 0 : index
    %c0_56 = arith.constant 0 : index
    %123 = vector.load %arg4[%c0_54, %c0_55, %c0_56] : memref<1x128x512xf32, #tpu.memory_space<vmem>>, vector<1x128x512xf32>
    %124 = vector.shape_cast %123 : vector<1x128x512xf32> to vector<128x512xf32>
    %cst_57 = arith.constant dense<0.000000e+00> : vector<32x512xf32>
    %125 = tpu.matmul %122, %124, %cst_57 {dimension_numbers = #tpu.dot_dimension_numbers<[1], [0], [0], [1], [0, 0, 1, 1], [], []>} : vector<32x128xf32>, vector<128x512xf32>, vector<32x512xf32> -> vector<32x512xf32>
    %c1 = arith.constant 1 : index
    %c0_58 = arith.constant 0 : index
    %c0_59 = arith.constant 0 : index
    %126 = vector.load %arg6[%c1, %c0_58, %c0_59] : memref<2x1x512xf32, #tpu.memory_space<vmem>>, vector<1x1x512xf32>
    %127 = vector.shape_cast %126 : vector<1x1x512xf32> to vector<1x512xf32>
    %128 = vector.broadcast %127 : vector<1x512xf32> to vector<32x512xf32>
    %129 = arith.addf %125, %128 : vector<32x512xf32>
    %130 = vector.shape_cast %129 : vector<32x512xf32> to vector<4x8x512xf32>
    %c0_60 = arith.constant 0 : index
    %c0_61 = arith.constant 0 : index
    %c0_62 = arith.constant 0 : index
    %131 = vector.load %arg11[%c0_60, %c0_61, %c0_62] : memref<4x8x512xf32, #tpu.memory_space<vmem>>, vector<4x8x512xf32>
    tpu.vector_store %arg11[%c0_60, %c0_61, %c0_62], %130 {strides = array<i32>} : memref<4x8x512xf32, #tpu.memory_space<vmem>>, vector<4x8x512xf32>,
    %c1_63 = arith.constant 1 : index
    %c0_64 = arith.constant 0 : index
    %c0_65 = arith.constant 0 : index
    %132 = vector.load %arg5[%c1_63, %c0_64, %c0_65] : memref<2x128x512xf32, #tpu.memory_space<vmem>>, vector<1x128x512xf32>
    %133 = vector.shape_cast %132 : vector<1x128x512xf32> to vector<128x512xf32>
    %c1_66 = arith.constant 1 : index
    %c0_67 = arith.constant 0 : index
    %c0_68 = arith.constant 0 : index
    %134 = vector.load %arg12[%c1_66, %c0_67, %c0_68] : memref<2x8x128xf32, #tpu.memory_space<vmem>>, vector<1x8x128xf32>
    %135 = vector.shape_cast %134 : vector<1x8x128xf32> to vector<8x128xf32>
    %c1_69 = arith.constant 1 : index
    %c0_70 = arith.constant 0 : index
    %c0_71 = arith.constant 0 : index
    %136 = vector.load %arg13[%c1_69, %c0_70, %c0_71] : memref<2x8x128xf32, #tpu.memory_space<vmem>>, vector<1x8x128xf32>
    %137 = vector.shape_cast %136 : vector<1x8x128xf32> to vector<8x128xf32>
    %c0_i32_72 = arith.constant 0 : i32
    %138 = arith.index_cast %c0_i32_72 : i32 to index
    %c0_73 = arith.constant 0 : index
    %c0_74 = arith.constant 0 : index
    %139 = vector.load %arg11[%138, %c0_73, %c0_74] : memref<4x8x512xf32, #tpu.memory_space<vmem>>, vector<1x8x512xf32>
    %140 = vector.shape_cast %139 : vector<1x8x512xf32> to vector<8x512xf32>
    %cst_75 = arith.constant dense<0.000000e+00> : vector<8x512xf32>
    %141 = tpu.matmul %135, %133, %cst_75 {dimension_numbers = #tpu.dot_dimension_numbers<[1], [0], [0], [1], [0, 0, 1, 1], [], []>} : vector<8x128xf32>, vector<128x512xf32>, vector<8x512xf32> -> vector<8x512xf32>
    %142 = arith.addf %140, %141 : vector<8x512xf32>
    %143 = arith.negf %142 : vector<8x512xf32>
    %144 = math.exp %143 : vector<8x512xf32>
    %cst_76 = arith.constant 1.000000e+00 : f32
    %145 = vector.broadcast %cst_76 : f32 to vector<8x512xf32>
    %146 = arith.addf %145, %144 : vector<8x512xf32>
    %147 = arith.divf %145, %146 : vector<8x512xf32>
    %148 = math.tanh %142 : vector<8x512xf32>
    %149 = vector.extract_strided_slice %147 {offsets = [0, 0], sizes = [8, 128], strides = [1, 1]} : vector<8x512xf32> to vector<8x128xf32>
    %150 = vector.extract_strided_slice %147 {offsets = [0, 128], sizes = [8, 128], strides = [1, 1]} : vector<8x512xf32> to vector<8x128xf32>
    %151 = vector.extract_strided_slice %148 {offsets = [0, 256], sizes = [8, 128], strides = [1, 1]} : vector<8x512xf32> to vector<8x128xf32>
    %152 = vector.extract_strided_slice %147 {offsets = [0, 384], sizes = [8, 128], strides = [1, 1]} : vector<8x512xf32> to vector<8x128xf32>
    %153 = arith.mulf %150, %137 : vector<8x128xf32>
    %154 = arith.mulf %149, %151 : vector<8x128xf32>
    %155 = arith.addf %153, %154 : vector<8x128xf32>
    %156 = math.tanh %155 : vector<8x128xf32>
    %157 = arith.mulf %152, %156 : vector<8x128xf32>
    %c1_i32_77 = arith.constant 1 : i32
    %158 = arith.index_cast %c1_i32_77 : i32 to index
    %c0_78 = arith.constant 0 : index
    %c0_79 = arith.constant 0 : index
    %159 = vector.load %arg11[%158, %c0_78, %c0_79] : memref<4x8x512xf32, #tpu.memory_space<vmem>>, vector<1x8x512xf32>
    %160 = vector.shape_cast %159 : vector<1x8x512xf32> to vector<8x512xf32>
    %cst_80 = arith.constant dense<0.000000e+00> : vector<8x512xf32>
    %161 = tpu.matmul %157, %133, %cst_80 {dimension_numbers = #tpu.dot_dimension_numbers<[1], [0], [0], [1], [0, 0, 1, 1], [], []>} : vector<8x128xf32>, vector<128x512xf32>, vector<8x512xf32> -> vector<8x512xf32>
    %162 = arith.addf %160, %161 : vector<8x512xf32>
    %163 = arith.negf %162 : vector<8x512xf32>
    %164 = math.exp %163 : vector<8x512xf32>
    %cst_81 = arith.constant 1.000000e+00 : f32
    %165 = vector.broadcast %cst_81 : f32 to vector<8x512xf32>
    %166 = arith.addf %165, %164 : vector<8x512xf32>
    %167 = arith.divf %165, %166 : vector<8x512xf32>
    %168 = math.tanh %162 : vector<8x512xf32>
    %169 = vector.extract_strided_slice %167 {offsets = [0, 0], sizes = [8, 128], strides = [1, 1]} : vector<8x512xf32> to vector<8x128xf32>
    %170 = vector.extract_strided_slice %167 {offsets = [0, 128], sizes = [8, 128], strides = [1, 1]} : vector<8x512xf32> to vector<8x128xf32>
    %171 = vector.extract_strided_slice %168 {offsets = [0, 256], sizes = [8, 128], strides = [1, 1]} : vector<8x512xf32> to vector<8x128xf32>
    %172 = vector.extract_strided_slice %167 {offsets = [0, 384], sizes = [8, 128], strides = [1, 1]} : vector<8x512xf32> to vector<8x128xf32>
    %173 = arith.mulf %170, %155 : vector<8x128xf32>
    %174 = arith.mulf %169, %171 : vector<8x128xf32>
    %175 = arith.addf %173, %174 : vector<8x128xf32>
    %176 = math.tanh %175 : vector<8x128xf32>
    %177 = arith.mulf %172, %176 : vector<8x128xf32>
    %c2_i32_82 = arith.constant 2 : i32
    %178 = arith.index_cast %c2_i32_82 : i32 to index
    %c0_83 = arith.constant 0 : index
    %c0_84 = arith.constant 0 : index
    %179 = vector.load %arg11[%178, %c0_83, %c0_84] : memref<4x8x512xf32, #tpu.memory_space<vmem>>, vector<1x8x512xf32>
    %180 = vector.shape_cast %179 : vector<1x8x512xf32> to vector<8x512xf32>
    %cst_85 = arith.constant dense<0.000000e+00> : vector<8x512xf32>
    %181 = tpu.matmul %177, %133, %cst_85 {dimension_numbers = #tpu.dot_dimension_numbers<[1], [0], [0], [1], [0, 0, 1, 1], [], []>} : vector<8x128xf32>, vector<128x512xf32>, vector<8x512xf32> -> vector<8x512xf32>
    %182 = arith.addf %180, %181 : vector<8x512xf32>
    %183 = arith.negf %182 : vector<8x512xf32>
    %184 = math.exp %183 : vector<8x512xf32>
    %cst_86 = arith.constant 1.000000e+00 : f32
    %185 = vector.broadcast %cst_86 : f32 to vector<8x512xf32>
    %186 = arith.addf %185, %184 : vector<8x512xf32>
    %187 = arith.divf %185, %186 : vector<8x512xf32>
    %188 = math.tanh %182 : vector<8x512xf32>
    %189 = vector.extract_strided_slice %187 {offsets = [0, 0], sizes = [8, 128], strides = [1, 1]} : vector<8x512xf32> to vector<8x128xf32>
    %190 = vector.extract_strided_slice %187 {offsets = [0, 128], sizes = [8, 128], strides = [1, 1]} : vector<8x512xf32> to vector<8x128xf32>
    %191 = vector.extract_strided_slice %188 {offsets = [0, 256], sizes = [8, 128], strides = [1, 1]} : vector<8x512xf32> to vector<8x128xf32>
    %192 = vector.extract_strided_slice %187 {offsets = [0, 384], sizes = [8, 128], strides = [1, 1]} : vector<8x512xf32> to vector<8x128xf32>
    %193 = arith.mulf %190, %175 : vector<8x128xf32>
    %194 = arith.mulf %189, %191 : vector<8x128xf32>
    %195 = arith.addf %193, %194 : vector<8x128xf32>
    %196 = math.tanh %195 : vector<8x128xf32>
    %197 = arith.mulf %192, %196 : vector<8x128xf32>
    %c3_i32_87 = arith.constant 3 : i32
    %198 = arith.index_cast %c3_i32_87 : i32 to index
    %c0_88 = arith.constant 0 : index
    %c0_89 = arith.constant 0 : index
    %199 = vector.load %arg11[%198, %c0_88, %c0_89] : memref<4x8x512xf32, #tpu.memory_space<vmem>>, vector<1x8x512xf32>
    %200 = vector.shape_cast %199 : vector<1x8x512xf32> to vector<8x512xf32>
    %cst_90 = arith.constant dense<0.000000e+00> : vector<8x512xf32>
    %201 = tpu.matmul %197, %133, %cst_90 {dimension_numbers = #tpu.dot_dimension_numbers<[1], [0], [0], [1], [0, 0, 1, 1], [], []>} : vector<8x128xf32>, vector<128x512xf32>, vector<8x512xf32> -> vector<8x512xf32>
    %202 = arith.addf %200, %201 : vector<8x512xf32>
    %203 = arith.negf %202 : vector<8x512xf32>
    %204 = math.exp %203 : vector<8x512xf32>
    %cst_91 = arith.constant 1.000000e+00 : f32
    %205 = vector.broadcast %cst_91 : f32 to vector<8x512xf32>
    %206 = arith.addf %205, %204 : vector<8x512xf32>
    %207 = arith.divf %205, %206 : vector<8x512xf32>
    %208 = math.tanh %202 : vector<8x512xf32>
    %209 = vector.extract_strided_slice %207 {offsets = [0, 0], sizes = [8, 128], strides = [1, 1]} : vector<8x512xf32> to vector<8x128xf32>
    %210 = vector.extract_strided_slice %207 {offsets = [0, 128], sizes = [8, 128], strides = [1, 1]} : vector<8x512xf32> to vector<8x128xf32>
    %211 = vector.extract_strided_slice %208 {offsets = [0, 256], sizes = [8, 128], strides = [1, 1]} : vector<8x512xf32> to vector<8x128xf32>
    %212 = vector.extract_strided_slice %207 {offsets = [0, 384], sizes = [8, 128], strides = [1, 1]} : vector<8x512xf32> to vector<8x128xf32>
    %213 = arith.mulf %210, %195 : vector<8x128xf32>
    %214 = arith.mulf %209, %211 : vector<8x128xf32>
    %215 = arith.addf %213, %214 : vector<8x128xf32>
    %216 = math.tanh %215 : vector<8x128xf32>
    %217 = arith.mulf %212, %216 : vector<8x128xf32>
    %c4_i32_92 = arith.constant 4 : i32
    %c1_93 = arith.constant 1 : index
    %c0_94 = arith.constant 0 : index
    %c0_95 = arith.constant 0 : index
    %218 = vector.load %arg12[%c1_93, %c0_94, %c0_95] : memref<2x8x128xf32, #tpu.memory_space<vmem>>, vector<1x8x128xf32>
    %219 = vector.shape_cast %218 : vector<1x8x128xf32> to vector<8x128xf32>
    %220 = vector.shape_cast %217 : vector<8x128xf32> to vector<1x8x128xf32>
    tpu.vector_store %arg12[%c1_93, %c0_94, %c0_95], %220 {strides = array<i32>} : memref<2x8x128xf32, #tpu.memory_space<vmem>>, vector<1x8x128xf32>,
    %c1_96 = arith.constant 1 : index
    %c0_97 = arith.constant 0 : index
    %c0_98 = arith.constant 0 : index
    %221 = vector.load %arg13[%c1_96, %c0_97, %c0_98] : memref<2x8x128xf32, #tpu.memory_space<vmem>>, vector<1x8x128xf32>
    %222 = vector.shape_cast %221 : vector<1x8x128xf32> to vector<8x128xf32>
    %223 = vector.shape_cast %215 : vector<8x128xf32> to vector<1x8x128xf32>
    tpu.vector_store %arg13[%c1_96, %c0_97, %c0_98], %223 {strides = array<i32>} : memref<2x8x128xf32, #tpu.memory_space<vmem>>, vector<1x8x128xf32>,
    %c1_i32_99 = arith.constant 1 : i32
    %224 = arith.cmpi eq, %arg1, %c1_i32_99 : i32
    %225 = arith.extui %224 : i1 to i32
    %c0_i32_100 = arith.constant 0 : i32
    %226 = arith.cmpi ne, %225, %c0_i32_100 : i32
    scf.if %226 {
      %c0_101 = arith.constant 0 : index
      %c0_102 = arith.constant 0 : index
      %227 = vector.load %arg7[%c0_101, %c0_102] : memref<128x128xf32, #tpu.memory_space<vmem>>, vector<128x128xf32>
      %cst_103 = arith.constant dense<0.000000e+00> : vector<8x128xf32>
      %228 = tpu.matmul %217, %227, %cst_103 {dimension_numbers = #tpu.dot_dimension_numbers<[1], [0], [0], [1], [0, 0, 1, 1], [], []>} : vector<8x128xf32>, vector<128x128xf32>, vector<8x128xf32> -> vector<8x128xf32>
      %c0_104 = arith.constant 0 : index
      %c0_105 = arith.constant 0 : index
      %229 = vector.load %arg8[%c0_104, %c0_105] : memref<1x128xf32, #tpu.memory_space<vmem>>, vector<1x128xf32>
      %230 = vector.broadcast %229 : vector<1x128xf32> to vector<8x128xf32>
      %231 = arith.addf %228, %230 : vector<8x128xf32>
      %c0_106 = arith.constant 0 : index
      %c0_107 = arith.constant 0 : index
      %232 = vector.load %arg9[%c0_106, %c0_107] : memref<8x128xf32, #tpu.memory_space<vmem>>, vector<8x128xf32>
      tpu.vector_store %arg9[%c0_106, %c0_107], %231 {strides = array<i32>} : memref<8x128xf32, #tpu.memory_space<vmem>>, vector<8x128xf32>,
    } else {
    }
    return
  }
  func.func @transform_0(%arg0: i32, %arg1: i32) -> (i32, i32, i32) {
    %c0_i32 = arith.constant 0 : i32
    %c0_i32_0 = arith.constant 0 : i32
    return %arg1, %arg0, %c0_i32 : i32, i32, i32
  }
  func.func @transform_1(%arg0: i32, %arg1: i32) -> (i32, i32) {
    %c0_i32 = arith.constant 0 : i32
    %c0_i32_0 = arith.constant 0 : i32
    %c0_i32_1 = arith.constant 0 : i32
    return %c0_i32, %c0_i32_0 : i32, i32
  }
  func.func @transform_2(%arg0: i32, %arg1: i32) -> (i32, i32, i32) {
    %c0_i32 = arith.constant 0 : i32
    %c0_i32_0 = arith.constant 0 : i32
    %c0_i32_1 = arith.constant 0 : i32
    %c0_i32_2 = arith.constant 0 : i32
    return %c0_i32, %c0_i32_0, %c0_i32_1 : i32, i32, i32
  }
  func.func @transform_3(%arg0: i32, %arg1: i32) -> (i32, i32, i32) {
    %c0_i32 = arith.constant 0 : i32
    %c0_i32_0 = arith.constant 0 : i32
    %c0_i32_1 = arith.constant 0 : i32
    %c0_i32_2 = arith.constant 0 : i32
    return %c0_i32, %c0_i32_0, %c0_i32_1 : i32, i32, i32
  }
  func.func @transform_4(%arg0: i32, %arg1: i32) -> (i32, i32, i32) {
    %c0_i32 = arith.constant 0 : i32
    %c0_i32_0 = arith.constant 0 : i32
    %c0_i32_1 = arith.constant 0 : i32
    %c0_i32_2 = arith.constant 0 : i32
    return %c0_i32, %c0_i32_0, %c0_i32_1 : i32, i32, i32
  }
  func.func @transform_5(%arg0: i32, %arg1: i32) -> (i32, i32) {
    %c0_i32 = arith.constant 0 : i32
    %c0_i32_0 = arith.constant 0 : i32
    %c0_i32_1 = arith.constant 0 : i32
    return %c0_i32, %c0_i32_0 : i32, i32
  }
  func.func @transform_6(%arg0: i32, %arg1: i32) -> (i32, i32) {
    %c0_i32 = arith.constant 0 : i32
    %c0_i32_0 = arith.constant 0 : i32
    %c0_i32_1 = arith.constant 0 : i32
    return %c0_i32, %c0_i32_0 : i32, i32
  }
  func.func @transform_7(%arg0: i32, %arg1: i32) -> (i32, i32) {
    %c0_i32 = arith.constant 0 : i32
    %c0_i32_0 = arith.constant 0 : i32
    return %arg0, %c0_i32 : i32, i32
  }
}

</mosaic_0001>

<bundles_post_ra>
// kernel: tpu_custom_call.1
= control target key start
LH: loop header
LB: loop body
LE: loop exit
PB: predicated region body
PF: predicated region fallthrough
CT: control target
= control target key end

     0   :  { %s4534_s0 = inlined_call_operand.hbm [shape: f32[8,8,128], index: 0, kind: input, shape index: {}]   ;;  %s4535_s1 = inlined_call_operand.hbm [shape: f32[128,512], index: 1, kind: input, shape index: {}]   ;;  %s4536_s2 = inlined_call_operand.hbm [shape: f32[1,128,512], index: 2, kind: input, shape index: {}]   ;;  %s4537_s3 = inlined_call_operand.hbm [shape: f32[2,128,512], index: 3, kind: input, shape index: {}]   ;;  %s4538_s4 = inlined_call_operand.hbm [shape: f32[2,1,512], index: 4, kind: input, shape index: {}]   ;;  %s4539_s5 = inlined_call_operand.hbm [shape: f32[128,128], index: 5, kind: input, shape index: {}]   ;;  %s4540_s6 = inlined_call_operand.vmem [shape: f32[1,128], index: 6, kind: input, shape index: {}]   ;;  %s4541_s7 = inlined_call_operand.hbm [shape: f32[8,128], index: 7, kind: output, shape index: {}]  }
   0x1   :  { %4661 = sst [smem:[#allocation63_spill]] %s4535_s1 }
   0x2   :  { %12 = vsyncpa [#allocation7], 0 }
   0x3   :  { %14 = vsyncpa [#allocation7 + $0x1], 0 }
   0x4   :  { %15 = vsyncpa [#allocation10], 0 }
   0x5   :  { %16 = vsyncpa [#allocation13], 0 }
   0x6   :  { %17 = vsyncpa [#allocation16], 0 }
   0x7   :  { %18 = vsyncpa [#allocation8], 0  ;;  %s3375_s24 = smov 0   ;;  %s3377_s25 = smov 0  }
   0x8   :  { %s3379_s26 = smov 0   ;;  %s3381_s27 = smov 0  }
   0x9   :  { %s3383_s28 = smov 0   ;;  %s3385_s29 = smov 0  }
   0xa LB: > { %s4545_s30 = sadd.s32 4294967295, %s3316_s29   ;;  %p2716_p0 = scmp.ge.s32.totalorder %s3316_s29, 1  ;;  %s3316_s29 = sphi %s3385_s29, %s24_s29   ;;  %s3312_s28 = sphi %s3383_s28, %s4904_s28   ;;  %s3308_s27 = sphi %s3381_s27, %s4903_s27   ;;  %s3304_s26 = sphi %s3379_s26, %s4902_s26   ;;  %s3300_s25 = sphi %s3377_s25, %s4901_s25   ;;  %s3296_s24 = sphi %s3375_s24, %s4900_s24  }
   0xb   : > { %p3409_p1 = scmp.eq.s32.totalorder %s4545_s30, 0  ;;  %p221_p2 = scmp.lt.s32.totalorder %s3316_s29, 3 }
   0xc   : > { %s3318_s10 = smov [#allocation9]   ;;  %s3319_s13 = smov [#allocation12]  }
   0xd   : > { %s4662_s8 = scalar_select %p3409_p1, 1, 0 }
   0xe   : > { %p3414_p3 = pnand %p2716_p0, %p221_p2  ;;  %s233_s11 = sshll.u32 %s3318_s10, 4  ;;  %s234_s11 = int_to_ptr.vmem [resolvable:$true] %s233_s11 }
   0xf   : > { %s259_s14 = sshll.u32 %s3319_s13, 4  ;;  %s3320_s15 = smov [#allocation11]   ;;  %s260_s14 = int_to_ptr.vmem [resolvable:$true] %s259_s14 }
  0x10   : > { %s4663_s9 = scalar_select %p3414_p3, 1, 0 }
  0x11   : > { %p2843_p4 = pneg %p3414_p3  ;;  %s246_s16 = sshll.u32 %s3320_s15, 4  ;;  %s247_s16 = int_to_ptr.vmem [resolvable:$true] %s246_s16 }
  0x12   : > { %s3079_s18 = scalar_lea.vmem %s234_s11, 8192  ;;  %p3087_p10 = scmp.lt.s32.totalorder %s234_s11, %s234_s11 }
  0x13   : > { %p3422_p5 = pnand %p2843_p4, %p3409_p1  ;;  %p3080_p7 = scmp.ne.s32.totalorder %s234_s11, %s3079_s18 }
  0x14   : > { %p3088_p11 = scmp.lt.s32.totalorder %s3079_s18, %s3079_s18 }
  0x15   : > { %p3428_p6 = pneg %p3422_p5 }
  0x16   : > { %p3089_p12 = por %p3088_p11, %p3087_p10 }
  0x17   : > { %p3082_p8 = pnand %p3080_p7, %p3428_p6 }
  0x19   : > { %p3083_p9 = pneg %p3082_p8 }
  0x1b   : > { %p3090_p13 = pnand %p3089_p12, %p3083_p9 }
  0x1d   : > { %3093 = shalt.err (!%p3090_p13)
}
  0x1e   : > { %s3321_s19 = smov 512   ;;  %s3322_s20 = smov 32  }
  0x1f   : > { %s4666_s1 = sld [smem:[#allocation63_spill]]  ;;  %s3105_s23 = scalar_lea.vmem %s260_s14, 16384 }
  0x20   : > { %p3106_p0 = scmp.ne.s32.totalorder %s260_s14, %s3105_s23  ;;  %p3113_p7 = scmp.lt.s32.totalorder %s260_s14, %s260_s14 }
  0x21   : > { %p3114_p8 = scmp.lt.s32.totalorder %s3105_s23, %s3105_s23 }
  0x22   : > { %p3108_p2 = pnand %p3106_p0, %p3428_p6 }
  0x23   : > { %p3115_p3 = por %p3114_p8, %p3113_p7 }
  0x24   : > { %p3109_p4 = pneg %p3108_p2 }
  0x25   : > { %2846 = dma.hbm_to_vmem [thread:$0]  (!%p3422_p5), %s4666_s1, 8192, %s234_s11, [#allocation10], %s3321_s19, %s3321_s19, %s3322_s20  }
  0x26   : > { %p3116_p10 = pnand %p3115_p3, %p3109_p4 }
  0x28   : > { %3119 = shalt.err (!%p3116_p10)
}
  0x29   : > { %2852 = dma.hbm_to_vmem [thread:$0]  (!%p3422_p5), %s4537_s3, 16384, %s260_s14, [#allocation13], %s3321_s19, %s3321_s19, %s3322_s20  }
  0x2a   : > { %s3131_s15 = scalar_lea.vmem %s247_s16, 8192  ;;  %p3139_p13 = scmp.lt.s32.totalorder %s247_s16, %s247_s16 }
  0x2b   : > { %p3132_p9 = scmp.ne.s32.totalorder %s247_s16, %s3131_s15  ;;  %p3140_p0 = scmp.lt.s32.totalorder %s3131_s15, %s3131_s15 }
  0x2d   : > { %p3134_p11 = pnand %p3132_p9, %p3428_p6  ;;  %p3141_p2 = por %p3140_p0, %p3139_p13 }
  0x2f   : > { %p3135_p12 = pneg %p3134_p11 }
  0x31   : > { %p3142_p1 = pnand %p3141_p2, %p3135_p12 }
  0x33   : > { %3145 = shalt.err (!%p3142_p1)
}
  0x34   : > { %2849 = dma.hbm_to_vmem [thread:$0]  (!%p3422_p5), %s4536_s2, 8192, %s247_s16, [#allocation10], %s3321_s19, %s3321_s19, %s3322_s20  }
  0x35   : > { %s3323_s21 = smov [#allocation14]  }
  0x36   : > { %s272_s14 = sshll.u32 %s3323_s21, 4  ;;  %s273_s14 = int_to_ptr.vmem [resolvable:$true] %s272_s14 }
  0x37   : > { %s3157_s22 = scalar_lea.vmem %s273_s14, 128  ;;  %p3165_p8 = scmp.lt.s32.totalorder %s273_s14, %s273_s14 }
  0x38   : > { %p3158_p3 = scmp.ne.s32.totalorder %s273_s14, %s3157_s22  ;;  %p3166_p10 = scmp.lt.s32.totalorder %s3157_s22, %s3157_s22 }
  0x3a   : > { %p3160_p4 = pnand %p3158_p3, %p3428_p6  ;;  %p3167_p9 = por %p3166_p10, %p3165_p8 }
  0x3c   : > { %p3161_p7 = pneg %p3160_p4 }
  0x3e   : > { %p3168_p11 = pnand %p3167_p9, %p3161_p7 }
  0x40   : > { %3171 = shalt.err (!%p3168_p11)
}
  0x41   : > { %s3324_s23 = smov 64   ;;  %s3325_s10 = smov 4  }
  0x42   : > { %2855 = dma.hbm_to_vmem [thread:$0]  (!%p3422_p5), %s4538_s4, 128, %s273_s14, [#allocation13], %s3324_s23, %s3324_s23, %s3325_s10  }
  0x43   : > { %s3326_s19 = smov [#allocation15]  }
  0x44   : > { %s285_s20 = sshll.u32 %s3326_s19, 4  ;;  %s286_s20 = int_to_ptr.vmem [resolvable:$true] %s285_s20 }
  0x45   : > { %s3183_s15 = scalar_lea.vmem %s286_s20, 2048  ;;  %p3191_p0 = scmp.lt.s32.totalorder %s286_s20, %s286_s20 }
  0x46   : > { %p3184_p1 = scmp.ne.s32.totalorder %s286_s20, %s3183_s15  ;;  %p3192_p2 = scmp.lt.s32.totalorder %s3183_s15, %s3183_s15 }
  0x48   : > { %p3186_p12 = pnand %p3184_p1, %p3428_p6  ;;  %p3193_p3 = por %p3192_p2, %p3191_p0 }
  0x4a   : > { %p3187_p13 = pneg %p3186_p12 }
  0x4c   : > { %p3194_p4 = pnand %p3193_p3, %p3187_p13 }
  0x4e   : > { %3197 = shalt.err (!%p3194_p4)
}
  0x4f   : > { %s4546_s11 = smov 128   ;;  %s4547_s17 = smov 8  }
  0x50   : > { %2858 = dma.hbm_to_vmem [thread:$0]  (!%p3422_p5), %s4539_s5, 2048, %s286_s20, [#allocation16], %s4546_s11, %s4546_s11, %s4547_s17  }
  0x51   : > { %s33_s14 = sadd.s32 1, %s3312_s28  ;;  %s45_s22 = sadd.s32 1, %s3304_s26 }
  0x52   : > { %p34_p6 = scmp.ge.s32.totalorder %s33_s14, 2  ;;  %p52_p7 = scmp.ne.s32.totalorder %s3304_s26, %s3300_s25 }
  0x53   : > { %p53_p8 = scmp.eq.s32.totalorder %s3316_s29, 0  ;;  %p58_p9 = scmp.ne.s32.totalorder %s3300_s25, %s3296_s24 }
  0x54   : > { %s4906_s14 = smov (%p34_p6, %s33_s14), 0  ;;  %p2868_p11 = scmp.lt.s32.totalorder %s3316_s29, 2 }
  0x55   : > { %p3477_p10 = por %p53_p8, %p52_p7  ;;  %s40_s12 = ssub.s32 %s3312_s28, %s4906_s14 }
  0x56   : > { %p43_p1 = scmp.eq.s32.totalorder %s40_s12, 0  ;;  %p4668_p12 = scmp.ne.s32.totalorder %s4662_s8, 0 }
  0x57   : > { %s302_s13 = sand.u32 1, %s3304_s26   ;;  %s2764_s16 = sshll.u32 %s3312_s28, 9 }
  0x58   : > { %p3488_p13 = por %p4668_p12, %p58_p9  ;;  %s2723_s20 = sshll.u32 %s302_s13, 5 }
  0x59   : > { %s3495_s19 = scalar_select %p43_p1, %s3304_s26, %s45_s22  }
  0x5a   : > { %s313_s21 = scalar_lea.hbm %s4534_s0, %s2764_s16  ;;  %s306_s30 = scalar_lea.vmem [#allocation6], %s2723_s20 }
  0x5b   : > { %s314_s11 = sshll.u32 %s306_s30, 4  ;;  %p3502_p5 = pnand %p2868_p11, %p3477_p10  ;;  %s315_s11 = int_to_ptr.vmem [resolvable:$true] %s314_s11 }
  0x5c   : > { %s303_s12 = scalar_lea.sflag [#allocation7], %s302_s13  ;;  %s3211_s17 = scalar_lea.vmem %s315_s11, 512 }
  0x5d   : > { %p3200_p0 = pneg %p3502_p5  ;;  %p3212_p2 = scmp.ne.s32.totalorder %s315_s11, %s3211_s17 }
  0x5e   : > { %s3329_s22 = smov [#allocation6]  }
  0x5f   : > { %p3214_p3 = pnand %p3212_p2, %p3200_p0  ;;  %s3216_s1 = sshll.u32 %s3329_s22, 4  ;;  %s3217_s1 = int_to_ptr.vmem [resolvable:$false] %s3216_s1 }
  0x60   : > { %s3218_s16 = scalar_lea.vmem %s3217_s1, 1024  ;;  %p3219_p6 = scmp.lt.s32.totalorder %s315_s11, %s3217_s1 }
  0x61   : > { %p3215_p4 = pneg %p3214_p3  ;;  %p3220_p7 = scmp.lt.s32.totalorder %s3218_s16, %s3211_s17 }
  0x63   : > { %p3221_p8 = por %p3220_p7, %p3219_p6 }
  0x65   : > { %p3222_p10 = pnand %p3221_p8, %p3215_p4 }
  0x67   : > { %3225 = shalt.err (!%p3222_p10)
}
  0x68   : > { %s4671_s30 = smov 8   ;;  %s4672_s23 = smov 128  }
  0x69   : > { %2862 = dma.hbm_to_vmem [thread:$0]  (!%p3502_p5), %s313_s21, 512, %s315_s11, %s303_s12, %s4672_s23, %s4672_s23, %s4671_s30  }
  0x6a   : > { %p4673_p9 = scmp.ne.s32.totalorder %s4663_s9, 0 }
  0x6c   : > { %326 = sbr.rel (%p4673_p9) target bundleno = 2449 (0x991), region = 48 }
  0x71   : > { %s328_s13 = sand.u32 1, %s3300_s25  }
  0x72   : > { %s2727_s20 = sshll.u32 %s328_s13, 5  ;;  %s329_s15 = scalar_lea.sflag [#allocation7], %s328_s13 }
  0x73   : > { %s3516_s18 = scalar_lea.vmem [#allocation6], %s2727_s20 }
  0x74   : > { %3275 = dma.done.wait (%p3488_p13), %s329_s15, 512  }
  0x75   : > { %3277 = vsyncadd (%p3488_p13), %s329_s15, 4294966784  ;;  %p4674_p11 = scmp.ne.s32.totalorder %s4662_s8, 0 }
  0x77   : > { %3279 = dma.done.wait (%p4674_p11), [#allocation10], 16384  }
  0x78   : > { %3281 = vsyncadd (%p4674_p11), [#allocation10], 4294950912 }
  0x79   : > { %3283 = dma.done.wait (%p4674_p11), [#allocation13], 16512  }
  0x7a   : > { %3285 = vsyncadd (%p4674_p11), [#allocation13], 4294950784 }
  0x7b   : > { %3287 = dma.done.wait (%p4674_p11), [#allocation16], 2048  }
  0x7c   : > { %3289 = vsyncadd (%p4674_p11), [#allocation16], 4294965248  ;;  %p2733_p1 = scmp.ne.s32.totalorder %s3308_s27, 0 }
  0x7e   : > { %382 = sbr.rel (%p2733_p1) target bundleno = 134 (0x86), region = 76 }
  0x83   : > { %v3330_v0 = vmov 0.0  }
  0x84   : > { %383 = vst [vmem:[#allocation4] sm:$0xff] %v3330_v0  ;;  %384 = vst [vmem:[#allocation4 + $0x8] sm:$0xff] %v3330_v0 }
  0x85   : > { %385 = vst [vmem:[#allocation5 + $0x8] sm:$0xff] %v3330_v0  ;;  %386 = vst [vmem:[#allocation5] sm:$0xff] %v3330_v0 }
  0x86 PF: > { %v452_v1 = vld [vmem:[#allocation9 + $0x1e8] sm:$0xff]  ;;  %v454_v2 = vld [vmem:[#allocation9 + $0x1f8] sm:$0xff]  ;;  %v451_v3 = vld [vmem:[#allocation9 + $0x1e0] sm:$0xff]  ;;  %p2758_p12 = scmp.ne.s32.totalorder %s3308_s27, 1 }
  0x87   : > { %477 = vmatprep.subr.mxu0 %v452_v1  ;;  %566 = vmatprep.subr.mxu1 %v454_v2  ;;  %v453_v4 = vld [vmem:[#allocation9 + $0x1f0] sm:$0xff]  ;;  %v448_v5 = vld [vmem:[#allocation9 + $0x1c8] sm:$0xff]  ;;  %v450_v6 = vld [vmem:[#allocation9 + $0x1d8] sm:$0xff] }
  0x88   : > { %478 = vmatpush1.msra.mxu0 %v451_v3  ;;  %567 = vmatpush1.msra.mxu1 %v453_v4  ;;  %v447_v7 = vld [vmem:[#allocation9 + $0x1c0] sm:$0xff]  ;;  %v449_v8 = vld [vmem:[#allocation9 + $0x1d0] sm:$0xff]  ;;  %v444_v9 = vld [vmem:[#allocation9 + $0x1a8] sm:$0xff]  ;;  %v4550_v3 = vmov 0.0  }
  0x89   : > { %479 = vmatprep.subr.mxu0 %v448_v5  ;;  %568 = vmatprep.subr.mxu1 %v450_v6  ;;  %v446_v10 = vld [vmem:[#allocation9 + $0x1b8] sm:$0xff]  ;;  %v443_v11 = vld [vmem:[#allocation9 + $0x1a0] sm:$0xff]  ;;  %v445_v12 = vld [vmem:[#allocation9 + $0x1b0] sm:$0xff] }
  0x8a   : > { %480 = vmatpush1.msra.mxu0 %v447_v7  ;;  %569 = vmatpush1.msra.mxu1 %v449_v8  ;;  %v440_v13 = vld [vmem:[#allocation9 + $0x188] sm:$0xff]  ;;  %v442_v14 = vld [vmem:[#allocation9 + $0x198] sm:$0xff]  ;;  %v439_v15 = vld [vmem:[#allocation9 + $0x180] sm:$0xff] }
  0x8b   : > { %481 = vmatprep.subr.mxu0 %v444_v9  ;;  %570 = vmatprep.subr.mxu1 %v446_v10  ;;  %v441_v16 = vld [vmem:[#allocation9 + $0x190] sm:$0xff]  ;;  %v436_v17 = vld [vmem:[#allocation9 + $0x168] sm:$0xff]  ;;  %v438_v18 = vld [vmem:[#allocation9 + $0x178] sm:$0xff] }
  0x8c   : > { %482 = vmatpush1.msra.mxu0 %v443_v11  ;;  %571 = vmatpush1.msra.mxu1 %v445_v12  ;;  %v435_v19 = vld [vmem:[#allocation9 + $0x160] sm:$0xff]  ;;  %v437_v20 = vld [vmem:[#allocation9 + $0x170] sm:$0xff]  ;;  %v432_v21 = vld [vmem:[#allocation9 + $0x148] sm:$0xff] }
  0x8d   : > { %483 = vmatprep.subr.mxu0 %v440_v13  ;;  %572 = vmatprep.subr.mxu1 %v442_v14  ;;  %v434_v22 = vld [vmem:[#allocation9 + $0x158] sm:$0xff]  ;;  %v431_v23 = vld [vmem:[#allocation9 + $0x140] sm:$0xff]  ;;  %v433_v24 = vld [vmem:[#allocation9 + $0x150] sm:$0xff] }
  0x8e   : > { %484 = vmatpush1.msra.mxu0 %v439_v15  ;;  %573 = vmatpush1.msra.mxu1 %v441_v16  ;;  %v428_v25 = vld [vmem:[#allocation9 + $0x128] sm:$0xff]  ;;  %v430_v26 = vld [vmem:[#allocation9 + $0x138] sm:$0xff]  ;;  %v427_v27 = vld [vmem:[#allocation9 + $0x120] sm:$0xff] }
  0x8f   : > { %485 = vmatprep.subr.mxu0 %v436_v17  ;;  %574 = vmatprep.subr.mxu1 %v438_v18  ;;  %v429_v28 = vld [vmem:[#allocation9 + $0x130] sm:$0xff]  ;;  %v424_v29 = vld [vmem:[#allocation9 + $0x108] sm:$0xff]  ;;  %v426_v30 = vld [vmem:[#allocation9 + $0x118] sm:$0xff] }
  0x90   : > { %486 = vmatpush1.msra.mxu0 %v435_v19  ;;  %575 = vmatpush1.msra.mxu1 %v437_v20  ;;  %v423_v31 = vld [vmem:[#allocation9 + $0x100] sm:$0xff]  ;;  %v425_v32 = vld [vmem:[#allocation9 + $0x110] sm:$0xff]  ;;  %v420_v33 = vld [vmem:[#allocation9 + $0xe8] sm:$0xff] }
  0x91   : > { %487 = vmatprep.subr.mxu0 %v432_v21  ;;  %576 = vmatprep.subr.mxu1 %v434_v22  ;;  %v422_v34 = vld [vmem:[#allocation9 + $0xf8] sm:$0xff]  ;;  %v419_v35 = vld [vmem:[#allocation9 + $0xe0] sm:$0xff]  ;;  %v421_v36 = vld [vmem:[#allocation9 + $0xf0] sm:$0xff] }
  0x92   : > { %488 = vmatpush1.msra.mxu0 %v431_v23  ;;  %577 = vmatpush1.msra.mxu1 %v433_v24  ;;  %v416_v37 = vld [vmem:[#allocation9 + $0xc8] sm:$0xff]  ;;  %v418_v38 = vld [vmem:[#allocation9 + $0xd8] sm:$0xff]  ;;  %v415_v39 = vld [vmem:[#allocation9 + $0xc0] sm:$0xff] }
  0x93   : > { %489 = vmatprep.subr.mxu0 %v428_v25  ;;  %578 = vmatprep.subr.mxu1 %v430_v26  ;;  %v417_v40 = vld [vmem:[#allocation9 + $0xd0] sm:$0xff]  ;;  %v412_v41 = vld [vmem:[#allocation9 + $0xa8] sm:$0xff]  ;;  %v414_v42 = vld [vmem:[#allocation9 + $0xb8] sm:$0xff] }
  0x94   : > { %490 = vmatpush1.msra.mxu0 %v427_v27  ;;  %579 = vmatpush1.msra.mxu1 %v429_v28  ;;  %v411_v43 = vld [vmem:[#allocation9 + $0xa0] sm:$0xff]  ;;  %v413_v44 = vld [vmem:[#allocation9 + $0xb0] sm:$0xff]  ;;  %v408_v45 = vld [vmem:[#allocation9 + $0x88] sm:$0xff] }
  0x95   : > { %491 = vmatprep.subr.mxu0 %v424_v29  ;;  %580 = vmatprep.subr.mxu1 %v426_v30  ;;  %v410_v46 = vld [vmem:[#allocation9 + $0x98] sm:$0xff]  ;;  %v407_v47 = vld [vmem:[#allocation9 + $0x80] sm:$0xff]  ;;  %v409_v48 = vld [vmem:[#allocation9 + $0x90] sm:$0xff] }
  0x96   : > { %492 = vmatpush1.msra.mxu0 %v423_v31  ;;  %581 = vmatpush1.msra.mxu1 %v425_v32  ;;  %v404_v49 = vld [vmem:[#allocation9 + $0x68] sm:$0xff]  ;;  %v406_v50 = vld [vmem:[#allocation9 + $0x78] sm:$0xff]  ;;  %v403_v51 = vld [vmem:[#allocation9 + $0x60] sm:$0xff] }
  0x97   : > { %493 = vmatprep.subr.mxu0 %v420_v33  ;;  %582 = vmatprep.subr.mxu1 %v422_v34  ;;  %v405_v52 = vld [vmem:[#allocation9 + $0x70] sm:$0xff]  ;;  %v400_v53 = vld [vmem:[#allocation9 + $0x48] sm:$0xff]  ;;  %v402_v54 = vld [vmem:[#allocation9 + $0x58] sm:$0xff] }
  0x98   : > { %494 = vmatpush1.msra.mxu0 %v419_v35  ;;  %583 = vmatpush1.msra.mxu1 %v421_v36  ;;  %v399_v55 = vld [vmem:[#allocation9 + $0x40] sm:$0xff]  ;;  %v401_v56 = vld [vmem:[#allocation9 + $0x50] sm:$0xff]  ;;  %v396_v57 = vld [vmem:[#allocation9 + $0x28] sm:$0xff] }
  0x99   : > { %495 = vmatprep.subr.mxu0 %v416_v37  ;;  %584 = vmatprep.subr.mxu1 %v418_v38  ;;  %v398_v58 = vld [vmem:[#allocation9 + $0x38] sm:$0xff]  ;;  %v395_v59 = vld [vmem:[#allocation9 + $0x20] sm:$0xff]  ;;  %v397_v60 = vld [vmem:[#allocation9 + $0x30] sm:$0xff] }
  0x9a   : > { %496 = vmatpush1.msra.mxu0 %v415_v39  ;;  %585 = vmatpush1.msra.mxu1 %v417_v40  ;;  %v392_v61 = vld [vmem:[#allocation9 + $0x8] sm:$0xff]  ;;  %v394_v62 = vld [vmem:[#allocation9 + $0x18] sm:$0xff]  ;;  %v391_v63 = vld [vmem:[#allocation9] sm:$0xff] }
  0x9b   : > { %497 = vmatprep.subr.mxu0 %v412_v41  ;;  %586 = vmatprep.subr.mxu1 %v414_v42  ;;  %v393_v0 = vld [vmem:[#allocation9 + $0x10] sm:$0xff]  ;;  %v387_v1 = vld [vmem:[%s3516_s18] sm:$0xff]  ;;  %v3536_v2 = vld [vmem:[#allocation12 + $0x1e8] sm:$0xff] }
  0x9c   : > { %498 = vmatpush1.msra.mxu0 %v411_v43  ;;  %587 = vmatpush1.msra.mxu1 %v413_v44  ;;  %4675 = vst [vmem:[#allocation23_spill] sm:$0xff] %v3536_v2  ;;  %v3539_v4 = vld [vmem:[#allocation12 + $0x1f8] sm:$0xff]  ;;  %v3541_v5 = vld [vmem:[#allocation12 + $0x1e0] sm:$0xff]  ;;  %v3543_v6 = vld [vmem:[#allocation12 + $0x1f0] sm:$0xff] }
  0x9d   : > { %499 = vmatprep.subr.mxu0 %v408_v45  ;;  %588 = vmatprep.subr.mxu1 %v410_v46  ;;  %4676 = vst [vmem:[#allocation24_spill] sm:$0xff] %v3539_v4  ;;  %v3547_v7 = vld [vmem:[#allocation12 + $0x1c8] sm:$0xff]  ;;  %v3549_v8 = vld [vmem:[#allocation12 + $0x1d8] sm:$0xff]  ;;  %v3552_v9 = vld [vmem:[#allocation12 + $0x1c0] sm:$0xff] }
  0x9e   : > { %500 = vmatpush1.msra.mxu0 %v407_v47  ;;  %589 = vmatpush1.msra.mxu1 %v409_v48  ;;  %v3554_v10 = vld [vmem:[#allocation12 + $0x1d0] sm:$0xff]  ;;  %v3558_v11 = vld [vmem:[#allocation12 + $0x1a8] sm:$0xff]  ;;  %v3560_v12 = vld [vmem:[#allocation12 + $0x1b8] sm:$0xff] }
  0x9f   : > { %501 = vmatprep.subr.mxu0 %v404_v49  ;;  %590 = vmatprep.subr.mxu1 %v406_v50  ;;  %v3564_v13 = vld [vmem:[#allocation12 + $0x1a0] sm:$0xff]  ;;  %v3566_v14 = vld [vmem:[#allocation12 + $0x1b0] sm:$0xff]  ;;  %v3570_v15 = vld [vmem:[#allocation12 + $0x188] sm:$0xff] }
  0xa0   : > { %502 = vmatpush1.msra.mxu0 %v403_v51  ;;  %591 = vmatpush1.msra.mxu1 %v405_v52  ;;  %v3572_v16 = vld [vmem:[#allocation12 + $0x198] sm:$0xff]  ;;  %v3576_v17 = vld [vmem:[#allocation12 + $0x180] sm:$0xff]  ;;  %v3578_v18 = vld [vmem:[#allocation12 + $0x190] sm:$0xff] }
  0xa1   : > { %503 = vmatprep.subr.mxu0 %v400_v53  ;;  %592 = vmatprep.subr.mxu1 %v402_v54  ;;  %v3582_v19 = vld [vmem:[#allocation12 + $0x168] sm:$0xff]  ;;  %v3584_v20 = vld [vmem:[#allocation12 + $0x178] sm:$0xff]  ;;  %v3588_v21 = vld [vmem:[#allocation12 + $0x160] sm:$0xff] }
  0xa2   : > { %504 = vmatpush1.msra.mxu0 %v399_v55  ;;  %593 = vmatpush1.msra.mxu1 %v401_v56  ;;  %v3590_v22 = vld [vmem:[#allocation12 + $0x170] sm:$0xff]  ;;  %v3594_v23 = vld [vmem:[#allocation12 + $0x148] sm:$0xff]  ;;  %v3596_v24 = vld [vmem:[#allocation12 + $0x158] sm:$0xff] }
  0xa3   : > { %505 = vmatprep.subr.mxu0 %v396_v57  ;;  %594 = vmatprep.subr.mxu1 %v398_v58  ;;  %v3600_v25 = vld [vmem:[#allocation12 + $0x140] sm:$0xff]  ;;  %v3602_v26 = vld [vmem:[#allocation12 + $0x150] sm:$0xff]  ;;  %v3606_v27 = vld [vmem:[#allocation12 + $0x128] sm:$0xff] }
  0xa4   : > { %506 = vmatpush1.msra.mxu0 %v395_v59  ;;  %595 = vmatpush1.msra.mxu1 %v397_v60  ;;  %v3608_v28 = vld [vmem:[#allocation12 + $0x138] sm:$0xff]  ;;  %v3612_v29 = vld [vmem:[#allocation12 + $0x120] sm:$0xff]  ;;  %v3614_v30 = vld [vmem:[#allocation12 + $0x130] sm:$0xff] }
  0xa5   : > { %507 = vmatprep.subr.mxu0 %v392_v61  ;;  %596 = vmatprep.subr.mxu1 %v394_v62  ;;  %v3618_v31 = vld [vmem:[#allocation12 + $0x108] sm:$0xff]  ;;  %v3620_v32 = vld [vmem:[#allocation12 + $0x118] sm:$0xff]  ;;  %v3624_v33 = vld [vmem:[#allocation12 + $0x100] sm:$0xff] }
  0xa6   : > { %508 = vmatpush1.msra.mxu0 %v391_v63  ;;  %541 = vmatprep.mubr.f32.mxu0 %v4550_v3  ;;  %v3626_v34 = vld [vmem:[#allocation12 + $0x110] sm:$0xff]  ;;  %v3630_v35 = vld [vmem:[#allocation12 + $0xe8] sm:$0xff]  ;;  %v3632_v36 = vld [vmem:[#allocation12 + $0xf8] sm:$0xff] }
  0xa7   : > { %597 = vmatpush1.msra.mxu1 %v393_v0  ;;  %542 = vmatmul.mubr.f32.vlgmr.msra.gmra.mxu0 %v387_v1  ;;  %v3636_v37 = vld [vmem:[#allocation12 + $0xe0] sm:$0xff]  ;;  %v3640_v38 = vld [vmem:[#allocation12 + $0xf0] sm:$0xff]  ;;  %v388_v39 = vld [vmem:[%s3516_s18 + $0x8] sm:$0xff] }
  0xa8   : > { %630 = vmatprep.mubr.f32.mxu1 %v4550_v3  ;;  %741 = vmatprep.subr.mxu0 %v3536_v2  ;;  %v3645_v40 = vld [vmem:[#allocation12 + $0xc8] sm:$0xff]  ;;  %v3647_v41 = vld [vmem:[#allocation12 + $0xd8] sm:$0xff]  ;;  %v3651_v42 = vld [vmem:[#allocation12 + $0xc0] sm:$0xff] }
  0xa9   : > { %812 = vmatprep.subr.mxu1 %v3539_v4  ;;  %631 = vmatmul.mubr.f32.vlgmr.msra.gmra.mxu1 %v387_v1  ;;  %v3654_v43 = vld [vmem:[#allocation12 + $0xd0] sm:$0xff]  ;;  %v3656_v44 = vld [vmem:[#allocation12 + $0xa8] sm:$0xff]  ;;  %v3660_v45 = vld [vmem:[#allocation12 + $0xb8] sm:$0xff] }
  0xaa   : > { %742 = vmatpush1.msra.mxu0 %v3541_v5  ;;  %813 = vmatpush1.msra.mxu1 %v3543_v6  ;;  %4677 = vst [vmem:[#allocation25_spill] sm:$0xff] %v3656_v44  ;;  %4678 = vst [vmem:[#allocation26_spill] sm:$0xff] %v3660_v45  ;;  %v3664_v46 = vld [vmem:[#allocation12 + $0xa0] sm:$0xff]  ;;  %v3668_v47 = vld [vmem:[#allocation12 + $0xb0] sm:$0xff] }
  0xab   : > { %743 = vmatprep.subr.mxu0 %v3547_v7  ;;  %814 = vmatprep.subr.mxu1 %v3549_v8  ;;  %4679 = vst [vmem:[#allocation27_spill] sm:$0xff] %v3664_v46  ;;  %4680 = vst [vmem:[#allocation28_spill] sm:$0xff] %v3668_v47  ;;  %v389_v48 = vld [vmem:[%s3516_s18 + $0x10] sm:$0xff]  ;;  %v3672_v49 = vld [vmem:[#allocation12 + $0x88] sm:$0xff] }
  0xac   : > { %744 = vmatpush1.msra.mxu0 %v3552_v9  ;;  %815 = vmatpush1.msra.mxu1 %v3554_v10  ;;  %4681 = vst [vmem:[#allocation29_spill] sm:$0xff] %v3672_v49  ;;  %v3674_v50 = vld [vmem:[#allocation12 + $0x98] sm:$0xff]  ;;  %v3678_v51 = vld [vmem:[#allocation12 + $0x80] sm:$0xff]  ;;  %v3681_v52 = vld [vmem:[#allocation12 + $0x90] sm:$0xff] }
  0xad   : > { %745 = vmatprep.subr.mxu0 %v3558_v11  ;;  %816 = vmatprep.subr.mxu1 %v3560_v12  ;;  %4682 = vst [vmem:[#allocation30_spill] sm:$0xff] %v3674_v50  ;;  %4683 = vst [vmem:[#allocation31_spill] sm:$0xff] %v3678_v51  ;;  %v3683_v53 = vld [vmem:[#allocation12 + $0x68] sm:$0xff]  ;;  %v3687_v54 = vld [vmem:[#allocation12 + $0x78] sm:$0xff] }
  0xae   : > { %746 = vmatpush1.msra.mxu0 %v3564_v13  ;;  %817 = vmatpush1.msra.mxu1 %v3566_v14  ;;  %4684 = vst [vmem:[#allocation32_spill] sm:$0xff] %v3681_v52  ;;  %4685 = vst [vmem:[#allocation33_spill] sm:$0xff] %v3683_v53  ;;  %v3691_v55 = vld [vmem:[#allocation12 + $0x60] sm:$0xff]  ;;  %v3695_v56 = vld [vmem:[#allocation12 + $0x70] sm:$0xff] }
  0xaf   : > { %747 = vmatprep.subr.mxu0 %v3570_v15  ;;  %818 = vmatprep.subr.mxu1 %v3572_v16  ;;  %4686 = vst [vmem:[#allocation34_spill] sm:$0xff] %v3687_v54  ;;  %4687 = vst [vmem:[#allocation35_spill] sm:$0xff] %v3691_v55  ;;  %v390_v57 = vld [vmem:[%s3516_s18 + $0x18] sm:$0xff]  ;;  %v3699_v58 = vld [vmem:[#allocation12 + $0x48] sm:$0xff] }
  0xb0   : > { %748 = vmatpush1.msra.mxu0 %v3576_v17  ;;  %819 = vmatpush1.msra.mxu1 %v3578_v18  ;;  %4688 = vst [vmem:[#allocation36_spill] sm:$0xff] %v3695_v56  ;;  %4689 = vst [vmem:[#allocation37_spill] sm:$0xff] %v3699_v58  ;;  %v3701_v59 = vld [vmem:[#allocation12 + $0x58] sm:$0xff]  ;;  %v3705_v60 = vld [vmem:[#allocation12 + $0x40] sm:$0xff] }
  0xb1   : > { %749 = vmatprep.subr.mxu0 %v3582_v19  ;;  %820 = vmatprep.subr.mxu1 %v3584_v20  ;;  %4690 = vst [vmem:[#allocation38_spill] sm:$0xff] %v3701_v59  ;;  %4691 = vst [vmem:[#allocation39_spill] sm:$0xff] %v3705_v60  ;;  %v3708_v61 = vld [vmem:[#allocation12 + $0x50] sm:$0xff]  ;;  %v3710_v62 = vld [vmem:[#allocation12 + $0x28] sm:$0xff] }
  0xb2   : > { %750 = vmatpush1.msra.mxu0 %v3588_v21  ;;  %821 = vmatpush1.msra.mxu1 %v3590_v22  ;;  %4692 = vst [vmem:[#allocation40_spill] sm:$0xff] %v3708_v61  ;;  %4693 = vst [vmem:[#allocation41_spill] sm:$0xff] %v3710_v62  ;;  %v3714_v63 = vld [vmem:[#allocation12 + $0x38] sm:$0xff]  ;;  %v3718_v0 = vld [vmem:[#allocation12 + $0x20] sm:$0xff] }
  0xb3   : > { %751 = vmatprep.subr.mxu0 %v3594_v23  ;;  %822 = vmatprep.subr.mxu1 %v3596_v24  ;;  %4694 = vst [vmem:[#allocation42_spill] sm:$0xff] %v3714_v63  ;;  %4695 = vst [vmem:[#allocation43_spill] sm:$0xff] %v3718_v0  ;;  %v3720_v1 = vld [vmem:[#allocation12 + $0x30] sm:$0xff] }
  0xb4   : > { %752 = vmatpush1.msra.mxu0 %v3600_v25  ;;  %823 = vmatpush1.msra.mxu1 %v3602_v26  ;;  %4696 = vst [vmem:[#allocation44_spill] sm:$0xff] %v3720_v1 }
  0xb5   : > { %753 = vmatprep.subr.mxu0 %v3606_v27  ;;  %824 = vmatprep.subr.mxu1 %v3608_v28 }
  0xb6   : > { %754 = vmatpush1.msra.mxu0 %v3612_v29  ;;  %825 = vmatpush1.msra.mxu1 %v3614_v30 }
  0xb7   : > { %755 = vmatprep.subr.mxu0 %v3618_v31  ;;  %826 = vmatprep.subr.mxu1 %v3620_v32 }
  0xb8   : > { %756 = vmatpush1.msra.mxu0 %v3624_v33  ;;  %827 = vmatpush1.msra.mxu1 %v3626_v34 }
  0xb9   : > { %757 = vmatprep.subr.mxu0 %v3630_v35  ;;  %828 = vmatprep.subr.mxu1 %v3632_v36 }
  0xba   : > { %547 = vmatprep.mubr.f32.mxu0 %v4550_v3  ;;  %758 = vmatpush1.msra.mxu0 %v3636_v37 }
  0xbb   : > { %829 = vmatpush1.msra.mxu1 %v3640_v38  ;;  %548 = vmatmul.mubr.f32.gmra.mxu0 %v388_v39 }
  0xbc   : > { %759 = vmatprep.subr.mxu0 %v3645_v40  ;;  %830 = vmatprep.subr.mxu1 %v3647_v41 }
  0xbd   : > { %636 = vmatprep.mubr.f32.mxu1 %v4550_v3  ;;  %760 = vmatpush1.msra.mxu0 %v3651_v42 }
  0xbe   : > { %831 = vmatpush1.msra.mxu1 %v3654_v43  ;;  %761 = vmatprep.subr.mxu0 %v3656_v44 }
  0xbf   : > { %637 = vmatmul.mubr.f32.gmra.mxu1 %v388_v39  ;;  %832 = vmatprep.subr.mxu1 %v3660_v45  ;;  %v3724_v39 = vld [vmem:[#allocation12 + $0x8] sm:$0xff] }
  0xc0   : > { %553 = vmatprep.mubr.f32.mxu0 %v4550_v3  ;;  %762 = vmatpush1.msra.mxu0 %v3664_v46  ;;  %4697 = vst [vmem:[#allocation45_spill] sm:$0xff] %v3724_v39 }
  0xc1   : > { %833 = vmatpush1.msra.mxu1 %v3668_v47  ;;  %554 = vmatmul.mubr.f32.gmra.mxu0 %v389_v48 }
  0xc2   : > { %763 = vmatprep.subr.mxu0 %v3672_v49  ;;  %834 = vmatprep.subr.mxu1 %v3674_v50 }
  0xc3   : > { %642 = vmatprep.mubr.f32.mxu1 %v4550_v3  ;;  %764 = vmatpush1.msra.mxu0 %v3678_v51 }
  0xc4   : > { %835 = vmatpush1.msra.mxu1 %v3681_v52  ;;  %765 = vmatprep.subr.mxu0 %v3683_v53 }
  0xc5   : > { %643 = vmatmul.mubr.f32.gmra.mxu1 %v389_v48  ;;  %836 = vmatprep.subr.mxu1 %v3687_v54  ;;  %v3726_v48 = vld [vmem:[#allocation12 + $0x18] sm:$0xff] }
  0xc6   : > { %559 = vmatprep.mubr.f32.mxu0 %v4550_v3  ;;  %766 = vmatpush1.msra.mxu0 %v3691_v55  ;;  %4698 = vst [vmem:[#allocation46_spill] sm:$0xff] %v3726_v48 }
  0xc7   : > { %837 = vmatpush1.msra.mxu1 %v3695_v56  ;;  %560 = vmatmul.mubr.f32.gmra.mxu0 %v390_v57 }
  0xc8   : > { %767 = vmatprep.subr.mxu0 %v3699_v58  ;;  %838 = vmatprep.subr.mxu1 %v3701_v59  ;;  %v3729_v59 = vld [vmem:[#allocation12] sm:$0xff] }
  0xc9   : > { %648 = vmatprep.mubr.f32.mxu1 %v4550_v3  ;;  %768 = vmatpush1.msra.mxu0 %v3705_v60  ;;  %4699 = vst [vmem:[#allocation47_spill] sm:$0xff] %v3729_v59  ;;  %v3733_v3 = vld [vmem:[#allocation12 + $0x10] sm:$0xff] }
  0xca   : > { %839 = vmatpush1.msra.mxu1 %v3708_v61  ;;  %769 = vmatprep.subr.mxu0 %v3710_v62  ;;  %4700 = vst [vmem:[#allocation48_spill] sm:$0xff] %v3733_v3  ;;  %v735_v62 = vld [vmem:[#allocation4] sm:$0xff]  ;;  %v4701_v61 = vmov 0.0  }
  0xcb   : > { %649 = vmatmul.mubr.f32.gmra.mxu1 %v390_v57  ;;  %840 = vmatprep.subr.mxu1 %v3714_v63  ;;  %v4702_v57 = vld [vmem:[#allocation38_spill] sm:$0xff] }
  0xcc   : > { %770 = vmatpush1.msra.mxu0 %v3718_v0  ;;  %841 = vmatpush1.msra.mxu1 %v3720_v1 }
  0xcd   : > { %771 = vmatprep.subr.mxu0 %v3724_v39  ;;  %842 = vmatprep.subr.mxu1 %v3726_v48 }
  0xce   : > { %772 = vmatpush1.msra.mxu0 %v3729_v59  ;;  %805 = vmatprep.mubr.f32.mxu0 %v4701_v61 }
  0xcf   : > { %843 = vmatpush1.msra.mxu1 %v3733_v3  ;;  %876 = vmatprep.mubr.f32.mxu1 %v4701_v61 }
  0xd0   : > { %806 = vmatmul.mubr.f32.vlgmr.msra.gmra.mxu0 %v735_v62  ;;  %877 = vmatmul.mubr.f32.vlgmr.msra.gmra.mxu1 %v735_v62  ;;  %v4703_v62 = vld [vmem:[#allocation40_spill] sm:$0xff] }
  0xd1   : > { %917 = vmatprep.subr.mxu0 %v3536_v2  ;;  %988 = vmatprep.subr.mxu1 %v3539_v4 }
  0xd2   : > { %918 = vmatpush1.msra.mxu0 %v3541_v5  ;;  %989 = vmatpush1.msra.mxu1 %v3543_v6 }
  0xd3   : > { %919 = vmatprep.subr.mxu0 %v3547_v7  ;;  %990 = vmatprep.subr.mxu1 %v3549_v8 }
  0xd4   : > { %920 = vmatpush1.msra.mxu0 %v3552_v9  ;;  %991 = vmatpush1.msra.mxu1 %v3554_v10 }
  0xd5   : > { %921 = vmatprep.subr.mxu0 %v3558_v11  ;;  %992 = vmatprep.subr.mxu1 %v3560_v12 }
  0xd6   : > { %922 = vmatpush1.msra.mxu0 %v3564_v13  ;;  %993 = vmatpush1.msra.mxu1 %v3566_v14 }
  0xd7   : > { %923 = vmatprep.subr.mxu0 %v3570_v15  ;;  %994 = vmatprep.subr.mxu1 %v3572_v16 }
  0xd8   : > { %924 = vmatpush1.msra.mxu0 %v3576_v17  ;;  %995 = vmatpush1.msra.mxu1 %v3578_v18 }
  0xd9   : > { %925 = vmatprep.subr.mxu0 %v3582_v19  ;;  %996 = vmatprep.subr.mxu1 %v3584_v20 }
  0xda   : > { %926 = vmatpush1.msra.mxu0 %v3588_v21  ;;  %997 = vmatpush1.msra.mxu1 %v3590_v22 }
  0xdb   : > { %927 = vmatprep.subr.mxu0 %v3594_v23  ;;  %998 = vmatprep.subr.mxu1 %v3596_v24 }
  0xdc   : > { %928 = vmatpush1.msra.mxu0 %v3600_v25  ;;  %999 = vmatpush1.msra.mxu1 %v3602_v26 }
  0xdd   : > { %929 = vmatprep.subr.mxu0 %v3606_v27  ;;  %1000 = vmatprep.subr.mxu1 %v3608_v28 }
  0xde   : > { %930 = vmatpush1.msra.mxu0 %v3612_v29  ;;  %1001 = vmatpush1.msra.mxu1 %v3614_v30 }
  0xdf   : > { %931 = vmatprep.subr.mxu0 %v3618_v31  ;;  %1002 = vmatprep.subr.mxu1 %v3620_v32 }
  0xe0   : > { %932 = vmatpush1.msra.mxu0 %v3624_v33  ;;  %1003 = vmatpush1.msra.mxu1 %v3626_v34 }
  0xe1   : > { %933 = vmatprep.subr.mxu0 %v3630_v35  ;;  %1004 = vmatprep.subr.mxu1 %v3632_v36 }
  0xe2   : > { %934 = vmatpush1.msra.mxu0 %v3636_v37  ;;  %1005 = vmatpush1.msra.mxu1 %v3640_v38 }
  0xe3   : > { %935 = vmatprep.subr.mxu0 %v3645_v40  ;;  %1006 = vmatprep.subr.mxu1 %v3647_v41 }
  0xe4   : > { %936 = vmatpush1.msra.mxu0 %v3651_v42  ;;  %1007 = vmatpush1.msra.mxu1 %v3654_v43 }
  0xe5   : > { %937 = vmatprep.subr.mxu0 %v3656_v44  ;;  %1008 = vmatprep.subr.mxu1 %v3660_v45 }
  0xe6   : > { %938 = vmatpush1.msra.mxu0 %v3664_v46  ;;  %1009 = vmatpush1.msra.mxu1 %v3668_v47 }
  0xe7   : > { %939 = vmatprep.subr.mxu0 %v3672_v49  ;;  %1010 = vmatprep.subr.mxu1 %v3674_v50  ;;  %v4704_v50 = vld [vmem:[#allocation41_spill] sm:$0xff] }
  0xe8   : > { %940 = vmatpush1.msra.mxu0 %v3678_v51  ;;  %1011 = vmatpush1.msra.mxu1 %v3681_v52 }
  0xe9   : > { %941 = vmatprep.subr.mxu0 %v3683_v53  ;;  %1012 = vmatprep.subr.mxu1 %v3687_v54 }
  0xea   : > { %942 = vmatpush1.msra.mxu0 %v3691_v55  ;;  %1013 = vmatpush1.msra.mxu1 %v3695_v56 }
  0xeb   : > { %943 = vmatprep.subr.mxu0 %v3699_v58  ;;  %1014 = vmatprep.subr.mxu1 %v4702_v57 }
  0xec   : > { %944 = vmatpush1.msra.mxu0 %v3705_v60  ;;  %1015 = vmatpush1.msra.mxu1 %v4703_v62 }
  0xed   : > { %945 = vmatprep.subr.mxu0 %v4704_v50  ;;  %1016 = vmatprep.subr.mxu1 %v3714_v63  ;;  %v457_v63 = vlaneseq  ;;  %v455_v50 = vld [vmem:[#allocation14] sm:$0xf] }
  0xee   : > { %946 = vmatpush1.msra.mxu0 %v3718_v0  ;;  %1017 = vmatpush1.msra.mxu1 %v3720_v1 }
  0xef   : > { %947 = vmatprep.subr.mxu0 %v3724_v39  ;;  %1018 = vmatprep.subr.mxu1 %v3726_v48  ;;  %v3809_v0 = vshrl.u32 %v457_v63, 7 }
  0xf0   : > { %948 = vmatpush1.msra.mxu0 %v3729_v59  ;;  %981 = vmatprep.mubr.f32.mxu0 %v4701_v61 }
  0xf1   : > { %1019 = vmatpush1.msra.mxu1 %v3733_v3  ;;  %1052 = vmatprep.mubr.f32.mxu1 %v4701_v61  ;;  %4705 = vst [vmem:[#allocation49_spill] sm:$0xff] %v3809_v0  ;;  %v4585_v39 = vsub.s32 0, %v3809_v0  ;;  %v4594_v59 = vsub.s32 1, %v3809_v0  ;;  %v4599_v61 = vsub.s32 2, %v3809_v0  ;;  %v4602_v57 = vsub.s32 3, %v3809_v0 }
  0xf2   : > { %1094 = vmatprep.subr.mxu0 %v3536_v2  ;;  %1165 = vmatprep.subr.mxu1 %v3539_v4 }
  0xf3   : > { %v460_v3 = vrot.slane %v455_v50, %v4585_v39  ;;  %v464_v4 = vrot.slane %v455_v50, %v4594_v59  ;;  %v468_v56 = vrot.slane %v455_v50, %v4599_v61  ;;  %v472_v39 = vrot.slane %v455_v50, %v4602_v57 }
 0x167   : > { %v543_v1 = vpop.f32.mrf.mxu0 }
 0x169   : > { %v632_v48 = vpop.f32.mrf.mxu1  ;;  %v545_v62 = vpop.f32.mrf.mxu0 }
 0x16b   : > { %v634_v2 = vpop.f32.mrf.mxu1 }
 0x17b   : > { %v549_v60 = vpop.f32.mrf.mxu0 }
 0x17c   : > { %v3818_v63 = vadd.f32 %v549_v60, %v460_v3 }
 0x17d   : > { %v551_v58 = vpop.f32.mrf.mxu0 }
 0x17e   : > { %4706 = vst [vmem:[#allocation50_spill] sm:$0xff] %v3818_v63  ;;  %v3823_v55 = vadd.f32 %v551_v58, %v464_v4 }
 0x17f   : > { %v638_v54 = vpop.f32.mrf.mxu1 }
 0x180   : > { %4707 = vst [vmem:[#allocation51_spill] sm:$0xff] %v3823_v55  ;;  %v3827_v53 = vadd.f32 %v638_v54, %v468_v56 }
 0x181   : > { %v555_v52 = vpop.f32.mrf.mxu0  ;;  %v640_v51 = vpop.f32.mrf.mxu1 }
 0x182   : > { %4708 = vst [vmem:[#allocation52_spill] sm:$0xff] %v3827_v53  ;;  %v3829_v49 = vadd.f32 %v555_v52, %v460_v3  ;;  %v3831_v60 = vadd.f32 %v640_v51, %v472_v39  ;;  %v546_v53 = vadd.f32 %v545_v62, %v464_v4 }
 0x183   : > { %v557_v59 = vpop.f32.mrf.mxu0 }
 0x184   : > { %4709 = vst [vmem:[#allocation53_spill] sm:$0xff] %v3829_v49  ;;  %4710 = vst [vmem:[#allocation54_spill] sm:$0xff] %v3831_v60  ;;  %v3833_v63 = vadd.f32 %v557_v59, %v464_v4  ;;  %v544_v59 = vadd.f32 %v543_v1, %v460_v3 }
 0x185   : > { %v644_v47 = vpop.f32.mrf.mxu1 }
 0x186   : > { %4711 = vst [vmem:[#allocation55_spill] sm:$0xff] %v3833_v63  ;;  %v3835_v46 = vadd.f32 %v644_v47, %v468_v56 }
 0x187   : > { %v561_v58 = vpop.f32.mrf.mxu0  ;;  %v646_v61 = vpop.f32.mrf.mxu1 }
 0x188   : > { %4712 = vst [vmem:[#allocation56_spill] sm:$0xff] %v3835_v46  ;;  %v3837_v55 = vadd.f32 %v561_v58, %v460_v3  ;;  %v3839_v0 = vadd.f32 %v646_v61, %v472_v39 }
 0x189   : > { %v563_v50 = vpop.f32.mrf.mxu0 }
 0x18a   : > { %4713 = vst [vmem:[#allocation57_spill] sm:$0xff] %v3837_v55  ;;  %4714 = vst [vmem:[#allocation58_spill] sm:$0xff] %v3839_v0  ;;  %v3841_v54 = vadd.f32 %v563_v50, %v464_v4  ;;  %v635_v50 = vadd.f32 %v634_v2, %v472_v39  ;;  %v633_v0 = vadd.f32 %v632_v48, %v468_v56  ;;  %v4721_v48 = vld [vmem:[#allocation27_spill] sm:$0xff] }
 0x18b   : > { %v650_v57 = vpop.f32.mrf.mxu1 }
 0x18c   : > { %4715 = vst [vmem:[#allocation59_spill] sm:$0xff] %v3841_v54  ;;  %v3843_v52 = vadd.f32 %v650_v57, %v468_v56 }
 0x18d   : > { %v652_v51 = vpop.f32.mrf.mxu1 }
 0x18e   : > { %4716 = vst [vmem:[#allocation60_spill] sm:$0xff] %v3843_v52  ;;  %v3845_v49 = vadd.f32 %v652_v51, %v472_v39 }
 0x190   : > { %4717 = vst [vmem:[#allocation61_spill] sm:$0xff] %v3845_v49  ;;  %v807_v63 = vpop.f32.mrf.mxu0  ;;  %v878_v58 = vpop.f32.mrf.mxu1 }
 0x191   : > { %v883_v47 = vadd.f32 %v807_v63, %v544_v59  ;;  %v885_v44 = vadd.f32 %v878_v58, %v633_v0  ;;  %v4725_v59 = vld [vmem:[#allocation31_spill] sm:$0xff]  ;;  %v4727_v58 = vld [vmem:[#allocation33_spill] sm:$0xff] }
 0x192   : > { %v809_v46 = vpop.f32.mrf.mxu0  ;;  %v880_v55 = vpop.f32.mrf.mxu1 }
 0x193   : > { %v2734_v60 = vmul.f32 -1.442695, %v883_v47  ;;  %v884_v45 = vadd.f32 %v809_v46, %v546_v53  ;;  %v886_v54 = vadd.f32 %v880_v55, %v635_v50  ;;  %v736_v53 = vld [vmem:[#allocation5 + $0x8] sm:$0xff]  ;;  %v4729_v50 = vld [vmem:[#allocation35_spill] sm:$0xff] }
 0x194   : > { %v4726_v47 = vld [vmem:[#allocation32_spill] sm:$0xff] }
 0x195   : > { %2940 = vpow2.f32 %v2734_v60  ;;  %v2735_v61 = vmul.f32 -1.442695, %v884_v45  ;;  %v2736_v57 = vmul.f32 -1.442695, %v886_v54  ;;  %v4722_v60 = vld [vmem:[#allocation28_spill] sm:$0xff]  ;;  %v4723_v54 = vld [vmem:[#allocation29_spill] sm:$0xff] }
 0x197   : > { %2942 = vpow2.f32 %v2735_v61  ;;  %v4728_v61 = vld [vmem:[#allocation34_spill] sm:$0xff] }
 0x198   : > { %2944 = vpow2.f32 %v2736_v57  ;;  %v4730_v57 = vld [vmem:[#allocation36_spill] sm:$0xff] }
 0x1a2   : > { %v2941_v52 = vpop.eup %2940 }
 0x1a3   : > { %v896_v51 = vadd.f32 1.0, %v2941_v52  ;;  %v4724_v52 = vld [vmem:[#allocation30_spill] sm:$0xff] }
 0x1a4   : > { %v2943_v49 = vpop.eup %2942 }
 0x1a5   : > { %2946 = vrcp.f32 %v896_v51  ;;  %v897_v3 = vadd.f32 1.0, %v2943_v49  ;;  %v2945_v4 = vpop.eup %2944  ;;  %v4720_v49 = vld [vmem:[#allocation26_spill] sm:$0xff]  ;;  %v4731_v51 = vld [vmem:[#allocation37_spill] sm:$0xff] }
 0x1a6   : > { %2948 = vtanh.f32 %v885_v44  ;;  %v898_v62 = vadd.f32 1.0, %v2945_v4  ;;  %v4719_v44 = vld [vmem:[#allocation25_spill] sm:$0xff]  ;;  %v4733_v4 = vld [vmem:[#allocation39_spill] sm:$0xff] }
 0x1a7   : > { %2950 = vrcp.f32 %v897_v3  ;;  %v4732_v3 = vld [vmem:[#allocation38_spill] sm:$0xff] }
 0x1a8   : > { %2952 = vrcp.f32 %v898_v62  ;;  %v4738_v62 = vld [vmem:[#allocation44_spill] sm:$0xff] }
 0x1b2   : > { %v2947_v46 = vpop.eup %2946 }
 0x1b3   : > { %v2949_v1 = vpop.eup %2948 }
 0x1b4   : > { %v2951_v45 = vpop.eup %2950  ;;  %v907_v63 = vmul.f32 %v2949_v1, %v2947_v46  ;;  %v4734_v46 = vld [vmem:[#allocation40_spill] sm:$0xff]  ;;  %v4736_v1 = vld [vmem:[#allocation42_spill] sm:$0xff] }
 0x1b5   : > { %v906_v2 = vmul.f32 %v2951_v45, %v736_v53  ;;  %v2953_v56 = vpop.eup %2952  ;;  %v4735_v53 = vld [vmem:[#allocation41_spill] sm:$0xff]  ;;  %v4737_v45 = vld [vmem:[#allocation43_spill] sm:$0xff] }
 0x1b7   : > { %v3847_v55 = vadd.f32 %v907_v63, %v906_v2  ;;  %v4739_v63 = vld [vmem:[#allocation45_spill] sm:$0xff]  ;;  %v4740_v2 = vld [vmem:[#allocation46_spill] sm:$0xff] }
 0x1b9   : > { %2954 = vtanh.f32 %v3847_v55 }
 0x1c6   : > { %v2955_v0 = vpop.eup %2954 }
 0x1c7   : > { %v3850_v39 = vmul.f32 %v2955_v0, %v2953_v56  ;;  %v4741_v56 = vld [vmem:[#allocation47_spill] sm:$0xff]  ;;  %v4742_v0 = vmov 0.0  }
 0x1c9   : > { %4718 = vst [vmem:[#allocation62_spill] sm:$0xff] %v3850_v39  ;;  %982 = vmatmul.mubr.f32.vlgmr.msra.gmra.mxu0 %v3850_v39  ;;  %1053 = vmatmul.mubr.f32.vlgmr.msra.gmra.mxu1 %v3850_v39  ;;  %v4743_v39 = vld [vmem:[#allocation48_spill] sm:$0xff] }
 0x1ca   : > { %1095 = vmatpush1.msra.mxu0 %v3541_v5  ;;  %1166 = vmatpush1.msra.mxu1 %v3543_v6 }
 0x1cb   : > { %1096 = vmatprep.subr.mxu0 %v3547_v7  ;;  %1167 = vmatprep.subr.mxu1 %v3549_v8 }
 0x1cc   : > { %1097 = vmatpush1.msra.mxu0 %v3552_v9  ;;  %1168 = vmatpush1.msra.mxu1 %v3554_v10 }
 0x1cd   : > { %1098 = vmatprep.subr.mxu0 %v3558_v11  ;;  %1169 = vmatprep.subr.mxu1 %v3560_v12 }
 0x1ce   : > { %1099 = vmatpush1.msra.mxu0 %v3564_v13  ;;  %1170 = vmatpush1.msra.mxu1 %v3566_v14 }
 0x1cf   : > { %1100 = vmatprep.subr.mxu0 %v3570_v15  ;;  %1171 = vmatprep.subr.mxu1 %v3572_v16 }
 0x1d0   : > { %1101 = vmatpush1.msra.mxu0 %v3576_v17  ;;  %1172 = vmatpush1.msra.mxu1 %v3578_v18 }
 0x1d1   : > { %1102 = vmatprep.subr.mxu0 %v3582_v19  ;;  %1173 = vmatprep.subr.mxu1 %v3584_v20 }
 0x1d2   : > { %1103 = vmatpush1.msra.mxu0 %v3588_v21  ;;  %1174 = vmatpush1.msra.mxu1 %v3590_v22 }
 0x1d3   : > { %1104 = vmatprep.subr.mxu0 %v3594_v23  ;;  %1175 = vmatprep.subr.mxu1 %v3596_v24 }
 0x1d4   : > { %1105 = vmatpush1.msra.mxu0 %v3600_v25  ;;  %1176 = vmatpush1.msra.mxu1 %v3602_v26 }
 0x1d5   : > { %1106 = vmatprep.subr.mxu0 %v3606_v27  ;;  %1177 = vmatprep.subr.mxu1 %v3608_v28 }
 0x1d6   : > { %1107 = vmatpush1.msra.mxu0 %v3612_v29  ;;  %1178 = vmatpush1.msra.mxu1 %v3614_v30 }
 0x1d7   : > { %1108 = vmatprep.subr.mxu0 %v3618_v31  ;;  %1179 = vmatprep.subr.mxu1 %v3620_v32 }
 0x1d8   : > { %1109 = vmatpush1.msra.mxu0 %v3624_v33  ;;  %1180 = vmatpush1.msra.mxu1 %v3626_v34 }
 0x1d9   : > { %1110 = vmatprep.subr.mxu0 %v3630_v35  ;;  %1181 = vmatprep.subr.mxu1 %v3632_v36 }
 0x1da   : > { %1111 = vmatpush1.msra.mxu0 %v3636_v37  ;;  %1182 = vmatpush1.msra.mxu1 %v3640_v38 }
 0x1db   : > { %1112 = vmatprep.subr.mxu0 %v3645_v40  ;;  %1183 = vmatprep.subr.mxu1 %v3647_v41 }
 0x1dc   : > { %1113 = vmatpush1.msra.mxu0 %v3651_v42  ;;  %1184 = vmatpush1.msra.mxu1 %v3654_v43 }
 0x1dd   : > { %1114 = vmatprep.subr.mxu0 %v4719_v44  ;;  %1185 = vmatprep.subr.mxu1 %v4720_v49 }
 0x1de   : > { %1115 = vmatpush1.msra.mxu0 %v4721_v48  ;;  %1186 = vmatpush1.msra.mxu1 %v4722_v60 }
 0x1df   : > { %1116 = vmatprep.subr.mxu0 %v4723_v54  ;;  %1187 = vmatprep.subr.mxu1 %v4724_v52 }
 0x1e0   : > { %1117 = vmatpush1.msra.mxu0 %v4725_v59  ;;  %1188 = vmatpush1.msra.mxu1 %v4726_v47 }
 0x1e1   : > { %1118 = vmatprep.subr.mxu0 %v4727_v58  ;;  %1189 = vmatprep.subr.mxu1 %v4728_v61  ;;  %v4749_v61 = vld [vmem:[#allocation52_spill] sm:$0xff] }
 0x1e2   : > { %1119 = vmatpush1.msra.mxu0 %v4729_v50  ;;  %1190 = vmatpush1.msra.mxu1 %v4730_v57  ;;  %v4748_v50 = vld [vmem:[#allocation54_spill] sm:$0xff] }
 0x1e3   : > { %1120 = vmatprep.subr.mxu0 %v4731_v51  ;;  %1191 = vmatprep.subr.mxu1 %v4732_v3 }
 0x1e4   : > { %1121 = vmatpush1.msra.mxu0 %v4733_v4  ;;  %1192 = vmatpush1.msra.mxu1 %v4734_v46  ;;  %v4744_v46 = vld [vmem:[#allocation23_spill] sm:$0xff] }
 0x1e5   : > { %1122 = vmatprep.subr.mxu0 %v4735_v53  ;;  %1193 = vmatprep.subr.mxu1 %v4736_v1  ;;  %v4745_v53 = vld [vmem:[#allocation24_spill] sm:$0xff] }
 0x1e6   : > { %1123 = vmatpush1.msra.mxu0 %v4737_v45  ;;  %1194 = vmatpush1.msra.mxu1 %v4738_v62  ;;  %v4746_v45 = vld [vmem:[#allocation50_spill] sm:$0xff] }
 0x1e7   : > { %1124 = vmatprep.subr.mxu0 %v4739_v63  ;;  %1195 = vmatprep.subr.mxu1 %v4740_v2  ;;  %v4747_v63 = vld [vmem:[#allocation51_spill] sm:$0xff] }
 0x1e8   : > { %1125 = vmatpush1.msra.mxu0 %v4741_v56  ;;  %1158 = vmatprep.mubr.f32.mxu0 %v4742_v0 }
 0x1e9   : > { %1196 = vmatpush1.msra.mxu1 %v4743_v39  ;;  %1229 = vmatprep.mubr.f32.mxu1 %v4742_v0 }
 0x1ea   : > { %1271 = vmatprep.subr.mxu0 %v4744_v46  ;;  %1342 = vmatprep.subr.mxu1 %v4745_v53 }
 0x289   : > { %v983_v1 = vpop.f32.mrf.mxu0  ;;  %v1054_v2 = vpop.f32.mrf.mxu1 }
 0x28a   : > { %v1059_v4 = vadd.f32 %v983_v1, %v4746_v45  ;;  %v1061_v0 = vadd.f32 %v1054_v2, %v4749_v61 }
 0x28b   : > { %v985_v62 = vpop.f32.mrf.mxu0  ;;  %v1056_v57 = vpop.f32.mrf.mxu1 }
 0x28c   : > { %v2737_v3 = vmul.f32 -1.442695, %v1059_v4  ;;  %v1060_v51 = vadd.f32 %v985_v62, %v4747_v63  ;;  %v1062_v39 = vadd.f32 %v1056_v57, %v4748_v50 }
 0x28e   : > { %2956 = vpow2.f32 %v2737_v3  ;;  %v2738_v56 = vmul.f32 -1.442695, %v1060_v51  ;;  %v2739_v58 = vmul.f32 -1.442695, %v1062_v39 }
 0x290   : > { %2958 = vpow2.f32 %v2738_v56 }
 0x291   : > { %2960 = vtanh.f32 %v1061_v0 }
 0x292   : > { %2962 = vpow2.f32 %v2739_v58 }
 0x29b   : > { %v2957_v46 = vpop.eup %2956 }
 0x29c   : > { %v1072_v47 = vadd.f32 1.0, %v2957_v46  ;;  %v1509_v46 = vld [vmem:[#allocation11 + $0x1e0] sm:$0xff] }
 0x29d   : > { %v2959_v53 = vpop.eup %2958 }
 0x29e   : > { %2964 = vrcp.f32 %v1072_v47  ;;  %v1073_v1 = vadd.f32 1.0, %v2959_v53  ;;  %v2961_v4 = vpop.eup %2960  ;;  %v1511_v53 = vld [vmem:[#allocation11 + $0x1f0] sm:$0xff] }
 0x29f   : > { %v2963_v45 = vpop.eup %2962 }
 0x2a0   : > { %2966 = vrcp.f32 %v1073_v1  ;;  %v1074_v63 = vadd.f32 1.0, %v2963_v45  ;;  %v1506_v1 = vld [vmem:[#allocation11 + $0x1c8] sm:$0xff]  ;;  %v1505_v45 = vld [vmem:[#allocation11 + $0x1c0] sm:$0xff] }
 0x2a2   : > { %2968 = vrcp.f32 %v1074_v63  ;;  %v1501_v63 = vld [vmem:[#allocation11 + $0x1a0] sm:$0xff] }
 0x2ab   : > { %v2965_v3 = vpop.eup %2964 }
 0x2ac   : > { %v1083_v62 = vmul.f32 %v2965_v3, %v2961_v4  ;;  %v1508_v4 = vld [vmem:[#allocation11 + $0x1d8] sm:$0xff]  ;;  %v1507_v3 = vld [vmem:[#allocation11 + $0x1d0] sm:$0xff] }
 0x2ad   : > { %v2967_v51 = vpop.eup %2966 }
 0x2ae   : > { %v1082_v56 = vmul.f32 %v2967_v51, %v3847_v55  ;;  %v1504_v51 = vld [vmem:[#allocation11 + $0x1b8] sm:$0xff] }
 0x2af   : > { %v2969_v39 = vpop.eup %2968 }
 0x2b0   : > { %v3925_v50 = vadd.f32 %v1083_v62, %v1082_v56  ;;  %v1502_v62 = vld [vmem:[#allocation11 + $0x1a8] sm:$0xff]  ;;  %v1503_v56 = vld [vmem:[#allocation11 + $0x1b0] sm:$0xff] }
 0x2b2   : > { %2970 = vtanh.f32 %v3925_v50 }
 0x2bf   : > { %v2971_v61 = vpop.eup %2970 }
 0x2c0   : > { %v3928_v57 = vmul.f32 %v2971_v61, %v2969_v39  ;;  %v1500_v39 = vld [vmem:[#allocation11 + $0x198] sm:$0xff]  ;;  %v1497_v61 = vld [vmem:[#allocation11 + $0x180] sm:$0xff] }
 0x2c2   : > { %1159 = vmatmul.mubr.f32.vlgmr.msra.gmra.mxu0 %v3928_v57  ;;  %1230 = vmatmul.mubr.f32.vlgmr.msra.gmra.mxu1 %v3928_v57 }
 0x2c3   : > { %1272 = vmatpush1.msra.mxu0 %v3541_v5  ;;  %1343 = vmatpush1.msra.mxu1 %v3543_v6  ;;  %v4750_v5 = vld [vmem:[#allocation32_spill] sm:$0xff]  ;;  %v4751_v6 = vld [vmem:[#allocation33_spill] sm:$0xff] }
 0x2c4   : > { %1273 = vmatprep.subr.mxu0 %v3547_v7  ;;  %1344 = vmatprep.subr.mxu1 %v3549_v8  ;;  %v4752_v7 = vld [vmem:[#allocation34_spill] sm:$0xff]  ;;  %v4753_v8 = vld [vmem:[#allocation35_spill] sm:$0xff] }
 0x2c5   : > { %1274 = vmatpush1.msra.mxu0 %v3552_v9  ;;  %1345 = vmatpush1.msra.mxu1 %v3554_v10  ;;  %v4754_v9 = vld [vmem:[#allocation36_spill] sm:$0xff]  ;;  %v4755_v10 = vld [vmem:[#allocation37_spill] sm:$0xff] }
 0x2c6   : > { %1275 = vmatprep.subr.mxu0 %v3558_v11  ;;  %1346 = vmatprep.subr.mxu1 %v3560_v12  ;;  %v4756_v11 = vld [vmem:[#allocation38_spill] sm:$0xff]  ;;  %v4757_v12 = vld [vmem:[#allocation39_spill] sm:$0xff] }
 0x2c7   : > { %1276 = vmatpush1.msra.mxu0 %v3564_v13  ;;  %1347 = vmatpush1.msra.mxu1 %v3566_v14  ;;  %v4758_v13 = vld [vmem:[#allocation40_spill] sm:$0xff]  ;;  %v4759_v14 = vld [vmem:[#allocation41_spill] sm:$0xff] }
 0x2c8   : > { %1277 = vmatprep.subr.mxu0 %v3570_v15  ;;  %1348 = vmatprep.subr.mxu1 %v3572_v16  ;;  %v4760_v15 = vld [vmem:[#allocation42_spill] sm:$0xff]  ;;  %v4761_v16 = vld [vmem:[#allocation43_spill] sm:$0xff] }
 0x2c9   : > { %1278 = vmatpush1.msra.mxu0 %v3576_v17  ;;  %1349 = vmatpush1.msra.mxu1 %v3578_v18  ;;  %v4762_v17 = vld [vmem:[#allocation44_spill] sm:$0xff]  ;;  %v4763_v18 = vld [vmem:[#allocation45_spill] sm:$0xff] }
 0x2ca   : > { %1279 = vmatprep.subr.mxu0 %v3582_v19  ;;  %1350 = vmatprep.subr.mxu1 %v3584_v20  ;;  %v4764_v19 = vld [vmem:[#allocation46_spill] sm:$0xff]  ;;  %v4765_v20 = vld [vmem:[#allocation47_spill] sm:$0xff] }
 0x2cb   : > { %1280 = vmatpush1.msra.mxu0 %v3588_v21  ;;  %1351 = vmatpush1.msra.mxu1 %v3590_v22  ;;  %v4766_v21 = vld [vmem:[#allocation48_spill] sm:$0xff]  ;;  %v4767_v22 = vmov 0.0  }
 0x2cc   : > { %1281 = vmatprep.subr.mxu0 %v3594_v23  ;;  %1352 = vmatprep.subr.mxu1 %v3596_v24  ;;  %v1510_v23 = vld [vmem:[#allocation11 + $0x1e8] sm:$0xff]  ;;  %v1512_v24 = vld [vmem:[#allocation11 + $0x1f8] sm:$0xff] }
 0x2cd   : > { %1282 = vmatpush1.msra.mxu0 %v3600_v25  ;;  %1353 = vmatpush1.msra.mxu1 %v3602_v26  ;;  %v4768_v26 = vld [vmem:[#allocation53_spill] sm:$0xff] }
 0x2ce   : > { %1283 = vmatprep.subr.mxu0 %v3606_v27  ;;  %1354 = vmatprep.subr.mxu1 %v3608_v28 }
 0x2cf   : > { %1284 = vmatpush1.msra.mxu0 %v3612_v29  ;;  %1355 = vmatpush1.msra.mxu1 %v3614_v30  ;;  %v4769_v30 = vld [vmem:[#allocation55_spill] sm:$0xff] }
 0x2d0   : > { %1285 = vmatprep.subr.mxu0 %v3618_v31  ;;  %1356 = vmatprep.subr.mxu1 %v3620_v32 }
 0x2d1   : > { %1286 = vmatpush1.msra.mxu0 %v3624_v33  ;;  %1357 = vmatpush1.msra.mxu1 %v3626_v34 }
 0x2d2   : > { %1287 = vmatprep.subr.mxu0 %v3630_v35  ;;  %1358 = vmatprep.subr.mxu1 %v3632_v36  ;;  %v4770_v35 = vld [vmem:[#allocation58_spill] sm:$0xff] }
 0x2d3   : > { %1288 = vmatpush1.msra.mxu0 %v3636_v37  ;;  %1359 = vmatpush1.msra.mxu1 %v3640_v38  ;;  %v4771_v37 = vld [vmem:[#allocation56_spill] sm:$0xff] }
 0x2d4   : > { %1289 = vmatprep.subr.mxu0 %v3645_v40  ;;  %1360 = vmatprep.subr.mxu1 %v3647_v41 }
 0x2d5   : > { %1290 = vmatpush1.msra.mxu0 %v3651_v42  ;;  %1361 = vmatpush1.msra.mxu1 %v3654_v43 }
 0x2d6   : > { %1291 = vmatprep.subr.mxu0 %v4719_v44  ;;  %1362 = vmatprep.subr.mxu1 %v4720_v49 }
 0x2d7   : > { %1292 = vmatpush1.msra.mxu0 %v4721_v48  ;;  %1363 = vmatpush1.msra.mxu1 %v4722_v60 }
 0x2d8   : > { %1293 = vmatprep.subr.mxu0 %v4723_v54  ;;  %1364 = vmatprep.subr.mxu1 %v4724_v52 }
 0x2d9   : > { %1294 = vmatpush1.msra.mxu0 %v4725_v59  ;;  %1365 = vmatpush1.msra.mxu1 %v4750_v5  ;;  %v1499_v5 = vld [vmem:[#allocation11 + $0x190] sm:$0xff] }
 0x2da   : > { %1295 = vmatprep.subr.mxu0 %v4751_v6  ;;  %1366 = vmatprep.subr.mxu1 %v4752_v7  ;;  %v1494_v6 = vld [vmem:[#allocation11 + $0x168] sm:$0xff]  ;;  %v1496_v7 = vld [vmem:[#allocation11 + $0x178] sm:$0xff] }
 0x2db   : > { %1296 = vmatpush1.msra.mxu0 %v4753_v8  ;;  %1367 = vmatpush1.msra.mxu1 %v4754_v9  ;;  %v1493_v8 = vld [vmem:[#allocation11 + $0x160] sm:$0xff]  ;;  %v1495_v9 = vld [vmem:[#allocation11 + $0x170] sm:$0xff] }
 0x2dc   : > { %1297 = vmatprep.subr.mxu0 %v4755_v10  ;;  %1368 = vmatprep.subr.mxu1 %v4756_v11  ;;  %v1490_v10 = vld [vmem:[#allocation11 + $0x148] sm:$0xff]  ;;  %v1492_v11 = vld [vmem:[#allocation11 + $0x158] sm:$0xff] }
 0x2dd   : > { %1298 = vmatpush1.msra.mxu0 %v4757_v12  ;;  %1369 = vmatpush1.msra.mxu1 %v4758_v13  ;;  %v1489_v12 = vld [vmem:[#allocation11 + $0x140] sm:$0xff]  ;;  %v1491_v13 = vld [vmem:[#allocation11 + $0x150] sm:$0xff] }
 0x2de   : > { %1299 = vmatprep.subr.mxu0 %v4759_v14  ;;  %1370 = vmatprep.subr.mxu1 %v4760_v15  ;;  %v1486_v14 = vld [vmem:[#allocation11 + $0x128] sm:$0xff]  ;;  %v1488_v15 = vld [vmem:[#allocation11 + $0x138] sm:$0xff] }
 0x2df   : > { %1300 = vmatpush1.msra.mxu0 %v4761_v16  ;;  %1371 = vmatpush1.msra.mxu1 %v4762_v17  ;;  %v1485_v16 = vld [vmem:[#allocation11 + $0x120] sm:$0xff]  ;;  %v1487_v17 = vld [vmem:[#allocation11 + $0x130] sm:$0xff] }
 0x2e0   : > { %1301 = vmatprep.subr.mxu0 %v4763_v18  ;;  %1372 = vmatprep.subr.mxu1 %v4764_v19  ;;  %v1482_v18 = vld [vmem:[#allocation11 + $0x108] sm:$0xff]  ;;  %v1484_v19 = vld [vmem:[#allocation11 + $0x118] sm:$0xff] }
 0x2e1   : > { %1302 = vmatpush1.msra.mxu0 %v4765_v20  ;;  %1373 = vmatpush1.msra.mxu1 %v4766_v21  ;;  %v1481_v20 = vld [vmem:[#allocation11 + $0x100] sm:$0xff]  ;;  %v1483_v21 = vld [vmem:[#allocation11 + $0x110] sm:$0xff] }
 0x2e2   : > { %1335 = vmatprep.mubr.f32.mxu0 %v4767_v22  ;;  %1406 = vmatprep.mubr.f32.mxu1 %v4767_v22 }
 0x2e3   : > { %1536 = vmatprep.subr.mxu0 %v1510_v23  ;;  %1625 = vmatprep.subr.mxu1 %v1512_v24  ;;  %v1478_v23 = vld [vmem:[#allocation11 + $0xe8] sm:$0xff]  ;;  %v1480_v24 = vld [vmem:[#allocation11 + $0xf8] sm:$0xff] }
 0x382   : > { %v1160_v25 = vpop.f32.mrf.mxu0  ;;  %v1231_v32 = vpop.f32.mrf.mxu1 }
 0x383   : > { %v1236_v27 = vadd.f32 %v1160_v25, %v4768_v26  ;;  %v1238_v38 = vadd.f32 %v1231_v32, %v4771_v37  ;;  %v1477_v25 = vld [vmem:[#allocation11 + $0xe0] sm:$0xff]  ;;  %v1479_v26 = vld [vmem:[#allocation11 + $0xf0] sm:$0xff]  ;;  %v1472_v32 = vld [vmem:[#allocation11 + $0xb8] sm:$0xff] }
 0x384   : > { %v1162_v28 = vpop.f32.mrf.mxu0  ;;  %v1233_v34 = vpop.f32.mrf.mxu1  ;;  %v1465_v37 = vld [vmem:[#allocation11 + $0x80] sm:$0xff] }
 0x385   : > { %v2740_v29 = vmul.f32 -1.442695, %v1236_v27  ;;  %v1237_v31 = vadd.f32 %v1162_v28, %v4769_v30  ;;  %v1239_v36 = vadd.f32 %v1233_v34, %v4770_v35  ;;  %v1474_v27 = vld [vmem:[#allocation11 + $0xc8] sm:$0xff]  ;;  %v1476_v28 = vld [vmem:[#allocation11 + $0xd8] sm:$0xff]  ;;  %v1475_v30 = vld [vmem:[#allocation11 + $0xd0] sm:$0xff] }
 0x386   : > { %v1471_v34 = vld [vmem:[#allocation11 + $0xb0] sm:$0xff]  ;;  %v1466_v35 = vld [vmem:[#allocation11 + $0x88] sm:$0xff] }
 0x387   : > { %2972 = vpow2.f32 %v2740_v29  ;;  %v2741_v33 = vmul.f32 -1.442695, %v1237_v31  ;;  %v2742_v40 = vmul.f32 -1.442695, %v1239_v36  ;;  %v1473_v29 = vld [vmem:[#allocation11 + $0xc0] sm:$0xff]  ;;  %v1470_v31 = vld [vmem:[#allocation11 + $0xa8] sm:$0xff] }
 0x388   : > { %v1468_v36 = vld [vmem:[#allocation11 + $0x98] sm:$0xff] }
 0x389   : > { %2974 = vpow2.f32 %v2741_v33  ;;  %v1469_v33 = vld [vmem:[#allocation11 + $0xa0] sm:$0xff] }
 0x38a   : > { %2976 = vtanh.f32 %v1238_v38  ;;  %v1467_v38 = vld [vmem:[#allocation11 + $0x90] sm:$0xff] }
 0x38b   : > { %2978 = vpow2.f32 %v2742_v40  ;;  %v1462_v40 = vld [vmem:[#allocation11 + $0x68] sm:$0xff] }
 0x394   : > { %v2973_v41 = vpop.eup %2972 }
 0x395   : > { %v1249_v42 = vadd.f32 1.0, %v2973_v41  ;;  %v1464_v41 = vld [vmem:[#allocation11 + $0x78] sm:$0xff] }
 0x396   : > { %v2975_v43 = vpop.eup %2974 }
 0x397   : > { %2980 = vrcp.f32 %v1249_v42  ;;  %v1250_v55 = vadd.f32 1.0, %v2975_v43  ;;  %v2977_v44 = vpop.eup %2976  ;;  %v1461_v42 = vld [vmem:[#allocation11 + $0x60] sm:$0xff]  ;;  %v1463_v43 = vld [vmem:[#allocation11 + $0x70] sm:$0xff] }
 0x398   : > { %v2979_v49 = vpop.eup %2978 }
 0x399   : > { %2982 = vrcp.f32 %v1250_v55  ;;  %v1251_v52 = vadd.f32 1.0, %v2979_v49  ;;  %v1458_v55 = vld [vmem:[#allocation11 + $0x48] sm:$0xff]  ;;  %v1457_v49 = vld [vmem:[#allocation11 + $0x40] sm:$0xff] }
 0x39b   : > { %2984 = vrcp.f32 %v1251_v52  ;;  %v1453_v52 = vld [vmem:[#allocation11 + $0x20] sm:$0xff] }
 0x3a4   : > { %v2981_v48 = vpop.eup %2980 }
 0x3a5   : > { %v1260_v60 = vmul.f32 %v2981_v48, %v2977_v44  ;;  %v1460_v44 = vld [vmem:[#allocation11 + $0x58] sm:$0xff]  ;;  %v1459_v48 = vld [vmem:[#allocation11 + $0x50] sm:$0xff] }
 0x3a6   : > { %v2983_v54 = vpop.eup %2982 }
 0x3a7   : > { %v1259_v59 = vmul.f32 %v2983_v54, %v3925_v50  ;;  %v1498_v50 = vld [vmem:[#allocation11 + $0x188] sm:$0xff]  ;;  %v1456_v54 = vld [vmem:[#allocation11 + $0x38] sm:$0xff] }
 0x3a8   : > { %v2985_v58 = vpop.eup %2984 }
 0x3a9   : > { %v4001_v47 = vadd.f32 %v1260_v60, %v1259_v59  ;;  %v1454_v60 = vld [vmem:[#allocation11 + $0x28] sm:$0xff]  ;;  %v1455_v59 = vld [vmem:[#allocation11 + $0x30] sm:$0xff] }
 0x3ab   : > { %2986 = vtanh.f32 %v4001_v47 }
 0x3b8   : > { %v2987_v2 = vpop.eup %2986 }
 0x3b9   : > { %v4004_v0 = vmul.f32 %v2987_v2, %v2985_v58  ;;  %v1450_v58 = vld [vmem:[#allocation11 + $0x8] sm:$0xff]  ;;  %v1452_v2 = vld [vmem:[#allocation11 + $0x18] sm:$0xff] }
 0x3bb   : > { %1336 = vmatmul.mubr.f32.vlgmr.msra.gmra.mxu0 %v4004_v0  ;;  %1407 = vmatmul.mubr.f32.vlgmr.msra.gmra.mxu1 %v4004_v0 }
 0x3bc   : > { %1537 = vmatpush1.msra.mxu0 %v1509_v46  ;;  %1626 = vmatpush1.msra.mxu1 %v1511_v53  ;;  %v1449_v46 = vld [vmem:[#allocation11] sm:$0xff]  ;;  %v1451_v53 = vld [vmem:[#allocation11 + $0x10] sm:$0xff] }
 0x3bd   : > { %1538 = vmatprep.subr.mxu0 %v1506_v1  ;;  %1627 = vmatprep.subr.mxu1 %v1508_v4  ;;  %v4772_v1 = vld [vmem:[#allocation62_spill] sm:$0xff] }
 0x3be   : > { %1539 = vmatpush1.msra.mxu0 %v1505_v45  ;;  %1628 = vmatpush1.msra.mxu1 %v1507_v3  ;;  %v4022_v4 = vld [vmem:[#allocation12 + $0x3e8] sm:$0xff]  ;;  %v4024_v45 = vld [vmem:[#allocation12 + $0x3f8] sm:$0xff]  ;;  %v4030_v3 = vld [vmem:[#allocation12 + $0x3f0] sm:$0xff] }
 0x3bf   : > { %1540 = vmatprep.subr.mxu0 %v1502_v62  ;;  %1629 = vmatprep.subr.mxu1 %v1504_v51  ;;  %4773 = vst [vmem:[#allocation25_spill] sm:$0xff] %v4022_v4  ;;  %4774 = vst [vmem:[#allocation26_spill] sm:$0xff] %v4024_v45  ;;  %v4036_v62 = vld [vmem:[#allocation12 + $0x3d8] sm:$0xff]  ;;  %v4040_v51 = vld [vmem:[#allocation12 + $0x3c0] sm:$0xff] }
 0x3c0   : > { %1541 = vmatpush1.msra.mxu0 %v1501_v63  ;;  %1630 = vmatpush1.msra.mxu1 %v1503_v56  ;;  %v4042_v63 = vld [vmem:[#allocation12 + $0x3d0] sm:$0xff]  ;;  %v4046_v56 = vld [vmem:[#allocation12 + $0x3a8] sm:$0xff] }
 0x3c1   : > { %1542 = vmatprep.subr.mxu0 %v1498_v50  ;;  %1631 = vmatprep.subr.mxu1 %v1500_v39  ;;  %v4048_v50 = vld [vmem:[#allocation12 + $0x3b8] sm:$0xff]  ;;  %v4052_v39 = vld [vmem:[#allocation12 + $0x3a0] sm:$0xff] }
 0x3c2   : > { %1543 = vmatpush1.msra.mxu0 %v1497_v61  ;;  %1632 = vmatpush1.msra.mxu1 %v1499_v5  ;;  %v4054_v61 = vld [vmem:[#allocation12 + $0x3b0] sm:$0xff]  ;;  %v4058_v5 = vld [vmem:[#allocation12 + $0x388] sm:$0xff] }
 0x3c3   : > { %1544 = vmatprep.subr.mxu0 %v1494_v6  ;;  %1633 = vmatprep.subr.mxu1 %v1496_v7  ;;  %v4060_v6 = vld [vmem:[#allocation12 + $0x398] sm:$0xff]  ;;  %v4064_v7 = vld [vmem:[#allocation12 + $0x380] sm:$0xff] }
 0x3c4   : > { %1545 = vmatpush1.msra.mxu0 %v1493_v8  ;;  %1634 = vmatpush1.msra.mxu1 %v1495_v9  ;;  %v4066_v8 = vld [vmem:[#allocation12 + $0x390] sm:$0xff]  ;;  %v4070_v9 = vld [vmem:[#allocation12 + $0x368] sm:$0xff] }
 0x3c5   : > { %1546 = vmatprep.subr.mxu0 %v1490_v10  ;;  %1635 = vmatprep.subr.mxu1 %v1492_v11  ;;  %v4072_v10 = vld [vmem:[#allocation12 + $0x378] sm:$0xff]  ;;  %v4076_v11 = vld [vmem:[#allocation12 + $0x360] sm:$0xff] }
 0x3c6   : > { %1547 = vmatpush1.msra.mxu0 %v1489_v12  ;;  %1636 = vmatpush1.msra.mxu1 %v1491_v13  ;;  %v4078_v12 = vld [vmem:[#allocation12 + $0x370] sm:$0xff]  ;;  %v4082_v13 = vld [vmem:[#allocation12 + $0x348] sm:$0xff] }
 0x3c7   : > { %1548 = vmatprep.subr.mxu0 %v1486_v14  ;;  %1637 = vmatprep.subr.mxu1 %v1488_v15  ;;  %v4084_v14 = vld [vmem:[#allocation12 + $0x358] sm:$0xff]  ;;  %v4088_v15 = vld [vmem:[#allocation12 + $0x340] sm:$0xff] }
 0x3c8   : > { %1549 = vmatpush1.msra.mxu0 %v1485_v16  ;;  %1638 = vmatpush1.msra.mxu1 %v1487_v17  ;;  %v4090_v16 = vld [vmem:[#allocation12 + $0x350] sm:$0xff]  ;;  %v4094_v17 = vld [vmem:[#allocation12 + $0x328] sm:$0xff] }
 0x3c9   : > { %1550 = vmatprep.subr.mxu0 %v1482_v18  ;;  %1639 = vmatprep.subr.mxu1 %v1484_v19  ;;  %v4096_v18 = vld [vmem:[#allocation12 + $0x338] sm:$0xff]  ;;  %v4100_v19 = vld [vmem:[#allocation12 + $0x320] sm:$0xff] }
 0x3ca   : > { %1551 = vmatpush1.msra.mxu0 %v1481_v20  ;;  %1640 = vmatpush1.msra.mxu1 %v1483_v21  ;;  %v4102_v20 = vld [vmem:[#allocation12 + $0x330] sm:$0xff]  ;;  %v4106_v21 = vld [vmem:[#allocation12 + $0x308] sm:$0xff] }
 0x3cb   : > { %1552 = vmatprep.subr.mxu0 %v1478_v23  ;;  %1641 = vmatprep.subr.mxu1 %v1480_v24  ;;  %v4108_v23 = vld [vmem:[#allocation12 + $0x318] sm:$0xff]  ;;  %v4110_v24 = vld [vmem:[#allocation12 + $0x300] sm:$0xff] }
 0x3cc   : > { %1553 = vmatpush1.msra.mxu0 %v1477_v25  ;;  %1642 = vmatpush1.msra.mxu1 %v1479_v26  ;;  %v4114_v25 = vld [vmem:[#allocation12 + $0x310] sm:$0xff]  ;;  %v4116_v26 = vld [vmem:[#allocation12 + $0x2e8] sm:$0xff] }
 0x3cd   : > { %1554 = vmatprep.subr.mxu0 %v1474_v27  ;;  %1643 = vmatprep.subr.mxu1 %v1476_v28  ;;  %v4118_v27 = vld [vmem:[#allocation12 + $0x2f8] sm:$0xff]  ;;  %v4122_v28 = vld [vmem:[#allocation12 + $0x2e0] sm:$0xff] }
 0x3ce   : > { %1555 = vmatpush1.msra.mxu0 %v1473_v29  ;;  %1644 = vmatpush1.msra.mxu1 %v1475_v30  ;;  %v4124_v29 = vld [vmem:[#allocation12 + $0x2f0] sm:$0xff]  ;;  %v4126_v30 = vld [vmem:[#allocation12 + $0x2c8] sm:$0xff] }
 0x3cf   : > { %1556 = vmatprep.subr.mxu0 %v1470_v31  ;;  %1645 = vmatprep.subr.mxu1 %v1472_v32  ;;  %v4130_v31 = vld [vmem:[#allocation12 + $0x2d8] sm:$0xff]  ;;  %v4132_v32 = vld [vmem:[#allocation12 + $0x2c0] sm:$0xff] }
 0x3d0   : > { %1557 = vmatpush1.msra.mxu0 %v1469_v33  ;;  %1646 = vmatpush1.msra.mxu1 %v1471_v34  ;;  %v4134_v33 = vld [vmem:[#allocation12 + $0x2d0] sm:$0xff]  ;;  %v4138_v34 = vld [vmem:[#allocation12 + $0x2a8] sm:$0xff] }
 0x3d1   : > { %1558 = vmatprep.subr.mxu0 %v1466_v35  ;;  %1647 = vmatprep.subr.mxu1 %v1468_v36  ;;  %v4140_v35 = vld [vmem:[#allocation12 + $0x2b8] sm:$0xff]  ;;  %v4144_v36 = vld [vmem:[#allocation12 + $0x2a0] sm:$0xff] }
 0x3d2   : > { %1559 = vmatpush1.msra.mxu0 %v1465_v37  ;;  %1648 = vmatpush1.msra.mxu1 %v1467_v38  ;;  %v4146_v37 = vld [vmem:[#allocation12 + $0x2b0] sm:$0xff]  ;;  %v4150_v38 = vld [vmem:[#allocation12 + $0x288] sm:$0xff] }
 0x3d3   : > { %1560 = vmatprep.subr.mxu0 %v1462_v40  ;;  %1649 = vmatprep.subr.mxu1 %v1464_v41  ;;  %4775 = vst [vmem:[#allocation27_spill] sm:$0xff] %v4146_v37  ;;  %4776 = vst [vmem:[#allocation28_spill] sm:$0xff] %v4150_v38  ;;  %v4152_v40 = vld [vmem:[#allocation12 + $0x298] sm:$0xff]  ;;  %v4156_v41 = vld [vmem:[#allocation12 + $0x280] sm:$0xff] }
 0x3d4   : > { %1561 = vmatpush1.msra.mxu0 %v1461_v42  ;;  %1650 = vmatpush1.msra.mxu1 %v1463_v43  ;;  %4777 = vst [vmem:[#allocation29_spill] sm:$0xff] %v4152_v40  ;;  %4778 = vst [vmem:[#allocation30_spill] sm:$0xff] %v4156_v41  ;;  %v4158_v42 = vld [vmem:[#allocation12 + $0x290] sm:$0xff]  ;;  %v4162_v43 = vld [vmem:[#allocation12 + $0x268] sm:$0xff] }
 0x3d5   : > { %1562 = vmatprep.subr.mxu0 %v1458_v55  ;;  %1651 = vmatprep.subr.mxu1 %v1460_v44  ;;  %4779 = vst [vmem:[#allocation31_spill] sm:$0xff] %v4158_v42  ;;  %4780 = vst [vmem:[#allocation23_spill] sm:$0xff] %v4162_v43  ;;  %v4164_v55 = vld [vmem:[#allocation12 + $0x278] sm:$0xff]  ;;  %v4168_v44 = vld [vmem:[#allocation12 + $0x260] sm:$0xff] }
 0x3d6   : > { %1563 = vmatpush1.msra.mxu0 %v1457_v49  ;;  %1652 = vmatpush1.msra.mxu1 %v1459_v48  ;;  %4781 = vst [vmem:[#allocation24_spill] sm:$0xff] %v4164_v55  ;;  %4782 = vst [vmem:[#allocation50_spill] sm:$0xff] %v4168_v44  ;;  %v4170_v49 = vld [vmem:[#allocation12 + $0x270] sm:$0xff]  ;;  %v4174_v48 = vld [vmem:[#allocation12 + $0x248] sm:$0xff] }
 0x3d7   : > { %1564 = vmatprep.subr.mxu0 %v1454_v60  ;;  %1653 = vmatprep.subr.mxu1 %v1456_v54  ;;  %4783 = vst [vmem:[#allocation51_spill] sm:$0xff] %v4170_v49  ;;  %4784 = vst [vmem:[#allocation54_spill] sm:$0xff] %v4174_v48  ;;  %v4176_v60 = vld [vmem:[#allocation12 + $0x258] sm:$0xff]  ;;  %v4180_v54 = vld [vmem:[#allocation12 + $0x240] sm:$0xff] }
 0x3d8   : > { %1565 = vmatpush1.msra.mxu0 %v1453_v52  ;;  %1654 = vmatpush1.msra.mxu1 %v1455_v59  ;;  %4785 = vst [vmem:[#allocation52_spill] sm:$0xff] %v4176_v60  ;;  %4786 = vst [vmem:[#allocation32_spill] sm:$0xff] %v4180_v54  ;;  %v4182_v52 = vld [vmem:[#allocation12 + $0x250] sm:$0xff]  ;;  %v4188_v59 = vld [vmem:[#allocation12 + $0x228] sm:$0xff] }
 0x3d9   : > { %1566 = vmatprep.subr.mxu0 %v1450_v58  ;;  %1655 = vmatprep.subr.mxu1 %v1452_v2  ;;  %4787 = vst [vmem:[#allocation33_spill] sm:$0xff] %v4182_v52  ;;  %4788 = vst [vmem:[#allocation34_spill] sm:$0xff] %v4188_v59  ;;  %v4190_v58 = vld [vmem:[#allocation12 + $0x238] sm:$0xff]  ;;  %v4192_v2 = vld [vmem:[#allocation12 + $0x220] sm:$0xff] }
 0x3da   : > { %1567 = vmatpush1.msra.mxu0 %v1449_v46  ;;  %1600 = vmatprep.mubr.f32.mxu0 %v4767_v22  ;;  %4789 = vst [vmem:[#allocation35_spill] sm:$0xff] %v4190_v58  ;;  %4790 = vst [vmem:[#allocation36_spill] sm:$0xff] %v4192_v2  ;;  %v4196_v46 = vld [vmem:[#allocation12 + $0x230] sm:$0xff] }
 0x3db   : > { %1656 = vmatpush1.msra.mxu1 %v1451_v53  ;;  %1689 = vmatprep.mubr.f32.mxu1 %v4767_v22  ;;  %4791 = vst [vmem:[#allocation37_spill] sm:$0xff] %v4196_v46  ;;  %v4198_v53 = vld [vmem:[#allocation12 + $0x208] sm:$0xff] }
 0x3dc   : > { %1601 = vmatmul.mubr.f32.vlgmr.msra.gmra.mxu0 %v4772_v1  ;;  %1690 = vmatmul.mubr.f32.vlgmr.msra.gmra.mxu1 %v4772_v1  ;;  %4792 = vst [vmem:[#allocation38_spill] sm:$0xff] %v4198_v53  ;;  %v4200_v1 = vld [vmem:[#allocation12 + $0x218] sm:$0xff] }
 0x3dd   : > { %1606 = vmatprep.mubr.f32.mxu0 %v4767_v22  ;;  %1695 = vmatprep.mubr.f32.mxu1 %v4767_v22  ;;  %4793 = vst [vmem:[#allocation39_spill] sm:$0xff] %v4200_v1 }
 0x3de   : > { %1803 = vmatprep.subr.mxu0 %v4022_v4  ;;  %1874 = vmatprep.subr.mxu1 %v4024_v45 }
 0x3df   : > { %1875 = vmatpush1.msra.mxu1 %v4030_v3 }
 0x3e0   : > { %1607 = vmatmul.mubr.f32.gmra.mxu0 %v3928_v57  ;;  %1696 = vmatmul.mubr.f32.gmra.mxu1 %v3928_v57  ;;  %v4028_v57 = vld [vmem:[#allocation12 + $0x3e0] sm:$0xff] }
 0x3e1   : > { %1612 = vmatprep.mubr.f32.mxu0 %v4767_v22  ;;  %1701 = vmatprep.mubr.f32.mxu1 %v4767_v22 }
 0x3e2   : > { %1804 = vmatpush1.msra.mxu0 %v4028_v57  ;;  %1876 = vmatprep.subr.mxu1 %v4036_v62 }
 0x3e3   : > { %1877 = vmatpush1.msra.mxu1 %v4042_v63 }
 0x3e4   : > { %1613 = vmatmul.mubr.f32.gmra.mxu0 %v4004_v0  ;;  %1702 = vmatmul.mubr.f32.gmra.mxu1 %v4004_v0  ;;  %v4034_v0 = vld [vmem:[#allocation12 + $0x3c8] sm:$0xff] }
 0x3e5   : > { %1618 = vmatprep.mubr.f32.mxu0 %v4767_v22  ;;  %1707 = vmatprep.mubr.f32.mxu1 %v4767_v22 }
 0x3e6   : > { %1805 = vmatprep.subr.mxu0 %v4034_v0  ;;  %1878 = vmatprep.subr.mxu1 %v4048_v50 }
 0x3e7   : > { %1806 = vmatpush1.msra.mxu0 %v4040_v51  ;;  %1879 = vmatpush1.msra.mxu1 %v4054_v61 }
 0x3e8   : > { %1807 = vmatprep.subr.mxu0 %v4046_v56  ;;  %1880 = vmatprep.subr.mxu1 %v4060_v6 }
 0x3e9   : > { %1808 = vmatpush1.msra.mxu0 %v4052_v39  ;;  %1881 = vmatpush1.msra.mxu1 %v4066_v8 }
 0x3ea   : > { %1809 = vmatprep.subr.mxu0 %v4058_v5  ;;  %1882 = vmatprep.subr.mxu1 %v4072_v10 }
 0x3eb   : > { %1810 = vmatpush1.msra.mxu0 %v4064_v7  ;;  %1883 = vmatpush1.msra.mxu1 %v4078_v12 }
 0x3ec   : > { %1811 = vmatprep.subr.mxu0 %v4070_v9  ;;  %1884 = vmatprep.subr.mxu1 %v4084_v14 }
 0x3ed   : > { %1812 = vmatpush1.msra.mxu0 %v4076_v11  ;;  %1885 = vmatpush1.msra.mxu1 %v4090_v16 }
 0x3ee   : > { %1813 = vmatprep.subr.mxu0 %v4082_v13  ;;  %1886 = vmatprep.subr.mxu1 %v4096_v18 }
 0x3ef   : > { %1814 = vmatpush1.msra.mxu0 %v4088_v15  ;;  %1887 = vmatpush1.msra.mxu1 %v4102_v20 }
 0x3f0   : > { %1815 = vmatprep.subr.mxu0 %v4094_v17  ;;  %1888 = vmatprep.subr.mxu1 %v4108_v23 }
 0x3f1   : > { %1816 = vmatpush1.msra.mxu0 %v4100_v19  ;;  %1889 = vmatpush1.msra.mxu1 %v4114_v25 }
 0x3f2   : > { %1817 = vmatprep.subr.mxu0 %v4106_v21  ;;  %1890 = vmatprep.subr.mxu1 %v4118_v27 }
 0x3f3   : > { %1818 = vmatpush1.msra.mxu0 %v4110_v24  ;;  %1891 = vmatpush1.msra.mxu1 %v4124_v29 }
 0x3f4   : > { %1819 = vmatprep.subr.mxu0 %v4116_v26  ;;  %1892 = vmatprep.subr.mxu1 %v4130_v31 }
 0x3f5   : > { %1820 = vmatpush1.msra.mxu0 %v4122_v28  ;;  %1893 = vmatpush1.msra.mxu1 %v4134_v33 }
 0x3f6   : > { %1821 = vmatprep.subr.mxu0 %v4126_v30  ;;  %1894 = vmatprep.subr.mxu1 %v4140_v35 }
 0x3f7   : > { %1822 = vmatpush1.msra.mxu0 %v4132_v32  ;;  %1895 = vmatpush1.msra.mxu1 %v4146_v37 }
 0x3f8   : > { %1823 = vmatprep.subr.mxu0 %v4138_v34  ;;  %1896 = vmatprep.subr.mxu1 %v4152_v40 }
 0x3f9   : > { %1824 = vmatpush1.msra.mxu0 %v4144_v36  ;;  %1897 = vmatpush1.msra.mxu1 %v4158_v42 }
 0x3fa   : > { %1825 = vmatprep.subr.mxu0 %v4150_v38  ;;  %1898 = vmatprep.subr.mxu1 %v4164_v55  ;;  %v4798_v55 = vld [vmem:[#allocation61_spill] sm:$0xff] }
 0x3fb   : > { %1826 = vmatpush1.msra.mxu0 %v4156_v41  ;;  %1899 = vmatpush1.msra.mxu1 %v4170_v49 }
 0x3fc   : > { %1827 = vmatprep.subr.mxu0 %v4162_v43  ;;  %1900 = vmatprep.subr.mxu1 %v4176_v60  ;;  %v4204_v60 = vld [vmem:[#allocation12 + $0x200] sm:$0xff]  ;;  %v4799_v43 = vld [vmem:[#allocation60_spill] sm:$0xff] }
 0x3fd   : > { %1828 = vmatpush1.msra.mxu0 %v4168_v44  ;;  %1901 = vmatpush1.msra.mxu1 %v4182_v52  ;;  %4794 = vst [vmem:[#allocation40_spill] sm:$0xff] %v4204_v60 }
 0x3fe   : > { %1829 = vmatprep.subr.mxu0 %v4174_v48  ;;  %1902 = vmatprep.subr.mxu1 %v4190_v58  ;;  %v4206_v48 = vld [vmem:[#allocation12 + $0x210] sm:$0xff] }
 0x3ff   : > { %1830 = vmatpush1.msra.mxu0 %v4180_v54  ;;  %4795 = vst [vmem:[#allocation41_spill] sm:$0xff] %v4206_v48  ;;  %1903 = vmatpush1.msra.mxu1 %v4196_v46 }
 0x400   : > { %1831 = vmatprep.subr.mxu0 %v4188_v59  ;;  %1904 = vmatprep.subr.mxu1 %v4200_v1  ;;  %v4796_v59 = vld [vmem:[#allocation57_spill] sm:$0xff] }
 0x401   : > { %1832 = vmatpush1.msra.mxu0 %v4192_v2  ;;  %1905 = vmatpush1.msra.mxu1 %v4206_v48  ;;  %v4797_v2 = vld [vmem:[#allocation59_spill] sm:$0xff] }
 0x402   : > { %1833 = vmatprep.subr.mxu0 %v4198_v53  ;;  %2048 = vmatprep.subr.mxu1 %v4024_v45 }
 0x403   : > { %1834 = vmatpush1.msra.mxu0 %v4204_v60 }
 0x404   : > { %1977 = vmatprep.subr.mxu0 %v4022_v4 }
 0x47b   : > { %v1337_v58 = vpop.f32.mrf.mxu0  ;;  %v1408_v46 = vpop.f32.mrf.mxu1 }
 0x47c   : > { %v1413_v52 = vadd.f32 %v1337_v58, %v4796_v59  ;;  %v1415_v48 = vadd.f32 %v1408_v46, %v4799_v43  ;;  %v4804_v46 = vld [vmem:[#allocation50_spill] sm:$0xff] }
 0x47d   : > { %v1339_v54 = vpop.f32.mrf.mxu0  ;;  %v1410_v1 = vpop.f32.mrf.mxu1 }
 0x47e   : > { %v2743_v49 = vmul.f32 -1.442695, %v1413_v52  ;;  %v1414_v44 = vadd.f32 %v1339_v54, %v4797_v2  ;;  %v1416_v60 = vadd.f32 %v1410_v1, %v4798_v55  ;;  %v4805_v1 = vld [vmem:[#allocation51_spill] sm:$0xff] }
 0x480   : > { %2988 = vpow2.f32 %v2743_v49  ;;  %v2744_v53 = vmul.f32 -1.442695, %v1414_v44  ;;  %v2745_v42 = vmul.f32 -1.442695, %v1416_v60  ;;  %v4803_v60 = vld [vmem:[#allocation24_spill] sm:$0xff] }
 0x482   : > { %2990 = vpow2.f32 %v2744_v53 }
 0x483   : > { %2992 = vtanh.f32 %v1415_v48 }
 0x484   : > { %2994 = vpow2.f32 %v2745_v42  ;;  %v4802_v42 = vld [vmem:[#allocation23_spill] sm:$0xff] }
 0x48d   : > { %v2989_v4 = vpop.eup %2988 }
 0x48e   : > { %v1426_v41 = vadd.f32 1.0, %v2989_v4 }
 0x48f   : > { %v2991_v45 = vpop.eup %2990 }
 0x490   : > { %2996 = vrcp.f32 %v1426_v41  ;;  %v1427_v59 = vadd.f32 1.0, %v2991_v45  ;;  %v2993_v52 = vpop.eup %2992  ;;  %v1796_v45 = vld [vmem:[#allocation4 + $0x8] sm:$0xff]  ;;  %v4801_v41 = vld [vmem:[#allocation31_spill] sm:$0xff] }
 0x491   : > { %v2995_v54 = vpop.eup %2994 }
 0x492   : > { %2998 = vrcp.f32 %v1427_v59  ;;  %v1428_v2 = vadd.f32 1.0, %v2995_v54  ;;  %v4806_v59 = vld [vmem:[#allocation54_spill] sm:$0xff]  ;;  %v4808_v54 = vld [vmem:[#allocation32_spill] sm:$0xff] }
 0x494   : > { %3000 = vrcp.f32 %v1428_v2  ;;  %v4812_v2 = vld [vmem:[#allocation36_spill] sm:$0xff] }
 0x49d   : > { %v2997_v49 = vpop.eup %2996 }
 0x49e   : > { %v1437_v58 = vmul.f32 %v2997_v49, %v2993_v52  ;;  %v4807_v52 = vld [vmem:[#allocation52_spill] sm:$0xff]  ;;  %v4809_v49 = vld [vmem:[#allocation33_spill] sm:$0xff] }
 0x49f   : > { %v2999_v44 = vpop.eup %2998 }
 0x4a0   : > { %v1436_v53 = vmul.f32 %v2999_v44, %v4001_v47  ;;  %v4800_v47 = vld [vmem:[#allocation30_spill] sm:$0xff]  ;;  %v4811_v44 = vld [vmem:[#allocation35_spill] sm:$0xff] }
 0x4a1   : > { %v3001_v43 = vpop.eup %3000 }
 0x4a2   : > { %v1438_v55 = vadd.f32 %v1437_v58, %v1436_v53  ;;  %v4810_v58 = vld [vmem:[#allocation34_spill] sm:$0xff]  ;;  %v4813_v53 = vld [vmem:[#allocation37_spill] sm:$0xff] }
 0x4a4   : > { %3002 = vtanh.f32 %v1438_v55  ;;  %1444 = vst [vmem:[#allocation5 + $0x8] sm:$0xff] %v1438_v55  ;;  %v4814_v55 = vld [vmem:[#allocation38_spill] sm:$0xff] }
 0x4b1   : > { %v3003_v4 = vpop.eup %3002 }
 0x4b2   : > { %v1440_v48 = vmul.f32 %v3003_v4, %v3001_v43  ;;  %v4815_v43 = vld [vmem:[#allocation39_spill] sm:$0xff]  ;;  %v4816_v4 = vld [vmem:[#allocation40_spill] sm:$0xff] }
 0x4b4   : > { %1443 = vst [vmem:[#allocation4] sm:$0xff] %v1440_v48  ;;  %1619 = vmatmul.mubr.f32.gmra.mxu0 %v1440_v48  ;;  %1708 = vmatmul.mubr.f32.gmra.mxu1 %v1440_v48  ;;  %v4817_v48 = vld [vmem:[#allocation41_spill] sm:$0xff] }
 0x4b5   : > { %1867 = vmatprep.mubr.f32.mxu0 %v4767_v22  ;;  %1938 = vmatprep.mubr.f32.mxu1 %v4767_v22 }
 0x4b8   : > { %1868 = vmatmul.mubr.f32.vlgmr.msra.gmra.mxu0 %v1796_v45  ;;  %1939 = vmatmul.mubr.f32.vlgmr.msra.gmra.mxu1 %v1796_v45  ;;  %v4818_v45 = vld [vmem:[#allocation25_spill] sm:$0xff] }
 0x4b9   : > { %1978 = vmatpush1.msra.mxu0 %v4028_v57  ;;  %2049 = vmatpush1.msra.mxu1 %v4030_v3 }
 0x4ba   : > { %1979 = vmatprep.subr.mxu0 %v4034_v0  ;;  %2050 = vmatprep.subr.mxu1 %v4036_v62 }
 0x4bb   : > { %1980 = vmatpush1.msra.mxu0 %v4040_v51  ;;  %2051 = vmatpush1.msra.mxu1 %v4042_v63 }
 0x4bc   : > { %1981 = vmatprep.subr.mxu0 %v4046_v56  ;;  %2052 = vmatprep.subr.mxu1 %v4048_v50 }
 0x4bd   : > { %1982 = vmatpush1.msra.mxu0 %v4052_v39  ;;  %2053 = vmatpush1.msra.mxu1 %v4054_v61 }
 0x4be   : > { %1983 = vmatprep.subr.mxu0 %v4058_v5  ;;  %2054 = vmatprep.subr.mxu1 %v4060_v6 }
 0x4bf   : > { %1984 = vmatpush1.msra.mxu0 %v4064_v7  ;;  %2055 = vmatpush1.msra.mxu1 %v4066_v8 }
 0x4c0   : > { %1985 = vmatprep.subr.mxu0 %v4070_v9  ;;  %2056 = vmatprep.subr.mxu1 %v4072_v10 }
 0x4c1   : > { %1986 = vmatpush1.msra.mxu0 %v4076_v11  ;;  %2057 = vmatpush1.msra.mxu1 %v4078_v12 }
 0x4c2   : > { %1987 = vmatprep.subr.mxu0 %v4082_v13  ;;  %2058 = vmatprep.subr.mxu1 %v4084_v14 }
 0x4c3   : > { %1988 = vmatpush1.msra.mxu0 %v4088_v15  ;;  %2059 = vmatpush1.msra.mxu1 %v4090_v16 }
 0x4c4   : > { %1989 = vmatprep.subr.mxu0 %v4094_v17  ;;  %2060 = vmatprep.subr.mxu1 %v4096_v18 }
 0x4c5   : > { %1990 = vmatpush1.msra.mxu0 %v4100_v19  ;;  %2061 = vmatpush1.msra.mxu1 %v4102_v20 }
 0x4c6   : > { %1991 = vmatprep.subr.mxu0 %v4106_v21  ;;  %2062 = vmatprep.subr.mxu1 %v4108_v23 }
 0x4c7   : > { %1992 = vmatpush1.msra.mxu0 %v4110_v24  ;;  %2063 = vmatpush1.msra.mxu1 %v4114_v25 }
 0x4c8   : > { %1993 = vmatprep.subr.mxu0 %v4116_v26  ;;  %2064 = vmatprep.subr.mxu1 %v4118_v27 }
 0x4c9   : > { %1994 = vmatpush1.msra.mxu0 %v4122_v28  ;;  %2065 = vmatpush1.msra.mxu1 %v4124_v29 }
 0x4ca   : > { %1995 = vmatprep.subr.mxu0 %v4126_v30  ;;  %2066 = vmatprep.subr.mxu1 %v4130_v31 }
 0x4cb   : > { %1996 = vmatpush1.msra.mxu0 %v4132_v32  ;;  %2067 = vmatpush1.msra.mxu1 %v4134_v33 }
 0x4cc   : > { %1997 = vmatprep.subr.mxu0 %v4138_v34  ;;  %2068 = vmatprep.subr.mxu1 %v4140_v35 }
 0x4cd   : > { %1998 = vmatpush1.msra.mxu0 %v4144_v36  ;;  %2069 = vmatpush1.msra.mxu1 %v4146_v37 }
 0x4ce   : > { %1999 = vmatprep.subr.mxu0 %v4150_v38  ;;  %2070 = vmatprep.subr.mxu1 %v4152_v40 }
 0x4cf   : > { %2000 = vmatpush1.msra.mxu0 %v4800_v47  ;;  %2071 = vmatpush1.msra.mxu1 %v4801_v41 }
 0x4d0   : > { %2001 = vmatprep.subr.mxu0 %v4802_v42  ;;  %2072 = vmatprep.subr.mxu1 %v4803_v60 }
 0x4d1   : > { %2002 = vmatpush1.msra.mxu0 %v4804_v46  ;;  %2073 = vmatpush1.msra.mxu1 %v4805_v1 }
 0x4d2   : > { %2003 = vmatprep.subr.mxu0 %v4806_v59  ;;  %2074 = vmatprep.subr.mxu1 %v4807_v52 }
 0x4d3   : > { %2004 = vmatpush1.msra.mxu0 %v4808_v54  ;;  %2075 = vmatpush1.msra.mxu1 %v4809_v49 }
 0x4d4   : > { %2005 = vmatprep.subr.mxu0 %v4810_v58  ;;  %2076 = vmatprep.subr.mxu1 %v4811_v44  ;;  %v4819_v58 = vld [vmem:[#allocation26_spill] sm:$0xff]  ;;  %v1602_v44 = vpop.f32.mrf.mxu0 }
 0x4d5   : > { %2006 = vmatpush1.msra.mxu0 %v4812_v2  ;;  %2077 = vmatpush1.msra.mxu1 %v4813_v53  ;;  %v1691_v2 = vpop.f32.mrf.mxu1 }
 0x4d6   : > { %2007 = vmatprep.subr.mxu0 %v4814_v55  ;;  %2078 = vmatprep.subr.mxu1 %v4815_v43  ;;  %v1604_v49 = vpop.f32.mrf.mxu0 }
 0x4d7   : > { %2008 = vmatpush1.msra.mxu0 %v4816_v4  ;;  %2041 = vmatprep.mubr.f32.mxu0 %v4767_v22  ;;  %v1693_v53 = vpop.f32.mrf.mxu1 }
 0x4d8   : > { %2079 = vmatpush1.msra.mxu1 %v4817_v48  ;;  %2112 = vmatprep.mubr.f32.mxu1 %v4767_v22  ;;  %v4289_v54 = vpop.f32.mrf.mxu0  ;;  %v1514_v22 = vld [vmem:[#allocation14 + $0x4] sm:$0xf] }
 0x4d9   : > { %2151 = vmatprep.subr.mxu0 %v4818_v45  ;;  %2222 = vmatprep.subr.mxu1 %v4819_v58  ;;  %4820 = vst [vmem:[#allocation42_spill] sm:$0xff] %v4289_v54  ;;  %v4291_v55 = vpop.f32.mrf.mxu1  ;;  %v4827_v58 = vld [vmem:[#allocation49_spill] sm:$0xff] }
 0x4da   : > { %4821 = vst [vmem:[#allocation43_spill] sm:$0xff] %v4291_v55  ;;  %v4293_v43 = vpop.f32.mrf.mxu0  ;;  %v4828_v59 = vsub.s32 0, %v4827_v58  ;;  %v4832_v55 = vsub.s32 1, %v4827_v58 }
 0x4db   : > { %4822 = vst [vmem:[#allocation44_spill] sm:$0xff] %v4293_v43  ;;  %v4295_v4 = vpop.f32.mrf.mxu1 }
 0x4dc   : > { %4823 = vst [vmem:[#allocation45_spill] sm:$0xff] %v4295_v4  ;;  %v4297_v52 = vpop.f32.mrf.mxu0  ;;  %v4305_v1 = vrot.slane %v1514_v22, %v4828_v59  ;;  %v4313_v43 = vrot.slane %v1514_v22, %v4832_v55  ;;  %v4836_v55 = vsub.s32 3, %v4827_v58 }
 0x4dd   : > { %4824 = vst [vmem:[#allocation46_spill] sm:$0xff] %v4297_v52  ;;  %v4299_v48 = vpop.f32.mrf.mxu1 }
 0x4de   : > { %4825 = vst [vmem:[#allocation47_spill] sm:$0xff] %v4299_v48  ;;  %v4301_v45 = vpop.f32.mrf.mxu0  ;;  %4829 = vst [vmem:[#allocation53_spill] sm:$0xff] %v4305_v1  ;;  %v1603_v48 = vadd.f32 %v1602_v44, %v4305_v1  ;;  %v4325_v38 = vrot.slane %v1514_v22, %v4836_v55 }
 0x4df   : > { %4826 = vst [vmem:[#allocation48_spill] sm:$0xff] %v4301_v45  ;;  %v4307_v46 = vpop.f32.mrf.mxu1  ;;  %v1605_v45 = vadd.f32 %v1604_v49, %v4313_v43 }
 0x4e0   : > { %4830 = vst [vmem:[#allocation55_spill] sm:$0xff] %v4307_v46  ;;  %4837 = vst [vmem:[#allocation59_spill] sm:$0xff] %v4325_v38  ;;  %v1694_v44 = vadd.f32 %v1693_v53, %v4325_v38  ;;  %v1798_v53 = vld [vmem:[#allocation5] sm:$0xff] }
 0x574   : > { %v4309_v54 = vpop.f32.mrf.mxu0  ;;  %v4315_v4 = vpop.f32.mrf.mxu1 }
 0x575   : > { %4831 = vst [vmem:[#allocation58_spill] sm:$0xff] %v4309_v54  ;;  %4833 = vst [vmem:[#allocation56_spill] sm:$0xff] %v4315_v4 }
 0x576   : > { %v4317_v52 = vpop.f32.mrf.mxu0  ;;  %v4321_v42 = vpop.f32.mrf.mxu1 }
 0x577   : > { %4834 = vst [vmem:[#allocation62_spill] sm:$0xff] %v4317_v52  ;;  %4835 = vst [vmem:[#allocation57_spill] sm:$0xff] %v4321_v42  ;;  %v4838_v52 = vsub.s32 2, %v4827_v58 }
 0x578   : > { %v1869_v60 = vpop.f32.mrf.mxu0  ;;  %v1940_v54 = vpop.f32.mrf.mxu1 }
 0x579   : > { %v1945_v59 = vadd.f32 %v1869_v60, %v1603_v48  ;;  %v4330_v49 = vrot.slane %v1514_v22, %v4838_v52 }
 0x57a   : > { %v1871_v41 = vpop.f32.mrf.mxu0  ;;  %v1942_v4 = vpop.f32.mrf.mxu1 }
 0x57b   : > { %v2746_v46 = vmul.f32 -1.442695, %v1945_v59  ;;  %v1946_v47 = vadd.f32 %v1871_v41, %v1605_v45  ;;  %v1948_v42 = vadd.f32 %v1942_v4, %v1694_v44  ;;  %v1692_v60 = vadd.f32 %v1691_v2, %v4330_v49 }
 0x57d   : > { %3004 = vpow2.f32 %v2746_v46  ;;  %v2747_v40 = vmul.f32 -1.442695, %v1946_v47  ;;  %v2748_v48 = vmul.f32 -1.442695, %v1948_v42  ;;  %v1947_v46 = vadd.f32 %v1940_v54, %v1692_v60  ;;  %v4840_v60 = vld [vmem:[#allocation29_spill] sm:$0xff] }
 0x57f   : > { %3006 = vpow2.f32 %v2747_v40 }
 0x580   : > { %3008 = vpow2.f32 %v2748_v48  ;;  %v4841_v48 = vld [vmem:[#allocation30_spill] sm:$0xff] }
 0x58a   : > { %v3005_v41 = vpop.eup %3004 }
 0x58b   : > { %v1958_v45 = vadd.f32 1.0, %v3005_v41  ;;  %v4842_v41 = vld [vmem:[#allocation31_spill] sm:$0xff] }
 0x58c   : > { %v3007_v47 = vpop.eup %3006 }
 0x58d   : > { %3010 = vrcp.f32 %v1958_v45  ;;  %v1959_v59 = vadd.f32 1.0, %v3007_v47  ;;  %v3009_v40 = vpop.eup %3008  ;;  %v4844_v45 = vld [vmem:[#allocation24_spill] sm:$0xff]  ;;  %v4845_v47 = vld [vmem:[#allocation50_spill] sm:$0xff] }
 0x58e   : > { %3012 = vtanh.f32 %v1947_v46  ;;  %v1960_v22 = vadd.f32 1.0, %v3009_v40  ;;  %v4843_v46 = vld [vmem:[#allocation23_spill] sm:$0xff]  ;;  %v4847_v40 = vld [vmem:[#allocation54_spill] sm:$0xff] }
 0x58f   : > { %3014 = vrcp.f32 %v1959_v59  ;;  %v4846_v59 = vld [vmem:[#allocation51_spill] sm:$0xff] }
 0x590   : > { %3016 = vrcp.f32 %v1960_v22  ;;  %v4851_v22 = vld [vmem:[#allocation34_spill] sm:$0xff] }
 0x59a   : > { %v3011_v55 = vpop.eup %3010 }
 0x59b   : > { %v3013_v38 = vpop.eup %3012 }
 0x59c   : > { %v3015_v58 = vpop.eup %3014  ;;  %v1969_v52 = vmul.f32 %v3013_v38, %v3011_v55  ;;  %v4839_v38 = vld [vmem:[#allocation28_spill] sm:$0xff] }
 0x59d   : > { %v1968_v4 = vmul.f32 %v3015_v58, %v1798_v53  ;;  %v3017_v42 = vpop.eup %3016  ;;  %v4848_v55 = vld [vmem:[#allocation52_spill] sm:$0xff]  ;;  %v4850_v58 = vld [vmem:[#allocation33_spill] sm:$0xff] }
 0x59e   : > { %v4849_v53 = vld [vmem:[#allocation32_spill] sm:$0xff] }
 0x59f   : > { %v4333_v44 = vadd.f32 %v1969_v52, %v1968_v4  ;;  %v4852_v52 = vld [vmem:[#allocation35_spill] sm:$0xff]  ;;  %v4853_v4 = vld [vmem:[#allocation36_spill] sm:$0xff] }
 0x5a1   : > { %3018 = vtanh.f32 %v4333_v44 }
 0x5ae   : > { %v3019_v54 = vpop.eup %3018 }
 0x5af   : > { %v1972_v2 = vmul.f32 %v3019_v54, %v3017_v42  ;;  %v4854_v42 = vld [vmem:[#allocation37_spill] sm:$0xff]  ;;  %v4855_v54 = vld [vmem:[#allocation38_spill] sm:$0xff] }
 0x5b1   : > { %2042 = vmatmul.mubr.f32.vlgmr.msra.gmra.mxu0 %v1972_v2  ;;  %2113 = vmatmul.mubr.f32.vlgmr.msra.gmra.mxu1 %v1972_v2  ;;  %v4856_v2 = vld [vmem:[#allocation39_spill] sm:$0xff] }
 0x5b2   : > { %2152 = vmatpush1.msra.mxu0 %v4028_v57  ;;  %2223 = vmatpush1.msra.mxu1 %v4030_v3 }
 0x5b3   : > { %2153 = vmatprep.subr.mxu0 %v4034_v0  ;;  %2224 = vmatprep.subr.mxu1 %v4036_v62 }
 0x5b4   : > { %2154 = vmatpush1.msra.mxu0 %v4040_v51  ;;  %2225 = vmatpush1.msra.mxu1 %v4042_v63 }
 0x5b5   : > { %2155 = vmatprep.subr.mxu0 %v4046_v56  ;;  %2226 = vmatprep.subr.mxu1 %v4048_v50 }
 0x5b6   : > { %2156 = vmatpush1.msra.mxu0 %v4052_v39  ;;  %2227 = vmatpush1.msra.mxu1 %v4054_v61 }
 0x5b7   : > { %2157 = vmatprep.subr.mxu0 %v4058_v5  ;;  %2228 = vmatprep.subr.mxu1 %v4060_v6 }
 0x5b8   : > { %2158 = vmatpush1.msra.mxu0 %v4064_v7  ;;  %2229 = vmatpush1.msra.mxu1 %v4066_v8 }
 0x5b9   : > { %2159 = vmatprep.subr.mxu0 %v4070_v9  ;;  %2230 = vmatprep.subr.mxu1 %v4072_v10 }
 0x5ba   : > { %2160 = vmatpush1.msra.mxu0 %v4076_v11  ;;  %2231 = vmatpush1.msra.mxu1 %v4078_v12 }
 0x5bb   : > { %2161 = vmatprep.subr.mxu0 %v4082_v13  ;;  %2232 = vmatprep.subr.mxu1 %v4084_v14 }
 0x5bc   : > { %2162 = vmatpush1.msra.mxu0 %v4088_v15  ;;  %2233 = vmatpush1.msra.mxu1 %v4090_v16 }
 0x5bd   : > { %2163 = vmatprep.subr.mxu0 %v4094_v17  ;;  %2234 = vmatprep.subr.mxu1 %v4096_v18 }
 0x5be   : > { %2164 = vmatpush1.msra.mxu0 %v4100_v19  ;;  %2235 = vmatpush1.msra.mxu1 %v4102_v20 }
 0x5bf   : > { %2165 = vmatprep.subr.mxu0 %v4106_v21  ;;  %2236 = vmatprep.subr.mxu1 %v4108_v23 }
 0x5c0   : > { %2166 = vmatpush1.msra.mxu0 %v4110_v24  ;;  %2237 = vmatpush1.msra.mxu1 %v4114_v25 }
 0x5c1   : > { %2167 = vmatprep.subr.mxu0 %v4116_v26  ;;  %2238 = vmatprep.subr.mxu1 %v4118_v27 }
 0x5c2   : > { %2168 = vmatpush1.msra.mxu0 %v4122_v28  ;;  %2239 = vmatpush1.msra.mxu1 %v4124_v29 }
 0x5c3   : > { %2169 = vmatprep.subr.mxu0 %v4126_v30  ;;  %2240 = vmatprep.subr.mxu1 %v4130_v31 }
 0x5c4   : > { %2170 = vmatpush1.msra.mxu0 %v4132_v32  ;;  %2241 = vmatpush1.msra.mxu1 %v4134_v33 }
 0x5c5   : > { %2171 = vmatprep.subr.mxu0 %v4138_v34  ;;  %2242 = vmatprep.subr.mxu1 %v4140_v35 }
 0x5c6   : > { %2172 = vmatpush1.msra.mxu0 %v4144_v36  ;;  %2243 = vmatpush1.msra.mxu1 %v4146_v37 }
 0x5c7   : > { %2173 = vmatprep.subr.mxu0 %v4839_v38  ;;  %2244 = vmatprep.subr.mxu1 %v4840_v60  ;;  %v4866_v60 = vld [vmem:[#allocation43_spill] sm:$0xff] }
 0x5c8   : > { %2174 = vmatpush1.msra.mxu0 %v4841_v48  ;;  %2245 = vmatpush1.msra.mxu1 %v4842_v41  ;;  %v4864_v41 = vld [vmem:[#allocation59_spill] sm:$0xff] }
 0x5c9   : > { %2175 = vmatprep.subr.mxu0 %v4843_v46  ;;  %2246 = vmatprep.subr.mxu1 %v4844_v45 }
 0x5ca   : > { %2176 = vmatpush1.msra.mxu0 %v4845_v47  ;;  %2247 = vmatpush1.msra.mxu1 %v4846_v59  ;;  %v4857_v59 = vld [vmem:[#allocation40_spill] sm:$0xff] }
 0x5cb   : > { %2177 = vmatprep.subr.mxu0 %v4847_v40  ;;  %2248 = vmatprep.subr.mxu1 %v4848_v55  ;;  %v4858_v40 = vmov 0.0   ;;  %v4859_v55 = vld [vmem:[#allocation41_spill] sm:$0xff] }
 0x5cc   : > { %2178 = vmatpush1.msra.mxu0 %v4849_v53  ;;  %2249 = vmatpush1.msra.mxu1 %v4850_v58  ;;  %v4860_v58 = vld [vmem:[#allocation25_spill] sm:$0xff] }
 0x5cd   : > { %2179 = vmatprep.subr.mxu0 %v4851_v22  ;;  %2250 = vmatprep.subr.mxu1 %v4852_v52  ;;  %v4861_v22 = vld [vmem:[#allocation26_spill] sm:$0xff] }
 0x5ce   : > { %2180 = vmatpush1.msra.mxu0 %v4853_v4  ;;  %2251 = vmatpush1.msra.mxu1 %v4854_v42  ;;  %v4862_v4 = vld [vmem:[#allocation42_spill] sm:$0xff] }
 0x5cf   : > { %2181 = vmatprep.subr.mxu0 %v4855_v54  ;;  %2252 = vmatprep.subr.mxu1 %v4856_v2  ;;  %v1609_v52 = vadd.f32 %v4862_v4, %v4305_v1  ;;  %v4863_v54 = vld [vmem:[#allocation44_spill] sm:$0xff]  ;;  %v1698_v4 = vadd.f32 %v4866_v60, %v4330_v49 }
 0x5d0   : > { %2182 = vmatpush1.msra.mxu0 %v4857_v59  ;;  %2215 = vmatprep.mubr.f32.mxu0 %v4858_v40  ;;  %v1611_v53 = vadd.f32 %v4863_v54, %v4313_v43 }
 0x5d1   : > { %2253 = vmatpush1.msra.mxu1 %v4859_v55  ;;  %2286 = vmatprep.mubr.f32.mxu1 %v4858_v40 }
 0x5d2   : > { %2325 = vmatprep.subr.mxu0 %v4860_v58  ;;  %2396 = vmatprep.subr.mxu1 %v4861_v22  ;;  %v4865_v58 = vld [vmem:[#allocation45_spill] sm:$0xff] }
 0x5d3   : > { %v1700_v48 = vadd.f32 %v4865_v58, %v4864_v41 }
 0x671   : > { %v2043_v42 = vpop.f32.mrf.mxu0  ;;  %v2114_v46 = vpop.f32.mrf.mxu1 }
 0x672   : > { %v2119_v2 = vadd.f32 %v2043_v42, %v1609_v52  ;;  %v2121_v1 = vadd.f32 %v2114_v46, %v1698_v4 }
 0x673   : > { %v2045_v47 = vpop.f32.mrf.mxu0  ;;  %v2116_v40 = vpop.f32.mrf.mxu1 }
 0x674   : > { %v2749_v59 = vmul.f32 -1.442695, %v2119_v2  ;;  %v2120_v45 = vadd.f32 %v2045_v47, %v1611_v53  ;;  %v2122_v22 = vadd.f32 %v2116_v40, %v1700_v48 }
 0x676   : > { %3020 = vpow2.f32 %v2749_v59  ;;  %v2750_v55 = vmul.f32 -1.442695, %v2120_v45  ;;  %v2751_v38 = vmul.f32 -1.442695, %v2122_v22 }
 0x678   : > { %3022 = vpow2.f32 %v2750_v55 }
 0x679   : > { %3024 = vtanh.f32 %v2121_v1 }
 0x67a   : > { %3026 = vpow2.f32 %v2751_v38 }
 0x683   : > { %v3021_v37 = vpop.eup %3020 }
 0x684   : > { %v2132_v54 = vadd.f32 1.0, %v3021_v37 }
 0x685   : > { %v3023_v52 = vpop.eup %3022 }
 0x686   : > { %3028 = vrcp.f32 %v2132_v54  ;;  %v2133_v47 = vadd.f32 1.0, %v3023_v52  ;;  %v3025_v45 = vpop.eup %3024 }
 0x687   : > { %v3027_v59 = vpop.eup %3026 }
 0x688   : > { %3030 = vrcp.f32 %v2133_v47  ;;  %v2134_v2 = vadd.f32 1.0, %v3027_v59 }
 0x68a   : > { %3032 = vrcp.f32 %v2134_v2 }
 0x693   : > { %v3029_v55 = vpop.eup %3028 }
 0x694   : > { %v2143_v53 = vmul.f32 %v3029_v55, %v3025_v45 }
 0x695   : > { %v3031_v42 = vpop.eup %3030 }
 0x696   : > { %v2142_v48 = vmul.f32 %v3031_v42, %v4333_v44 }
 0x697   : > { %v3033_v37 = vpop.eup %3032 }
 0x698   : > { %v4411_v40 = vadd.f32 %v2143_v53, %v2142_v48 }
 0x69a   : > { %3034 = vtanh.f32 %v4411_v40 }
 0x6a7   : > { %v3035_v1 = vpop.eup %3034 }
 0x6a8   : > { %v2146_v60 = vmul.f32 %v3035_v1, %v3033_v37  ;;  %v4894_v37 = vld [vmem:[#allocation58_spill] sm:$0xff] }
 0x6aa   : > { %2216 = vmatmul.mubr.f32.vlgmr.msra.gmra.mxu0 %v2146_v60  ;;  %2287 = vmatmul.mubr.f32.vlgmr.msra.gmra.mxu1 %v2146_v60 }
 0x6ab   : > { %2326 = vmatpush1.msra.mxu0 %v4028_v57  ;;  %2397 = vmatpush1.msra.mxu1 %v4030_v3  ;;  %v4867_v57 = vld [vmem:[#allocation27_spill] sm:$0xff]  ;;  %v4868_v3 = vld [vmem:[#allocation28_spill] sm:$0xff] }
 0x6ac   : > { %2327 = vmatprep.subr.mxu0 %v4034_v0  ;;  %2398 = vmatprep.subr.mxu1 %v4036_v62  ;;  %v4869_v0 = vld [vmem:[#allocation29_spill] sm:$0xff]  ;;  %v4870_v62 = vld [vmem:[#allocation30_spill] sm:$0xff] }
 0x6ad   : > { %2328 = vmatpush1.msra.mxu0 %v4040_v51  ;;  %2399 = vmatpush1.msra.mxu1 %v4042_v63  ;;  %v4871_v51 = vld [vmem:[#allocation31_spill] sm:$0xff] }
 0x6ae   : > { %2329 = vmatprep.subr.mxu0 %v4046_v56  ;;  %2400 = vmatprep.subr.mxu1 %v4048_v50  ;;  %v4872_v63 = vld [vmem:[#allocation23_spill] sm:$0xff]  ;;  %v4873_v56 = vld [vmem:[#allocation24_spill] sm:$0xff]  ;;  %v4874_v50 = vld [vmem:[#allocation50_spill] sm:$0xff] }
 0x6af   : > { %2330 = vmatpush1.msra.mxu0 %v4052_v39  ;;  %2401 = vmatpush1.msra.mxu1 %v4054_v61  ;;  %v4875_v39 = vld [vmem:[#allocation51_spill] sm:$0xff]  ;;  %v4876_v61 = vld [vmem:[#allocation54_spill] sm:$0xff] }
 0x6b0   : > { %2331 = vmatprep.subr.mxu0 %v4058_v5  ;;  %2402 = vmatprep.subr.mxu1 %v4060_v6  ;;  %v4877_v5 = vld [vmem:[#allocation52_spill] sm:$0xff] }
 0x6b1   : > { %2332 = vmatpush1.msra.mxu0 %v4064_v7  ;;  %2403 = vmatpush1.msra.mxu1 %v4066_v8  ;;  %v4878_v6 = vld [vmem:[#allocation32_spill] sm:$0xff]  ;;  %v4879_v7 = vld [vmem:[#allocation33_spill] sm:$0xff]  ;;  %v4880_v8 = vld [vmem:[#allocation34_spill] sm:$0xff] }
 0x6b2   : > { %2333 = vmatprep.subr.mxu0 %v4070_v9  ;;  %2404 = vmatprep.subr.mxu1 %v4072_v10  ;;  %v4881_v9 = vld [vmem:[#allocation35_spill] sm:$0xff]  ;;  %v4882_v10 = vld [vmem:[#allocation36_spill] sm:$0xff] }
 0x6b3   : > { %2334 = vmatpush1.msra.mxu0 %v4076_v11  ;;  %2405 = vmatpush1.msra.mxu1 %v4078_v12  ;;  %v4883_v11 = vld [vmem:[#allocation37_spill] sm:$0xff]  ;;  %v4884_v12 = vld [vmem:[#allocation38_spill] sm:$0xff] }
 0x6b4   : > { %2335 = vmatprep.subr.mxu0 %v4082_v13  ;;  %2406 = vmatprep.subr.mxu1 %v4084_v14  ;;  %v4885_v13 = vld [vmem:[#allocation39_spill] sm:$0xff]  ;;  %v4886_v14 = vld [vmem:[#allocation40_spill] sm:$0xff] }
 0x6b5   : > { %2336 = vmatpush1.msra.mxu0 %v4088_v15  ;;  %2407 = vmatpush1.msra.mxu1 %v4090_v16  ;;  %v4887_v15 = vmov 0.0   ;;  %v4888_v16 = vld [vmem:[#allocation41_spill] sm:$0xff] }
 0x6b6   : > { %2337 = vmatprep.subr.mxu0 %v4094_v17  ;;  %2408 = vmatprep.subr.mxu1 %v4096_v18  ;;  %v4889_v17 = vld [vmem:[#allocation53_spill] sm:$0xff]  ;;  %v4890_v18 = vld [vmem:[#allocation46_spill] sm:$0xff] }
 0x6b7   : > { %2338 = vmatpush1.msra.mxu0 %v4100_v19  ;;  %2409 = vmatpush1.msra.mxu1 %v4102_v20  ;;  %v1615_v19 = vadd.f32 %v4890_v18, %v4889_v17  ;;  %v1621_v1 = vadd.f32 %v4894_v37, %v4889_v17 }
 0x6b8   : > { %2339 = vmatprep.subr.mxu0 %v4106_v21  ;;  %2410 = vmatprep.subr.mxu1 %v4108_v23  ;;  %v4891_v21 = vld [vmem:[#allocation48_spill] sm:$0xff] }
 0x6b9   : > { %2340 = vmatpush1.msra.mxu0 %v4110_v24  ;;  %2411 = vmatpush1.msra.mxu1 %v4114_v25  ;;  %v1617_v23 = vadd.f32 %v4891_v21, %v4313_v43 }
 0x6ba   : > { %2341 = vmatprep.subr.mxu0 %v4116_v26  ;;  %2412 = vmatprep.subr.mxu1 %v4118_v27 }
 0x6bb   : > { %2342 = vmatpush1.msra.mxu0 %v4122_v28  ;;  %2413 = vmatpush1.msra.mxu1 %v4124_v29 }
 0x6bc   : > { %2343 = vmatprep.subr.mxu0 %v4126_v30  ;;  %2414 = vmatprep.subr.mxu1 %v4130_v31  ;;  %v4892_v31 = vld [vmem:[#allocation55_spill] sm:$0xff] }
 0x6bd   : > { %2344 = vmatpush1.msra.mxu0 %v4132_v32  ;;  %2415 = vmatpush1.msra.mxu1 %v4134_v33  ;;  %v1706_v32 = vadd.f32 %v4892_v31, %v4864_v41 }
 0x6be   : > { %2345 = vmatprep.subr.mxu0 %v4138_v34  ;;  %2416 = vmatprep.subr.mxu1 %v4140_v35  ;;  %v4893_v34 = vld [vmem:[#allocation47_spill] sm:$0xff] }
 0x6bf   : > { %2346 = vmatpush1.msra.mxu0 %v4144_v36  ;;  %2417 = vmatpush1.msra.mxu1 %v4867_v57  ;;  %v1704_v35 = vadd.f32 %v4893_v34, %v4330_v49  ;;  %v4895_v57 = vld [vmem:[#allocation62_spill] sm:$0xff] }
 0x6c0   : > { %2347 = vmatprep.subr.mxu0 %v4868_v3  ;;  %2418 = vmatprep.subr.mxu1 %v4869_v0  ;;  %v1623_v3 = vadd.f32 %v4895_v57, %v4313_v43 }
 0x6c1   : > { %2348 = vmatpush1.msra.mxu0 %v4870_v62  ;;  %2419 = vmatpush1.msra.mxu1 %v4871_v51 }
 0x6c2   : > { %2349 = vmatprep.subr.mxu0 %v4872_v63  ;;  %2420 = vmatprep.subr.mxu1 %v4873_v56 }
 0x6c3   : > { %2350 = vmatpush1.msra.mxu0 %v4874_v50  ;;  %2421 = vmatpush1.msra.mxu1 %v4875_v39  ;;  %v4896_v39 = vld [vmem:[#allocation57_spill] sm:$0xff] }
 0x6c4   : > { %2351 = vmatprep.subr.mxu0 %v4876_v61  ;;  %2422 = vmatprep.subr.mxu1 %v4877_v5  ;;  %v1712_v61 = vadd.f32 %v4896_v39, %v4864_v41 }
 0x6c5   : > { %2352 = vmatpush1.msra.mxu0 %v4878_v6  ;;  %2423 = vmatpush1.msra.mxu1 %v4879_v7  ;;  %v4897_v6 = vld [vmem:[#allocation56_spill] sm:$0xff] }
 0x6c6   : > { %2353 = vmatprep.subr.mxu0 %v4880_v8  ;;  %2424 = vmatprep.subr.mxu1 %v4881_v9  ;;  %v1710_v7 = vadd.f32 %v4897_v6, %v4330_v49 }
 0x6c7   : > { %2354 = vmatpush1.msra.mxu0 %v4882_v10  ;;  %2425 = vmatpush1.msra.mxu1 %v4883_v11 }
 0x6c8   : > { %2355 = vmatprep.subr.mxu0 %v4884_v12  ;;  %2426 = vmatprep.subr.mxu1 %v4885_v13 }
 0x6c9   : > { %2356 = vmatpush1.msra.mxu0 %v4886_v14  ;;  %2389 = vmatprep.mubr.f32.mxu0 %v4887_v15 }
 0x6ca   : > { %2427 = vmatpush1.msra.mxu1 %v4888_v16  ;;  %2460 = vmatprep.mubr.f32.mxu1 %v4887_v15 }
 0x76a   : > { %v2217_v20 = vpop.f32.mrf.mxu0  ;;  %v2288_v28 = vpop.f32.mrf.mxu1 }
 0x76b   : > { %v2293_v24 = vadd.f32 %v2217_v20, %v1615_v19  ;;  %v2295_v36 = vadd.f32 %v2288_v28, %v1704_v35 }
 0x76c   : > { %v2219_v25 = vpop.f32.mrf.mxu0  ;;  %v2290_v30 = vpop.f32.mrf.mxu1 }
 0x76d   : > { %v2752_v26 = vmul.f32 -1.442695, %v2293_v24  ;;  %v2294_v27 = vadd.f32 %v2219_v25, %v1617_v23  ;;  %v2296_v33 = vadd.f32 %v2290_v30, %v1706_v32 }
 0x76f   : > { %3036 = vpow2.f32 %v2752_v26  ;;  %v2753_v29 = vmul.f32 -1.442695, %v2294_v27  ;;  %v2754_v44 = vmul.f32 -1.442695, %v2296_v33 }
 0x771   : > { %3038 = vpow2.f32 %v2753_v29 }
 0x772   : > { %3040 = vtanh.f32 %v2295_v36 }
 0x773   : > { %3042 = vpow2.f32 %v2754_v44 }
 0x77c   : > { %v3037_v38 = vpop.eup %3036 }
 0x77d   : > { %v2306_v46 = vadd.f32 1.0, %v3037_v38 }
 0x77e   : > { %v3039_v58 = vpop.eup %3038 }
 0x77f   : > { %3044 = vrcp.f32 %v2306_v46  ;;  %v2307_v22 = vadd.f32 1.0, %v3039_v58  ;;  %v3041_v4 = vpop.eup %3040 }
 0x780   : > { %v3043_v54 = vpop.eup %3042 }
 0x781   : > { %3046 = vrcp.f32 %v2307_v22  ;;  %v2308_v59 = vadd.f32 1.0, %v3043_v54 }
 0x783   : > { %3048 = vrcp.f32 %v2308_v59 }
 0x78c   : > { %v3045_v52 = vpop.eup %3044 }
 0x78d   : > { %v2317_v47 = vmul.f32 %v3045_v52, %v3041_v4 }
 0x78e   : > { %v3047_v45 = vpop.eup %3046 }
 0x78f   : > { %v2316_v55 = vmul.f32 %v3047_v45, %v4411_v40 }
 0x790   : > { %v3049_v42 = vpop.eup %3048 }
 0x791   : > { %v2318_v53 = vadd.f32 %v2317_v47, %v2316_v55 }
 0x793   : > { %3050 = vtanh.f32 %v2318_v53 }
 0x7a0   : > { %v3051_v2 = vpop.eup %3050 }
 0x7a1   : > { %v2320_v48 = vmul.f32 %v3051_v2, %v3049_v42 }
 0x7a3   : > { %2390 = vmatmul.mubr.f32.vlgmr.msra.gmra.mxu0 %v2320_v48  ;;  %2461 = vmatmul.mubr.f32.vlgmr.msra.gmra.mxu1 %v2320_v48 }
 0x863   : > { %v2391_v60 = vpop.f32.mrf.mxu0  ;;  %v2462_v40 = vpop.f32.mrf.mxu1 }
 0x864   : > { %v2467_v0 = vadd.f32 %v2391_v60, %v1621_v1  ;;  %v2469_v8 = vadd.f32 %v2462_v40, %v1710_v7 }
 0x865   : > { %v2393_v62 = vpop.f32.mrf.mxu0  ;;  %v2464_v50 = vpop.f32.mrf.mxu1 }
 0x866   : > { %v2755_v51 = vmul.f32 -1.442695, %v2467_v0  ;;  %v2468_v63 = vadd.f32 %v2393_v62, %v1623_v3  ;;  %v2470_v5 = vadd.f32 %v2464_v50, %v1712_v61 }
 0x868   : > { %3052 = vpow2.f32 %v2755_v51  ;;  %v2756_v56 = vmul.f32 -1.442695, %v2468_v63  ;;  %v2757_v9 = vmul.f32 -1.442695, %v2470_v5 }
 0x86a   : > { %3054 = vpow2.f32 %v2756_v56 }
 0x86b   : > { %3056 = vtanh.f32 %v2469_v8 }
 0x86c   : > { %3058 = vpow2.f32 %v2757_v9 }
 0x875   : > { %v3053_v10 = vpop.eup %3052 }
 0x876   : > { %v2480_v43 = vadd.f32 1.0, %v3053_v10 }
 0x877   : > { %v3055_v11 = vpop.eup %3054 }
 0x878   : > { %3060 = vrcp.f32 %v2480_v43  ;;  %v2481_v12 = vadd.f32 1.0, %v3055_v11  ;;  %v3057_v13 = vpop.eup %3056 }
 0x879   : > { %v3059_v14 = vpop.eup %3058 }
 0x87a   : > { %3062 = vrcp.f32 %v2481_v12  ;;  %v2482_v41 = vadd.f32 1.0, %v3059_v14 }
 0x87c   : > { %3064 = vrcp.f32 %v2482_v41 }
 0x885   : > { %v3061_v15 = vpop.eup %3060 }
 0x886   : > { %v2491_v16 = vmul.f32 %v3061_v15, %v3057_v13 }
 0x887   : > { %v3063_v17 = vpop.eup %3062 }
 0x888   : > { %v2490_v18 = vmul.f32 %v3063_v17, %v2318_v53 }
 0x889   : > { %v3065_v49 = vpop.eup %3064 }
 0x88a   : > { %v2492_v19 = vadd.f32 %v2491_v16, %v2490_v18 }
 0x88c   : > { %3066 = vtanh.f32 %v2492_v19  ;;  %2496 = vst [vmem:[#allocation5] sm:$0xff] %v2492_v19 }
 0x898   : > { %2500 = sbr.rel (%p2758_p12) target bundleno = 2434 (0x982), region = 80 }
 0x899   : > { %v3067_v20 = vpop.eup %3066 }
 0x89a   : > { %v2494_v21 = vmul.f32 %v3067_v20, %v3065_v49 }
 0x89c   : > { %2495 = vst [vmem:[#allocation4 + $0x8] sm:$0xff] %v2494_v21 }
 0x89d   : > { %v2516_v23 = vld [vmem:[#allocation15 + $0x78] sm:$0xff]  ;;  %v3332_v24 = vmov 0.0   ;;  %v2515_v25 = vld [vmem:[#allocation15 + $0x70] sm:$0xff]  ;;  %vm3333_vm0 = vmmov 0   ;;  %v2514_v26 = vld [vmem:[#allocation15 + $0x68] sm:$0xff] }
 0x89e   : > { %2782 = vmatprep.subr.mxu0 %v3332_v24  ;;  %2814 = vmatprep.mubr.msk.f32.mxu0 %vm3333_vm0, %v3332_v24  ;;  %v2513_v27 = vld [vmem:[#allocation15 + $0x60] sm:$0xff]  ;;  %v2512_v28 = vld [vmem:[#allocation15 + $0x58] sm:$0xff]  ;;  %v2511_v29 = vld [vmem:[#allocation15 + $0x50] sm:$0xff] }
 0x89f   : > { %2783 = vmatpush3.msra.mxu0 %v2516_v23  ;;  %v2510_v30 = vld [vmem:[#allocation15 + $0x48] sm:$0xff]  ;;  %v2509_v31 = vld [vmem:[#allocation15 + $0x40] sm:$0xff]  ;;  %v2508_v32 = vld [vmem:[#allocation15 + $0x38] sm:$0xff] }
 0x8a0   : > { %2784 = vmatprep.subr.mxu0 %v3332_v24  ;;  %v2507_v33 = vld [vmem:[#allocation15 + $0x30] sm:$0xff]  ;;  %v2506_v34 = vld [vmem:[#allocation15 + $0x28] sm:$0xff]  ;;  %v2505_v35 = vld [vmem:[#allocation15 + $0x20] sm:$0xff] }
 0x8a1   : > { %2785 = vmatpush3.msra.mxu0 %v2515_v25  ;;  %v2504_v36 = vld [vmem:[#allocation15 + $0x18] sm:$0xff]  ;;  %v2503_v44 = vld [vmem:[#allocation15 + $0x10] sm:$0xff]  ;;  %v2502_v38 = vld [vmem:[#allocation15 + $0x8] sm:$0xff] }
 0x8a2   : > { %2786 = vmatprep.subr.mxu0 %v3332_v24  ;;  %v2501_v46 = vld [vmem:[#allocation15] sm:$0xff]  ;;  %v2759_v58 = vld [vmem:[%s4540_s6] ss:$0 sm:$0xff] }
 0x8a3   : > { %2787 = vmatpush3.msra.mxu0 %v2514_v26 }
 0x8a4   : > { %2788 = vmatprep.subr.mxu0 %v3332_v24 }
 0x8a5   : > { %2789 = vmatpush3.msra.mxu0 %v2513_v27 }
 0x8a6   : > { %2790 = vmatprep.subr.mxu0 %v3332_v24 }
 0x8a7   : > { %2791 = vmatpush3.msra.mxu0 %v2512_v28 }
 0x8a8   : > { %2792 = vmatprep.subr.mxu0 %v3332_v24 }
 0x8a9   : > { %2793 = vmatpush3.msra.mxu0 %v2511_v29 }
 0x8aa   : > { %2794 = vmatprep.subr.mxu0 %v3332_v24 }
 0x8ab   : > { %2795 = vmatpush3.msra.mxu0 %v2510_v30 }
 0x8ac   : > { %2796 = vmatprep.subr.mxu0 %v3332_v24 }
 0x8ad   : > { %2797 = vmatpush3.msra.mxu0 %v2509_v31 }
 0x8ae   : > { %2798 = vmatprep.subr.mxu0 %v3332_v24 }
 0x8af   : > { %2799 = vmatpush3.msra.mxu0 %v2508_v32 }
 0x8b0   : > { %2800 = vmatprep.subr.mxu0 %v3332_v24 }
 0x8b1   : > { %2801 = vmatpush3.msra.mxu0 %v2507_v33 }
 0x8b2   : > { %2802 = vmatprep.subr.mxu0 %v3332_v24 }
 0x8b3   : > { %2803 = vmatpush3.msra.mxu0 %v2506_v34 }
 0x8b4   : > { %2804 = vmatprep.subr.mxu0 %v3332_v24 }
 0x8b5   : > { %2805 = vmatpush3.msra.mxu0 %v2505_v35 }
 0x8b6   : > { %2806 = vmatprep.subr.mxu0 %v3332_v24 }
 0x8b7   : > { %2807 = vmatpush3.msra.mxu0 %v2504_v36 }
 0x8b8   : > { %2808 = vmatprep.subr.mxu0 %v3332_v24 }
 0x8b9   : > { %2809 = vmatpush3.msra.mxu0 %v2503_v44 }
 0x8ba   : > { %2810 = vmatprep.subr.mxu0 %v3332_v24 }
 0x8bb   : > { %2811 = vmatpush3.msra.mxu0 %v2502_v38 }
 0x8bc   : > { %2812 = vmatprep.subr.mxu0 %v3332_v24 }
 0x8bd   : > { %2813 = vmatpush3.msra.mxu0 %v2501_v46 }
 0x8be   : > { %2815 = vmatmul.mubr.f32.vlgmr.msra.gmra.mxu0 %v2494_v21 }
 0x97e   : > { %v2590_v22 = vpop.f32.mrf.mxu0 }
 0x97f   : > { %v2591_v4 = vadd.f32 %v2759_v58, %v2590_v22 }
 0x980   : > { %v2816_v54 = vpop.f32.mrf.mxu0 }
 0x981   : > { %2594 = vst [vmem:[#allocation17] sm:$0xff] %v2591_v4 }
 0x982 PF: > { %s4898_s8 = sadd.s32 4294967295, %s3316_s29   ;;  %s3334_s11 = smov [#allocation17]  }
 0x983   : > { %p4501_p13 = scmp.eq.s32.totalorder %s4898_s8, 1  ;;  %s2604_s17 = sshll.u32 %s3334_s11, 4  ;;  %s2605_s17 = int_to_ptr.vmem [resolvable:$true] %s2604_s17 }
 0x984   : > { %s3226_s10 = scalar_lea.vmem %s2605_s17, 128  ;;  %p3233_p3 = scmp.lt.s32.totalorder %s2605_s17, %s2605_s17 }
 0x985   : > { %p3227_p5 = scmp.ne.s32.totalorder %s2605_s17, %s3226_s10  ;;  %p3234_p4 = scmp.lt.s32.totalorder %s3226_s10, %s3226_s10 }
 0x987   : > { %p3228_p0 = pnand %p3227_p5, %p4501_p13  ;;  %p3235_p6 = por %p3234_p4, %p3233_p3 }
 0x989   : > { %p3229_p2 = pneg %p3228_p0 }
 0x98b   : > { %p3236_p7 = pnand %p3235_p6, %p3229_p2 }
 0x98d   : > { %3239 = shalt.err (!%p3236_p7)
}
 0x98e   : > { %2840 = dma.vmem_to_hbm [thread:$0]  (%p4501_p13), %s2605_s17, 128, %s4541_s7, [#allocation8]  }
 0x98f   : > { %3291 = dma.done.wait (%p4501_p13), [#allocation8], 128  }
 0x990   : > { %3293 = vsyncadd (%p4501_p13), [#allocation8], 4294967168 }
 0x991 PF: > { %s24_s29 = sadd.s32 1, %s3316_s29   ;;  %s4900_s24 = smov %s3300_s25 }
 0x992   : > { %p21_p8 = scmp.ge.s32.totalorder %s24_s29, 4   ;;  %s4901_s25 = smov %s3304_s26 }
 0x993   : > { %s4902_s26 = smov %s3495_s19  ;;  %s4903_s27 = smov %s3312_s28 }
 0x994   : > { %s4904_s28 = smov %s4906_s14  ;;  %23 = sbr.rel (!%p21_p8) target bundleno = 10 (0xa), region = 124 }
 0x999   :  { %2617 = vsyncpa [#allocation7], 1 }
 0x99a   :  { %2619 = vsyncpa [#allocation7 + $0x1], 1 }
 0x99b   :  { %2620 = vsyncpa [#allocation10], 1 }
 0x99c   :  { %2621 = vsyncpa [#allocation13], 1 }
 0x99d   :  { %2622 = vsyncpa [#allocation16], 1 }
 0x99e   :  { %2623 = vsyncpa [#allocation8], 1 }
 0x99f   :  { %2625 = vsyncpa [#allocation8 + $0x1], 1 }

</bundles_post_ra>
